<compile_context>
chip_gen: v5e
topology: v5e:2x2
jax: 0.10.0
libtpu: 0.0.40
codegen_flags: <defaults>
</compile_context>

<pallas_src>
import numpy as np
import jax
import jax.numpy as jnp
from jax.experimental import pallas as pl
from jax.experimental.pallas import tpu as pltpu

# ---------------- model config (small, consistent with the module) ----------
IMG = 16           # img_size
PATCH = 4          # patch_size
IN_CH = 3          # in_channels
EMBED = 32         # embed_dim
DEPTH = 2          # number of encoder blocks
HEADS = 4          # num_heads
FF = 64            # ff_dim
NUM_CLASSES = 10
N_PATCHES = (IMG // PATCH) ** 2          # 16
SEQ = N_PATCHES + 1                      # 17 (cls token + patches)
HEAD_DIM = EMBED // HEADS                # 8
PATCH_K = IN_CH * PATCH * PATCH          # 48
LN_EPS = 1e-5


# ---------------- small math helpers (usable inside and outside kernels) ----
def _erf(x):
    # Abramowitz & Stegun 7.1.26 rational approximation, |error| <= 1.5e-7.
    a1, a2, a3, a4, a5 = 0.254829592, -0.284496736, 1.421413741, -1.453152027, 1.061405429
    p = 0.3275911
    ax = jnp.abs(x)
    t = 1.0 / (1.0 + p * ax)
    poly = ((((a5 * t + a4) * t + a3) * t + a2) * t + a1) * t
    y = 1.0 - poly * jnp.exp(-ax * ax)
    return jnp.where(x >= 0, y, -y)


def _gelu(x):
    # exact (erf-based) GELU, matching nn.GELU() default
    return 0.5 * x * (1.0 + _erf(x * (1.0 / np.sqrt(2.0))))


def _layernorm(x, w, b):
    mu = jnp.mean(x, axis=-1, keepdims=True)
    var = jnp.mean((x - mu) ** 2, axis=-1, keepdims=True)
    return (x - mu) * jax.lax.rsqrt(var + LN_EPS) * w + b


# ---------------- fully fused ViT forward kernel ------------------------------
def _vit_fused_kernel(patches_ref, pw_ref, base_ref, bias_ref, sel_ref,
                      wq_ref, bq_ref, wk_ref, bk_ref, wv_ref, bv_ref,
                      wo_ref, bo_ref, ln1w_ref, ln1b_ref,
                      w1_ref, b1_ref, w2_ref, b2_ref, ln2w_ref, ln2b_ref,
                      hlnw_ref, hlnb_ref, hw_ref, hb_ref, o_ref):
    # Patch projection + cls/pos fold:  [B*S, K] @ [K, D] + base -> [B*S, D].
    # cls rows of `patches` are zero rows; `base` already contains
    # (cls + pos[0]) on cls rows and (patch_bias + pos[i]) on token rows.
    h = jnp.dot(patches_ref[...], pw_ref[...],
                preferred_element_type=jnp.float32) + base_ref[...]

    bias = bias_ref[...]                 # [B*S, B*S] block-diagonal (0 / -1e30)
    scale = 1.0 / np.sqrt(HEAD_DIM)

    for d in range(DEPTH):               # static unroll (DEPTH = 2)
        attn = None
        for hh in range(HEADS):          # static unroll (HEADS = 4)
            i = d * HEADS + hh
            # Per-head projections via leading-axis-indexed weights
            # (no lane-offset slicing of activations).
            q = jnp.dot(h, wq_ref[i], preferred_element_type=jnp.float32) + bq_ref[i]
            k = jnp.dot(h, wk_ref[i], preferred_element_type=jnp.float32) + bk_ref[i]
            v = jnp.dot(h, wv_ref[i], preferred_element_type=jnp.float32) + bv_ref[i]
            # scores over all B*S rows; cross-batch entries masked to -1e30
            s = jax.lax.dot_general(q, k, (((1,), (1,)), ((), ())),
                                    preferred_element_type=jnp.float32) * scale + bias
            s = s - jnp.max(s, axis=-1, keepdims=True)
            e = jnp.exp(s)
            # divide -> EUP reciprocal (approx) + VPU multiply
            p = e * pl.reciprocal(jnp.sum(e, axis=-1, keepdims=True), approx=True)
            oh = jnp.dot(p, v, preferred_element_type=jnp.float32)           # [B*S, hd]
            # head merge folded into the output projection (accumulate, no concat)
            c = jnp.dot(oh, wo_ref[i], preferred_element_type=jnp.float32)   # [B*S, D]
            attn = c if attn is None else attn + c
        attn = attn + bo_ref[d]

        # residual + LayerNorm 1 (dropout == identity, eval semantics)
        h1 = _layernorm(h + attn, ln1w_ref[d], ln1b_ref[d])

        # feed-forward: Linear -> GELU -> Linear
        f = jnp.dot(h1, w1_ref[d], preferred_element_type=jnp.float32) + b1_ref[d]
        f = _gelu(f)
        f = jnp.dot(f, w2_ref[d], preferred_element_type=jnp.float32) + b2_ref[d]

        # residual + LayerNorm 2
        h = _layernorm(h1 + f, ln2w_ref[d], ln2b_ref[d])

    # cls-row extraction as a tiny one-hot matmul (no unaligned sublane gather)
    cls = jnp.dot(sel_ref[...], h, preferred_element_type=jnp.float32)       # [B, D]
    z = _layernorm(cls, hlnw_ref[...], hlnb_ref[...])
    o_ref[...] = jnp.dot(z, hw_ref[...], preferred_element_type=jnp.float32) + hb_ref[...]


# ---------------- one-time host-side parameter re-layout ----------------------
def prepare_params(params):
    """Transposes, per-head splits, bias reshapes and depth-stacking, done ONCE."""
    D, hd = EMBED, HEAD_DIM
    wq, wk, wv, bq, bk, bv, wo_h = [], [], [], [], [], [], []
    bo, ln1w, ln1b, w1_t, b1, w2_t, b2, ln2w, ln2b = [], [], [], [], [], [], [], [], []
    for blk in params['blocks']:
        wqkv, bqkv = blk['wqkv'], blk['bqkv']          # [3D, D], [3D]
        wo_t = blk['wo'].T                             # [D, D]
        for h in range(HEADS):
            sl = slice(h * hd, (h + 1) * hd)
            wq.append(wqkv[0 * D:1 * D][sl].T)         # [D, hd]
            wk.append(wqkv[1 * D:2 * D][sl].T)
            wv.append(wqkv[2 * D:3 * D][sl].T)
            bq.append(bqkv[0 * D:1 * D][sl].reshape(1, hd))
            bk.append(bqkv[1 * D:2 * D][sl].reshape(1, hd))
            bv.append(bqkv[2 * D:3 * D][sl].reshape(1, hd))
            wo_h.append(wo_t[sl])                      # [hd, D]
        bo.append(blk['bo'].reshape(1, D))
        ln1w.append(blk['ln1w'].reshape(1, D)); ln1b.append(blk['ln1b'].reshape(1, D))
        w1_t.append(blk['w1'].T); b1.append(blk['b1'].reshape(1, FF))
        w2_t.append(blk['w2'].T); b2.append(blk['b2'].reshape(1, D))
        ln2w.append(blk['ln2w'].reshape(1, D)); ln2b.append(blk['ln2b'].reshape(1, D))

    # per-sequence additive base: row0 = cls + pos[0]; row i>0 = patch_bias + pos[i]
    base_seq = params['pos'][0] + jnp.concatenate(
        [params['cls'].reshape(1, D),
         jnp.broadcast_to(params['patch_b'].reshape(1, D), (N_PATCHES, D))], axis=0)

    return dict(
        pw_t=params['patch_w'].T,                      # [K, D]
        base_seq=base_seq,                             # [S, D]
        wq=jnp.stack(wq), wk=jnp.stack(wk), wv=jnp.stack(wv),   # [DEPTH*H, D, hd]
        bq=jnp.stack(bq), bk=jnp.stack(bk), bv=jnp.stack(bv),   # [DEPTH*H, 1, hd]
        wo=jnp.stack(wo_h),                            # [DEPTH*H, hd, D]
        bo=jnp.stack(bo),
        ln1w=jnp.stack(ln1w), ln1b=jnp.stack(ln1b),
        w1=jnp.stack(w1_t), b1=jnp.stack(b1),
        w2=jnp.stack(w2_t), b2=jnp.stack(b2),
        ln2w=jnp.stack(ln2w), ln2b=jnp.stack(ln2b),
        hlnw=params['head_lnw'].reshape(1, D), hlnb=params['head_lnb'].reshape(1, D),
        hw=params['head_w'].T, hb=params['head_b'].reshape(1, NUM_CLASSES),
    )


# ---------------- wrapper ------------------------------------------------------
_VMEM = pl.BlockSpec(memory_space=pltpu.MemorySpace.VMEM)


def vit_forward(x, prep):
    """x: [B, C, H, W] float32 (NCHW). `prep` = prepare_params(...) output."""
    B = x.shape[0]
    N = B * SEQ
    p = PATCH

    # Host-side glue: patch extraction (pure data re-layout, no compute).
    patches = x.reshape(B, IN_CH, IMG // p, p, IMG // p, p)
    patches = patches.transpose(0, 2, 4, 1, 3, 5).reshape(B, N_PATCHES, PATCH_K)
    # Zero row at each cls position -> one in-kernel matmul yields [B*S, D].
    patches = jnp.concatenate(
        [jnp.zeros((B, 1, PATCH_K), jnp.float32), patches], axis=1).reshape(N, PATCH_K)

    base = jnp.tile(prep['base_seq'], (B, 1))                       # [B*S, D]

    # Trace-time constants: block-diagonal attention mask + cls-row selector.
    bid = np.arange(N) // SEQ
    attn_bias = jnp.asarray(
        np.where(bid[:, None] == bid[None, :], 0.0, -1e30).astype(np.float32))
    sel_np = np.zeros((B, N), np.float32)
    sel_np[np.arange(B), np.arange(B) * SEQ] = 1.0
    sel = jnp.asarray(sel_np)

    args = (patches, prep['pw_t'], base, attn_bias, sel,
            prep['wq'], prep['bq'], prep['wk'], prep['bk'], prep['wv'], prep['bv'],
            prep['wo'], prep['bo'], prep['ln1w'], prep['ln1b'],
            prep['w1'], prep['b1'], prep['w2'], prep['b2'], prep['ln2w'], prep['ln2b'],
            prep['hlnw'], prep['hlnb'], prep['hw'], prep['hb'])

    return pl.pallas_call(
        _vit_fused_kernel,
        out_shape=jax.ShapeDtypeStruct((B, NUM_CLASSES), jnp.float32),
        in_specs=[_VMEM] * len(args),
        out_specs=_VMEM,
    )(*args)


# ---------------- pure-JAX reference (same math, for verification) -----------
def _ln_ref(x, w, b):
    mu = x.mean(-1, keepdims=True)
    var = ((x - mu) ** 2).mean(-1, keepdims=True)
    return (x - mu) * jax.lax.rsqrt(var + LN_EPS) * w + b


def vit_forward_ref(x, params):
    B = x.shape[0]
    p = PATCH
    patches = x.reshape(B, IN_CH, IMG // p, p, IMG // p, p)
    patches = patches.transpose(0, 2, 4, 1, 3, 5).reshape(B, N_PATCHES, PATCH_K)
    tokens = patches @ params['patch_w'].T + params['patch_b']
    h = jnp.concatenate([jnp.broadcast_to(params['cls'], (B, 1, EMBED)), tokens],
                        axis=1) + params['pos']
    for blk in params['blocks']:
        qkv = h @ blk['wqkv'].T + blk['bqkv']
        q, k, v = jnp.split(qkv, 3, axis=-1)
        q = q.reshape(B, SEQ, HEADS, HEAD_DIM)
        k = k.reshape(B, SEQ, HEADS, HEAD_DIM)
        v = v.reshape(B, SEQ, HEADS, HEAD_DIM)
        s = jnp.einsum('bqhd,bkhd->bhqk', q, k) / np.sqrt(HEAD_DIM)
        pr = jax.nn.softmax(s, axis=-1)
        a = jnp.einsum('bhqk,bkhd->bqhd', pr, v).reshape(B, SEQ, EMBED)
        a = a @ blk['wo'].T + blk['bo']
        h1 = _ln_ref(h + a, blk['ln1w'], blk['ln1b'])
        f = _gelu(h1 @ blk['w1'].T + blk['b1']) @ blk['w2'].T + blk['b2']
        h = _ln_ref(h1 + f, blk['ln2w'], blk['ln2b'])
    cls_out = h[:, 0, :]
    return _ln_ref(cls_out, params['head_lnw'], params['head_lnb']) \
        @ params['head_w'].T + params['head_b']


# ---------------- deterministic parameter init --------------------------------
def init_params(key):
    keys = iter(jax.random.split(key, 8 + DEPTH * 8))

    def nrm(shape, scale=0.05):
        return (scale * jax.random.normal(next(keys), shape)).astype(jnp.float32)

    params = {
        'patch_w': nrm((EMBED, PATCH_K)),   # torch Conv2d weight [D, C, p, p] flattened
        'patch_b': nrm((EMBED,), 0.02),
        'cls': nrm((1, 1, EMBED), 0.02),
        'pos': nrm((1, SEQ, EMBED), 0.02),
        'head_lnw': jnp.ones((EMBED,), jnp.float32),
        'head_lnb': jnp.zeros((EMBED,), jnp.float32),
        'head_w': nrm((NUM_CLASSES, EMBED)),
        'head_b': nrm((NUM_CLASSES,), 0.02),
    }
    blocks = []
    for _ in range(DEPTH):
        blocks.append(dict(
            wqkv=nrm((3 * EMBED, EMBED)),   # in_proj_weight
            bqkv=nrm((3 * EMBED,), 0.02),
            wo=nrm((EMBED, EMBED)),         # out_proj
            bo=nrm((EMBED,), 0.02),
            ln1w=jnp.ones((EMBED,), jnp.float32),
            ln1b=jnp.zeros((EMBED,), jnp.float32),
            w1=nrm((FF, EMBED)),
            b1=nrm((FF,), 0.02),
            w2=nrm((EMBED, FF)),
            b2=nrm((EMBED,), 0.02),
            ln2w=jnp.ones((EMBED,), jnp.float32),
            ln2b=jnp.zeros((EMBED,), jnp.float32),
        ))
    params['blocks'] = blocks
    return params


# ---------------- main --------------------------------------------------------
if __name__ == "__main__":
    key = jax.random.PRNGKey(0)
    kx, kp = jax.random.split(key)
    x = jax.random.normal(kx, (2, IN_CH, IMG, IMG), dtype=jnp.float32)  # NCHW
    params = init_params(kp)
    prep = prepare_params(params)     # one-time weight re-layout (NOT per forward)

    fwd = jax.jit(vit_forward)
    out = jax.block_until_ready(fwd(x, prep))

    ref = jax.block_until_ready(vit_forward_ref(x, params))
    # tolerance covers the EUP approximate-reciprocal softmax and the erf approx
    np.testing.assert_allclose(np.asarray(out), np.asarray(ref), atol=2e-3, rtol=2e-3)
    assert out.shape == (2, NUM_CLASSES)

    print("KERNEL_OK")
</pallas_src>

<mosaic_0001>
module attributes {stable_mosaic.version = 11 : i64} {
  func.func @_vit_fused_kernel(%arg0: memref<34x48xf32, #tpu.memory_space<vmem>>, %arg1: memref<48x32xf32, #tpu.memory_space<vmem>>, %arg2: memref<34x32xf32, #tpu.memory_space<vmem>>, %arg3: memref<34x34xf32, #tpu.memory_space<vmem>>, %arg4: memref<2x34xf32, #tpu.memory_space<vmem>>, %arg5: memref<8x32x8xf32, #tpu.memory_space<vmem>>, %arg6: memref<8x1x8xf32, #tpu.memory_space<vmem>>, %arg7: memref<8x32x8xf32, #tpu.memory_space<vmem>>, %arg8: memref<8x1x8xf32, #tpu.memory_space<vmem>>, %arg9: memref<8x32x8xf32, #tpu.memory_space<vmem>>, %arg10: memref<8x1x8xf32, #tpu.memory_space<vmem>>, %arg11: memref<8x8x32xf32, #tpu.memory_space<vmem>>, %arg12: memref<2x1x32xf32, #tpu.memory_space<vmem>>, %arg13: memref<2x1x32xf32, #tpu.memory_space<vmem>>, %arg14: memref<2x1x32xf32, #tpu.memory_space<vmem>>, %arg15: memref<2x32x64xf32, #tpu.memory_space<vmem>>, %arg16: memref<2x1x64xf32, #tpu.memory_space<vmem>>, %arg17: memref<2x64x32xf32, #tpu.memory_space<vmem>>, %arg18: memref<2x1x32xf32, #tpu.memory_space<vmem>>, %arg19: memref<2x1x32xf32, #tpu.memory_space<vmem>>, %arg20: memref<2x1x32xf32, #tpu.memory_space<vmem>>, %arg21: memref<1x32xf32, #tpu.memory_space<vmem>>, %arg22: memref<1x32xf32, #tpu.memory_space<vmem>>, %arg23: memref<32x10xf32, #tpu.memory_space<vmem>>, %arg24: memref<1x10xf32, #tpu.memory_space<vmem>>, %arg25: memref<2x10xf32, #tpu.memory_space<vmem>>) attributes {dimension_semantics = [], scalar_prefetch = 0 : i64, scratch_operands = 0 : i64, tpu.core_type = #tpu.core_type<tc>} {
    %c0 = arith.constant 0 : index
    %c0_0 = arith.constant 0 : index
    %0 = vector.load %arg0[%c0, %c0_0] : memref<34x48xf32, #tpu.memory_space<vmem>>, vector<34x48xf32>
    %c0_1 = arith.constant 0 : index
    %c0_2 = arith.constant 0 : index
    %1 = vector.load %arg1[%c0_1, %c0_2] : memref<48x32xf32, #tpu.memory_space<vmem>>, vector<48x32xf32>
    %cst = arith.constant dense<0.000000e+00> : vector<34x32xf32>
    %2 = tpu.matmul %0, %1, %cst {dimension_numbers = #tpu.dot_dimension_numbers<[1], [0], [0], [1], [0, 0, 1, 1], [], []>} : vector<34x48xf32>, vector<48x32xf32>, vector<34x32xf32> -> vector<34x32xf32>
    %c0_3 = arith.constant 0 : index
    %c0_4 = arith.constant 0 : index
    %3 = vector.load %arg2[%c0_3, %c0_4] : memref<34x32xf32, #tpu.memory_space<vmem>>, vector<34x32xf32>
    %4 = arith.addf %2, %3 : vector<34x32xf32>
    %c0_5 = arith.constant 0 : index
    %c0_6 = arith.constant 0 : index
    %5 = vector.load %arg3[%c0_5, %c0_6] : memref<34x34xf32, #tpu.memory_space<vmem>>, vector<34x34xf32>
    %c0_7 = arith.constant 0 : index
    %c0_8 = arith.constant 0 : index
    %c0_9 = arith.constant 0 : index
    %6 = vector.load %arg5[%c0_7, %c0_8, %c0_9] : memref<8x32x8xf32, #tpu.memory_space<vmem>>, vector<1x32x8xf32>
    %7 = vector.shape_cast %6 : vector<1x32x8xf32> to vector<32x8xf32>
    %cst_10 = arith.constant dense<0.000000e+00> : vector<34x8xf32>
    %8 = tpu.matmul %4, %7, %cst_10 {dimension_numbers = #tpu.dot_dimension_numbers<[1], [0], [0], [1], [0, 0, 1, 1], [], []>} : vector<34x32xf32>, vector<32x8xf32>, vector<34x8xf32> -> vector<34x8xf32>
    %c0_11 = arith.constant 0 : index
    %c0_12 = arith.constant 0 : index
    %c0_13 = arith.constant 0 : index
    %9 = vector.load %arg6[%c0_11, %c0_12, %c0_13] : memref<8x1x8xf32, #tpu.memory_space<vmem>>, vector<1x1x8xf32>
    %10 = vector.shape_cast %9 : vector<1x1x8xf32> to vector<1x8xf32>
    %11 = vector.broadcast %10 : vector<1x8xf32> to vector<34x8xf32>
    %12 = arith.addf %8, %11 : vector<34x8xf32>
    %c0_14 = arith.constant 0 : index
    %c0_15 = arith.constant 0 : index
    %c0_16 = arith.constant 0 : index
    %13 = vector.load %arg7[%c0_14, %c0_15, %c0_16] : memref<8x32x8xf32, #tpu.memory_space<vmem>>, vector<1x32x8xf32>
    %14 = vector.shape_cast %13 : vector<1x32x8xf32> to vector<32x8xf32>
    %cst_17 = arith.constant dense<0.000000e+00> : vector<34x8xf32>
    %15 = tpu.matmul %4, %14, %cst_17 {dimension_numbers = #tpu.dot_dimension_numbers<[1], [0], [0], [1], [0, 0, 1, 1], [], []>} : vector<34x32xf32>, vector<32x8xf32>, vector<34x8xf32> -> vector<34x8xf32>
    %c0_18 = arith.constant 0 : index
    %c0_19 = arith.constant 0 : index
    %c0_20 = arith.constant 0 : index
    %16 = vector.load %arg8[%c0_18, %c0_19, %c0_20] : memref<8x1x8xf32, #tpu.memory_space<vmem>>, vector<1x1x8xf32>
    %17 = vector.shape_cast %16 : vector<1x1x8xf32> to vector<1x8xf32>
    %18 = vector.broadcast %17 : vector<1x8xf32> to vector<34x8xf32>
    %19 = arith.addf %15, %18 : vector<34x8xf32>
    %c0_21 = arith.constant 0 : index
    %c0_22 = arith.constant 0 : index
    %c0_23 = arith.constant 0 : index
    %20 = vector.load %arg9[%c0_21, %c0_22, %c0_23] : memref<8x32x8xf32, #tpu.memory_space<vmem>>, vector<1x32x8xf32>
    %21 = vector.shape_cast %20 : vector<1x32x8xf32> to vector<32x8xf32>
    %cst_24 = arith.constant dense<0.000000e+00> : vector<34x8xf32>
    %22 = tpu.matmul %4, %21, %cst_24 {dimension_numbers = #tpu.dot_dimension_numbers<[1], [0], [0], [1], [0, 0, 1, 1], [], []>} : vector<34x32xf32>, vector<32x8xf32>, vector<34x8xf32> -> vector<34x8xf32>
    %c0_25 = arith.constant 0 : index
    %c0_26 = arith.constant 0 : index
    %c0_27 = arith.constant 0 : index
    %23 = vector.load %arg10[%c0_25, %c0_26, %c0_27] : memref<8x1x8xf32, #tpu.memory_space<vmem>>, vector<1x1x8xf32>
    %24 = vector.shape_cast %23 : vector<1x1x8xf32> to vector<1x8xf32>
    %25 = vector.broadcast %24 : vector<1x8xf32> to vector<34x8xf32>
    %26 = arith.addf %22, %25 : vector<34x8xf32>
    %cst_28 = arith.constant dense<0.000000e+00> : vector<34x34xf32>
    %27 = tpu.matmul %12, %19, %cst_28 {dimension_numbers = #tpu.dot_dimension_numbers<[1], [1], [0], [0], [0, 0, 1, 0], [], []>} : vector<34x8xf32>, vector<34x8xf32>, vector<34x34xf32> -> vector<34x34xf32>
    %cst_29 = arith.constant 0.353553385 : f32
    %28 = vector.broadcast %cst_29 : f32 to vector<34x34xf32>
    %29 = arith.mulf %27, %28 : vector<34x34xf32>
    %30 = arith.addf %29, %5 : vector<34x34xf32>
    %cst_30 = arith.constant dense<0xFF800000> : vector<34xf32>
    %31 = vector.multi_reduction <maximumf>, %30, %cst_30 [1] : vector<34x34xf32> to vector<34xf32>
    %32 = vector.shape_cast %31 : vector<34xf32> to vector<34x1xf32>
    %33 = vector.broadcast %32 : vector<34x1xf32> to vector<34x34xf32>
    %34 = arith.subf %30, %33 : vector<34x34xf32>
    %35 = math.exp %34 : vector<34x34xf32>
    %cst_31 = arith.constant dense<0.000000e+00> : vector<34xf32>
    %36 = vector.multi_reduction <add>, %35, %cst_31 [1] : vector<34x34xf32> to vector<34xf32>
    %37 = vector.shape_cast %36 : vector<34xf32> to vector<34x1xf32>
    %38 = tpu.reciprocal %37 {approx = true} : vector<34x1xf32> -> vector<34x1xf32>
    %39 = vector.broadcast %38 : vector<34x1xf32> to vector<34x34xf32>
    %40 = arith.mulf %35, %39 : vector<34x34xf32>
    %cst_32 = arith.constant dense<0.000000e+00> : vector<34x8xf32>
    %41 = tpu.matmul %40, %26, %cst_32 {dimension_numbers = #tpu.dot_dimension_numbers<[1], [0], [0], [1], [0, 0, 1, 1], [], []>} : vector<34x34xf32>, vector<34x8xf32>, vector<34x8xf32> -> vector<34x8xf32>
    %c0_33 = arith.constant 0 : index
    %c0_34 = arith.constant 0 : index
    %c0_35 = arith.constant 0 : index
    %42 = vector.load %arg11[%c0_33, %c0_34, %c0_35] : memref<8x8x32xf32, #tpu.memory_space<vmem>>, vector<1x8x32xf32>
    %43 = vector.shape_cast %42 : vector<1x8x32xf32> to vector<8x32xf32>
    %cst_36 = arith.constant dense<0.000000e+00> : vector<34x32xf32>
    %44 = tpu.matmul %41, %43, %cst_36 {dimension_numbers = #tpu.dot_dimension_numbers<[1], [0], [0], [1], [0, 0, 1, 1], [], []>} : vector<34x8xf32>, vector<8x32xf32>, vector<34x32xf32> -> vector<34x32xf32>
    %c1 = arith.constant 1 : index
    %c0_37 = arith.constant 0 : index
    %c0_38 = arith.constant 0 : index
    %45 = vector.load %arg5[%c1, %c0_37, %c0_38] : memref<8x32x8xf32, #tpu.memory_space<vmem>>, vector<1x32x8xf32>
    %46 = vector.shape_cast %45 : vector<1x32x8xf32> to vector<32x8xf32>
    %cst_39 = arith.constant dense<0.000000e+00> : vector<34x8xf32>
    %47 = tpu.matmul %4, %46, %cst_39 {dimension_numbers = #tpu.dot_dimension_numbers<[1], [0], [0], [1], [0, 0, 1, 1], [], []>} : vector<34x32xf32>, vector<32x8xf32>, vector<34x8xf32> -> vector<34x8xf32>
    %c1_40 = arith.constant 1 : index
    %c0_41 = arith.constant 0 : index
    %c0_42 = arith.constant 0 : index
    %48 = vector.load %arg6[%c1_40, %c0_41, %c0_42] : memref<8x1x8xf32, #tpu.memory_space<vmem>>, vector<1x1x8xf32>
    %49 = vector.shape_cast %48 : vector<1x1x8xf32> to vector<1x8xf32>
    %50 = vector.broadcast %49 : vector<1x8xf32> to vector<34x8xf32>
    %51 = arith.addf %47, %50 : vector<34x8xf32>
    %c1_43 = arith.constant 1 : index
    %c0_44 = arith.constant 0 : index
    %c0_45 = arith.constant 0 : index
    %52 = vector.load %arg7[%c1_43, %c0_44, %c0_45] : memref<8x32x8xf32, #tpu.memory_space<vmem>>, vector<1x32x8xf32>
    %53 = vector.shape_cast %52 : vector<1x32x8xf32> to vector<32x8xf32>
    %cst_46 = arith.constant dense<0.000000e+00> : vector<34x8xf32>
    %54 = tpu.matmul %4, %53, %cst_46 {dimension_numbers = #tpu.dot_dimension_numbers<[1], [0], [0], [1], [0, 0, 1, 1], [], []>} : vector<34x32xf32>, vector<32x8xf32>, vector<34x8xf32> -> vector<34x8xf32>
    %c1_47 = arith.constant 1 : index
    %c0_48 = arith.constant 0 : index
    %c0_49 = arith.constant 0 : index
    %55 = vector.load %arg8[%c1_47, %c0_48, %c0_49] : memref<8x1x8xf32, #tpu.memory_space<vmem>>, vector<1x1x8xf32>
    %56 = vector.shape_cast %55 : vector<1x1x8xf32> to vector<1x8xf32>
    %57 = vector.broadcast %56 : vector<1x8xf32> to vector<34x8xf32>
    %58 = arith.addf %54, %57 : vector<34x8xf32>
    %c1_50 = arith.constant 1 : index
    %c0_51 = arith.constant 0 : index
    %c0_52 = arith.constant 0 : index
    %59 = vector.load %arg9[%c1_50, %c0_51, %c0_52] : memref<8x32x8xf32, #tpu.memory_space<vmem>>, vector<1x32x8xf32>
    %60 = vector.shape_cast %59 : vector<1x32x8xf32> to vector<32x8xf32>
    %cst_53 = arith.constant dense<0.000000e+00> : vector<34x8xf32>
    %61 = tpu.matmul %4, %60, %cst_53 {dimension_numbers = #tpu.dot_dimension_numbers<[1], [0], [0], [1], [0, 0, 1, 1], [], []>} : vector<34x32xf32>, vector<32x8xf32>, vector<34x8xf32> -> vector<34x8xf32>
    %c1_54 = arith.constant 1 : index
    %c0_55 = arith.constant 0 : index
    %c0_56 = arith.constant 0 : index
    %62 = vector.load %arg10[%c1_54, %c0_55, %c0_56] : memref<8x1x8xf32, #tpu.memory_space<vmem>>, vector<1x1x8xf32>
    %63 = vector.shape_cast %62 : vector<1x1x8xf32> to vector<1x8xf32>
    %64 = vector.broadcast %63 : vector<1x8xf32> to vector<34x8xf32>
    %65 = arith.addf %61, %64 : vector<34x8xf32>
    %cst_57 = arith.constant dense<0.000000e+00> : vector<34x34xf32>
    %66 = tpu.matmul %51, %58, %cst_57 {dimension_numbers = #tpu.dot_dimension_numbers<[1], [1], [0], [0], [0, 0, 1, 0], [], []>} : vector<34x8xf32>, vector<34x8xf32>, vector<34x34xf32> -> vector<34x34xf32>
    %cst_58 = arith.constant 0.353553385 : f32
    %67 = vector.broadcast %cst_58 : f32 to vector<34x34xf32>
    %68 = arith.mulf %66, %67 : vector<34x34xf32>
    %69 = arith.addf %68, %5 : vector<34x34xf32>
    %cst_59 = arith.constant dense<0xFF800000> : vector<34xf32>
    %70 = vector.multi_reduction <maximumf>, %69, %cst_59 [1] : vector<34x34xf32> to vector<34xf32>
    %71 = vector.shape_cast %70 : vector<34xf32> to vector<34x1xf32>
    %72 = vector.broadcast %71 : vector<34x1xf32> to vector<34x34xf32>
    %73 = arith.subf %69, %72 : vector<34x34xf32>
    %74 = math.exp %73 : vector<34x34xf32>
    %cst_60 = arith.constant dense<0.000000e+00> : vector<34xf32>
    %75 = vector.multi_reduction <add>, %74, %cst_60 [1] : vector<34x34xf32> to vector<34xf32>
    %76 = vector.shape_cast %75 : vector<34xf32> to vector<34x1xf32>
    %77 = tpu.reciprocal %76 {approx = true} : vector<34x1xf32> -> vector<34x1xf32>
    %78 = vector.broadcast %77 : vector<34x1xf32> to vector<34x34xf32>
    %79 = arith.mulf %74, %78 : vector<34x34xf32>
    %cst_61 = arith.constant dense<0.000000e+00> : vector<34x8xf32>
    %80 = tpu.matmul %79, %65, %cst_61 {dimension_numbers = #tpu.dot_dimension_numbers<[1], [0], [0], [1], [0, 0, 1, 1], [], []>} : vector<34x34xf32>, vector<34x8xf32>, vector<34x8xf32> -> vector<34x8xf32>
    %c1_62 = arith.constant 1 : index
    %c0_63 = arith.constant 0 : index
    %c0_64 = arith.constant 0 : index
    %81 = vector.load %arg11[%c1_62, %c0_63, %c0_64] : memref<8x8x32xf32, #tpu.memory_space<vmem>>, vector<1x8x32xf32>
    %82 = vector.shape_cast %81 : vector<1x8x32xf32> to vector<8x32xf32>
    %cst_65 = arith.constant dense<0.000000e+00> : vector<34x32xf32>
    %83 = tpu.matmul %80, %82, %cst_65 {dimension_numbers = #tpu.dot_dimension_numbers<[1], [0], [0], [1], [0, 0, 1, 1], [], []>} : vector<34x8xf32>, vector<8x32xf32>, vector<34x32xf32> -> vector<34x32xf32>
    %84 = arith.addf %44, %83 : vector<34x32xf32>
    %c2 = arith.constant 2 : index
    %c0_66 = arith.constant 0 : index
    %c0_67 = arith.constant 0 : index
    %85 = vector.load %arg5[%c2, %c0_66, %c0_67] : memref<8x32x8xf32, #tpu.memory_space<vmem>>, vector<1x32x8xf32>
    %86 = vector.shape_cast %85 : vector<1x32x8xf32> to vector<32x8xf32>
    %cst_68 = arith.constant dense<0.000000e+00> : vector<34x8xf32>
    %87 = tpu.matmul %4, %86, %cst_68 {dimension_numbers = #tpu.dot_dimension_numbers<[1], [0], [0], [1], [0, 0, 1, 1], [], []>} : vector<34x32xf32>, vector<32x8xf32>, vector<34x8xf32> -> vector<34x8xf32>
    %c2_69 = arith.constant 2 : index
    %c0_70 = arith.constant 0 : index
    %c0_71 = arith.constant 0 : index
    %88 = vector.load %arg6[%c2_69, %c0_70, %c0_71] : memref<8x1x8xf32, #tpu.memory_space<vmem>>, vector<1x1x8xf32>
    %89 = vector.shape_cast %88 : vector<1x1x8xf32> to vector<1x8xf32>
    %90 = vector.broadcast %89 : vector<1x8xf32> to vector<34x8xf32>
    %91 = arith.addf %87, %90 : vector<34x8xf32>
    %c2_72 = arith.constant 2 : index
    %c0_73 = arith.constant 0 : index
    %c0_74 = arith.constant 0 : index
    %92 = vector.load %arg7[%c2_72, %c0_73, %c0_74] : memref<8x32x8xf32, #tpu.memory_space<vmem>>, vector<1x32x8xf32>
    %93 = vector.shape_cast %92 : vector<1x32x8xf32> to vector<32x8xf32>
    %cst_75 = arith.constant dense<0.000000e+00> : vector<34x8xf32>
    %94 = tpu.matmul %4, %93, %cst_75 {dimension_numbers = #tpu.dot_dimension_numbers<[1], [0], [0], [1], [0, 0, 1, 1], [], []>} : vector<34x32xf32>, vector<32x8xf32>, vector<34x8xf32> -> vector<34x8xf32>
    %c2_76 = arith.constant 2 : index
    %c0_77 = arith.constant 0 : index
    %c0_78 = arith.constant 0 : index
    %95 = vector.load %arg8[%c2_76, %c0_77, %c0_78] : memref<8x1x8xf32, #tpu.memory_space<vmem>>, vector<1x1x8xf32>
    %96 = vector.shape_cast %95 : vector<1x1x8xf32> to vector<1x8xf32>
    %97 = vector.broadcast %96 : vector<1x8xf32> to vector<34x8xf32>
    %98 = arith.addf %94, %97 : vector<34x8xf32>
    %c2_79 = arith.constant 2 : index
    %c0_80 = arith.constant 0 : index
    %c0_81 = arith.constant 0 : index
    %99 = vector.load %arg9[%c2_79, %c0_80, %c0_81] : memref<8x32x8xf32, #tpu.memory_space<vmem>>, vector<1x32x8xf32>
    %100 = vector.shape_cast %99 : vector<1x32x8xf32> to vector<32x8xf32>
    %cst_82 = arith.constant dense<0.000000e+00> : vector<34x8xf32>
    %101 = tpu.matmul %4, %100, %cst_82 {dimension_numbers = #tpu.dot_dimension_numbers<[1], [0], [0], [1], [0, 0, 1, 1], [], []>} : vector<34x32xf32>, vector<32x8xf32>, vector<34x8xf32> -> vector<34x8xf32>
    %c2_83 = arith.constant 2 : index
    %c0_84 = arith.constant 0 : index
    %c0_85 = arith.constant 0 : index
    %102 = vector.load %arg10[%c2_83, %c0_84, %c0_85] : memref<8x1x8xf32, #tpu.memory_space<vmem>>, vector<1x1x8xf32>
    %103 = vector.shape_cast %102 : vector<1x1x8xf32> to vector<1x8xf32>
    %104 = vector.broadcast %103 : vector<1x8xf32> to vector<34x8xf32>
    %105 = arith.addf %101, %104 : vector<34x8xf32>
    %cst_86 = arith.constant dense<0.000000e+00> : vector<34x34xf32>
    %106 = tpu.matmul %91, %98, %cst_86 {dimension_numbers = #tpu.dot_dimension_numbers<[1], [1], [0], [0], [0, 0, 1, 0], [], []>} : vector<34x8xf32>, vector<34x8xf32>, vector<34x34xf32> -> vector<34x34xf32>
    %cst_87 = arith.constant 0.353553385 : f32
    %107 = vector.broadcast %cst_87 : f32 to vector<34x34xf32>
    %108 = arith.mulf %106, %107 : vector<34x34xf32>
    %109 = arith.addf %108, %5 : vector<34x34xf32>
    %cst_88 = arith.constant dense<0xFF800000> : vector<34xf32>
    %110 = vector.multi_reduction <maximumf>, %109, %cst_88 [1] : vector<34x34xf32> to vector<34xf32>
    %111 = vector.shape_cast %110 : vector<34xf32> to vector<34x1xf32>
    %112 = vector.broadcast %111 : vector<34x1xf32> to vector<34x34xf32>
    %113 = arith.subf %109, %112 : vector<34x34xf32>
    %114 = math.exp %113 : vector<34x34xf32>
    %cst_89 = arith.constant dense<0.000000e+00> : vector<34xf32>
    %115 = vector.multi_reduction <add>, %114, %cst_89 [1] : vector<34x34xf32> to vector<34xf32>
    %116 = vector.shape_cast %115 : vector<34xf32> to vector<34x1xf32>
    %117 = tpu.reciprocal %116 {approx = true} : vector<34x1xf32> -> vector<34x1xf32>
    %118 = vector.broadcast %117 : vector<34x1xf32> to vector<34x34xf32>
    %119 = arith.mulf %114, %118 : vector<34x34xf32>
    %cst_90 = arith.constant dense<0.000000e+00> : vector<34x8xf32>
    %120 = tpu.matmul %119, %105, %cst_90 {dimension_numbers = #tpu.dot_dimension_numbers<[1], [0], [0], [1], [0, 0, 1, 1], [], []>} : vector<34x34xf32>, vector<34x8xf32>, vector<34x8xf32> -> vector<34x8xf32>
    %c2_91 = arith.constant 2 : index
    %c0_92 = arith.constant 0 : index
    %c0_93 = arith.constant 0 : index
    %121 = vector.load %arg11[%c2_91, %c0_92, %c0_93] : memref<8x8x32xf32, #tpu.memory_space<vmem>>, vector<1x8x32xf32>
    %122 = vector.shape_cast %121 : vector<1x8x32xf32> to vector<8x32xf32>
    %cst_94 = arith.constant dense<0.000000e+00> : vector<34x32xf32>
    %123 = tpu.matmul %120, %122, %cst_94 {dimension_numbers = #tpu.dot_dimension_numbers<[1], [0], [0], [1], [0, 0, 1, 1], [], []>} : vector<34x8xf32>, vector<8x32xf32>, vector<34x32xf32> -> vector<34x32xf32>
    %124 = arith.addf %84, %123 : vector<34x32xf32>
    %c3 = arith.constant 3 : index
    %c0_95 = arith.constant 0 : index
    %c0_96 = arith.constant 0 : index
    %125 = vector.load %arg5[%c3, %c0_95, %c0_96] : memref<8x32x8xf32, #tpu.memory_space<vmem>>, vector<1x32x8xf32>
    %126 = vector.shape_cast %125 : vector<1x32x8xf32> to vector<32x8xf32>
    %cst_97 = arith.constant dense<0.000000e+00> : vector<34x8xf32>
    %127 = tpu.matmul %4, %126, %cst_97 {dimension_numbers = #tpu.dot_dimension_numbers<[1], [0], [0], [1], [0, 0, 1, 1], [], []>} : vector<34x32xf32>, vector<32x8xf32>, vector<34x8xf32> -> vector<34x8xf32>
    %c3_98 = arith.constant 3 : index
    %c0_99 = arith.constant 0 : index
    %c0_100 = arith.constant 0 : index
    %128 = vector.load %arg6[%c3_98, %c0_99, %c0_100] : memref<8x1x8xf32, #tpu.memory_space<vmem>>, vector<1x1x8xf32>
    %129 = vector.shape_cast %128 : vector<1x1x8xf32> to vector<1x8xf32>
    %130 = vector.broadcast %129 : vector<1x8xf32> to vector<34x8xf32>
    %131 = arith.addf %127, %130 : vector<34x8xf32>
    %c3_101 = arith.constant 3 : index
    %c0_102 = arith.constant 0 : index
    %c0_103 = arith.constant 0 : index
    %132 = vector.load %arg7[%c3_101, %c0_102, %c0_103] : memref<8x32x8xf32, #tpu.memory_space<vmem>>, vector<1x32x8xf32>
    %133 = vector.shape_cast %132 : vector<1x32x8xf32> to vector<32x8xf32>
    %cst_104 = arith.constant dense<0.000000e+00> : vector<34x8xf32>
    %134 = tpu.matmul %4, %133, %cst_104 {dimension_numbers = #tpu.dot_dimension_numbers<[1], [0], [0], [1], [0, 0, 1, 1], [], []>} : vector<34x32xf32>, vector<32x8xf32>, vector<34x8xf32> -> vector<34x8xf32>
    %c3_105 = arith.constant 3 : index
    %c0_106 = arith.constant 0 : index
    %c0_107 = arith.constant 0 : index
    %135 = vector.load %arg8[%c3_105, %c0_106, %c0_107] : memref<8x1x8xf32, #tpu.memory_space<vmem>>, vector<1x1x8xf32>
    %136 = vector.shape_cast %135 : vector<1x1x8xf32> to vector<1x8xf32>
    %137 = vector.broadcast %136 : vector<1x8xf32> to vector<34x8xf32>
    %138 = arith.addf %134, %137 : vector<34x8xf32>
    %c3_108 = arith.constant 3 : index
    %c0_109 = arith.constant 0 : index
    %c0_110 = arith.constant 0 : index
    %139 = vector.load %arg9[%c3_108, %c0_109, %c0_110] : memref<8x32x8xf32, #tpu.memory_space<vmem>>, vector<1x32x8xf32>
    %140 = vector.shape_cast %139 : vector<1x32x8xf32> to vector<32x8xf32>
    %cst_111 = arith.constant dense<0.000000e+00> : vector<34x8xf32>
    %141 = tpu.matmul %4, %140, %cst_111 {dimension_numbers = #tpu.dot_dimension_numbers<[1], [0], [0], [1], [0, 0, 1, 1], [], []>} : vector<34x32xf32>, vector<32x8xf32>, vector<34x8xf32> -> vector<34x8xf32>
    %c3_112 = arith.constant 3 : index
    %c0_113 = arith.constant 0 : index
    %c0_114 = arith.constant 0 : index
    %142 = vector.load %arg10[%c3_112, %c0_113, %c0_114] : memref<8x1x8xf32, #tpu.memory_space<vmem>>, vector<1x1x8xf32>
    %143 = vector.shape_cast %142 : vector<1x1x8xf32> to vector<1x8xf32>
    %144 = vector.broadcast %143 : vector<1x8xf32> to vector<34x8xf32>
    %145 = arith.addf %141, %144 : vector<34x8xf32>
    %cst_115 = arith.constant dense<0.000000e+00> : vector<34x34xf32>
    %146 = tpu.matmul %131, %138, %cst_115 {dimension_numbers = #tpu.dot_dimension_numbers<[1], [1], [0], [0], [0, 0, 1, 0], [], []>} : vector<34x8xf32>, vector<34x8xf32>, vector<34x34xf32> -> vector<34x34xf32>
    %cst_116 = arith.constant 0.353553385 : f32
    %147 = vector.broadcast %cst_116 : f32 to vector<34x34xf32>
    %148 = arith.mulf %146, %147 : vector<34x34xf32>
    %149 = arith.addf %148, %5 : vector<34x34xf32>
    %cst_117 = arith.constant dense<0xFF800000> : vector<34xf32>
    %150 = vector.multi_reduction <maximumf>, %149, %cst_117 [1] : vector<34x34xf32> to vector<34xf32>
    %151 = vector.shape_cast %150 : vector<34xf32> to vector<34x1xf32>
    %152 = vector.broadcast %151 : vector<34x1xf32> to vector<34x34xf32>
    %153 = arith.subf %149, %152 : vector<34x34xf32>
    %154 = math.exp %153 : vector<34x34xf32>
    %cst_118 = arith.constant dense<0.000000e+00> : vector<34xf32>
    %155 = vector.multi_reduction <add>, %154, %cst_118 [1] : vector<34x34xf32> to vector<34xf32>
    %156 = vector.shape_cast %155 : vector<34xf32> to vector<34x1xf32>
    %157 = tpu.reciprocal %156 {approx = true} : vector<34x1xf32> -> vector<34x1xf32>
    %158 = vector.broadcast %157 : vector<34x1xf32> to vector<34x34xf32>
    %159 = arith.mulf %154, %158 : vector<34x34xf32>
    %cst_119 = arith.constant dense<0.000000e+00> : vector<34x8xf32>
    %160 = tpu.matmul %159, %145, %cst_119 {dimension_numbers = #tpu.dot_dimension_numbers<[1], [0], [0], [1], [0, 0, 1, 1], [], []>} : vector<34x34xf32>, vector<34x8xf32>, vector<34x8xf32> -> vector<34x8xf32>
    %c3_120 = arith.constant 3 : index
    %c0_121 = arith.constant 0 : index
    %c0_122 = arith.constant 0 : index
    %161 = vector.load %arg11[%c3_120, %c0_121, %c0_122] : memref<8x8x32xf32, #tpu.memory_space<vmem>>, vector<1x8x32xf32>
    %162 = vector.shape_cast %161 : vector<1x8x32xf32> to vector<8x32xf32>
    %cst_123 = arith.constant dense<0.000000e+00> : vector<34x32xf32>
    %163 = tpu.matmul %160, %162, %cst_123 {dimension_numbers = #tpu.dot_dimension_numbers<[1], [0], [0], [1], [0, 0, 1, 1], [], []>} : vector<34x8xf32>, vector<8x32xf32>, vector<34x32xf32> -> vector<34x32xf32>
    %164 = arith.addf %124, %163 : vector<34x32xf32>
    %c0_124 = arith.constant 0 : index
    %c0_125 = arith.constant 0 : index
    %c0_126 = arith.constant 0 : index
    %165 = vector.load %arg12[%c0_124, %c0_125, %c0_126] : memref<2x1x32xf32, #tpu.memory_space<vmem>>, vector<1x1x32xf32>
    %166 = vector.shape_cast %165 : vector<1x1x32xf32> to vector<1x32xf32>
    %167 = vector.broadcast %166 : vector<1x32xf32> to vector<34x32xf32>
    %168 = arith.addf %164, %167 : vector<34x32xf32>
    %169 = arith.addf %4, %168 : vector<34x32xf32>
    %c0_127 = arith.constant 0 : index
    %c0_128 = arith.constant 0 : index
    %c0_129 = arith.constant 0 : index
    %170 = vector.load %arg13[%c0_127, %c0_128, %c0_129] : memref<2x1x32xf32, #tpu.memory_space<vmem>>, vector<1x1x32xf32>
    %171 = vector.shape_cast %170 : vector<1x1x32xf32> to vector<1x32xf32>
    %c0_130 = arith.constant 0 : index
    %c0_131 = arith.constant 0 : index
    %c0_132 = arith.constant 0 : index
    %172 = vector.load %arg14[%c0_130, %c0_131, %c0_132] : memref<2x1x32xf32, #tpu.memory_space<vmem>>, vector<1x1x32xf32>
    %173 = vector.shape_cast %172 : vector<1x1x32xf32> to vector<1x32xf32>
    %cst_133 = arith.constant dense<0.000000e+00> : vector<34xf32>
    %174 = vector.multi_reduction <add>, %169, %cst_133 [1] : vector<34x32xf32> to vector<34xf32>
    %175 = vector.shape_cast %174 : vector<34xf32> to vector<34x1xf32>
    %cst_134 = arith.constant 3.200000e+01 : f32
    %176 = vector.broadcast %cst_134 : f32 to vector<34x1xf32>
    %177 = arith.divf %175, %176 : vector<34x1xf32>
    %178 = vector.broadcast %177 : vector<34x1xf32> to vector<34x32xf32>
    %179 = arith.subf %169, %178 : vector<34x32xf32>
    %180 = arith.mulf %179, %179 : vector<34x32xf32>
    %cst_135 = arith.constant dense<0.000000e+00> : vector<34xf32>
    %181 = vector.multi_reduction <add>, %180, %cst_135 [1] : vector<34x32xf32> to vector<34xf32>
    %182 = vector.shape_cast %181 : vector<34xf32> to vector<34x1xf32>
    %cst_136 = arith.constant 3.200000e+01 : f32
    %183 = vector.broadcast %cst_136 : f32 to vector<34x1xf32>
    %184 = arith.divf %182, %183 : vector<34x1xf32>
    %185 = vector.broadcast %177 : vector<34x1xf32> to vector<34x32xf32>
    %186 = arith.subf %169, %185 : vector<34x32xf32>
    %cst_137 = arith.constant 9.99999974E-6 : f32
    %187 = vector.broadcast %cst_137 : f32 to vector<34x1xf32>
    %188 = arith.addf %184, %187 : vector<34x1xf32>
    %189 = math.rsqrt %188 : vector<34x1xf32>
    %190 = vector.broadcast %189 : vector<34x1xf32> to vector<34x32xf32>
    %191 = arith.mulf %186, %190 : vector<34x32xf32>
    %192 = vector.broadcast %171 : vector<1x32xf32> to vector<34x32xf32>
    %193 = arith.mulf %191, %192 : vector<34x32xf32>
    %194 = vector.broadcast %173 : vector<1x32xf32> to vector<34x32xf32>
    %195 = arith.addf %193, %194 : vector<34x32xf32>
    %c0_138 = arith.constant 0 : index
    %c0_139 = arith.constant 0 : index
    %c0_140 = arith.constant 0 : index
    %196 = vector.load %arg15[%c0_138, %c0_139, %c0_140] : memref<2x32x64xf32, #tpu.memory_space<vmem>>, vector<1x32x64xf32>
    %197 = vector.shape_cast %196 : vector<1x32x64xf32> to vector<32x64xf32>
    %cst_141 = arith.constant dense<0.000000e+00> : vector<34x64xf32>
    %198 = tpu.matmul %195, %197, %cst_141 {dimension_numbers = #tpu.dot_dimension_numbers<[1], [0], [0], [1], [0, 0, 1, 1], [], []>} : vector<34x32xf32>, vector<32x64xf32>, vector<34x64xf32> -> vector<34x64xf32>
    %c0_142 = arith.constant 0 : index
    %c0_143 = arith.constant 0 : index
    %c0_144 = arith.constant 0 : index
    %199 = vector.load %arg16[%c0_142, %c0_143, %c0_144] : memref<2x1x64xf32, #tpu.memory_space<vmem>>, vector<1x1x64xf32>
    %200 = vector.shape_cast %199 : vector<1x1x64xf32> to vector<1x64xf32>
    %201 = vector.broadcast %200 : vector<1x64xf32> to vector<34x64xf32>
    %202 = arith.addf %198, %201 : vector<34x64xf32>
    %cst_145 = arith.constant 5.000000e-01 : f32
    %203 = vector.broadcast %cst_145 : f32 to vector<34x64xf32>
    %204 = arith.mulf %203, %202 : vector<34x64xf32>
    %cst_146 = arith.constant 0.707106769 : f32
    %205 = vector.broadcast %cst_146 : f32 to vector<34x64xf32>
    %206 = arith.mulf %202, %205 : vector<34x64xf32>
    %207 = math.absf %206 : vector<34x64xf32>
    %cst_147 = arith.constant 0.327591091 : f32
    %208 = vector.broadcast %cst_147 : f32 to vector<34x64xf32>
    %209 = arith.mulf %208, %207 : vector<34x64xf32>
    %cst_148 = arith.constant 1.000000e+00 : f32
    %210 = vector.broadcast %cst_148 : f32 to vector<34x64xf32>
    %211 = arith.addf %210, %209 : vector<34x64xf32>
    %cst_149 = arith.constant 1.000000e+00 : f32
    %212 = vector.broadcast %cst_149 : f32 to vector<34x64xf32>
    %213 = arith.divf %212, %211 : vector<34x64xf32>
    %cst_150 = arith.constant 1.06140542 : f32
    %214 = vector.broadcast %cst_150 : f32 to vector<34x64xf32>
    %215 = arith.mulf %214, %213 : vector<34x64xf32>
    %cst_151 = arith.constant -1.45315206 : f32
    %216 = vector.broadcast %cst_151 : f32 to vector<34x64xf32>
    %217 = arith.addf %215, %216 : vector<34x64xf32>
    %218 = arith.mulf %217, %213 : vector<34x64xf32>
    %cst_152 = arith.constant 1.42141378 : f32
    %219 = vector.broadcast %cst_152 : f32 to vector<34x64xf32>
    %220 = arith.addf %218, %219 : vector<34x64xf32>
    %221 = arith.mulf %220, %213 : vector<34x64xf32>
    %cst_153 = arith.constant -0.284496725 : f32
    %222 = vector.broadcast %cst_153 : f32 to vector<34x64xf32>
    %223 = arith.addf %221, %222 : vector<34x64xf32>
    %224 = arith.mulf %223, %213 : vector<34x64xf32>
    %cst_154 = arith.constant 0.254829586 : f32
    %225 = vector.broadcast %cst_154 : f32 to vector<34x64xf32>
    %226 = arith.addf %224, %225 : vector<34x64xf32>
    %227 = arith.mulf %226, %213 : vector<34x64xf32>
    %cst_155 = arith.constant 0.000000e+00 : f32
    %228 = vector.broadcast %cst_155 : f32 to vector<34x64xf32>
    %229 = arith.subf %228, %207 : vector<34x64xf32>
    %230 = arith.mulf %229, %207 : vector<34x64xf32>
    %231 = math.exp %230 : vector<34x64xf32>
    %232 = arith.mulf %227, %231 : vector<34x64xf32>
    %cst_156 = arith.constant 1.000000e+00 : f32
    %233 = vector.broadcast %cst_156 : f32 to vector<34x64xf32>
    %234 = arith.subf %233, %232 : vector<34x64xf32>
    %cst_157 = arith.constant 0.000000e+00 : f32
    %235 = vector.broadcast %cst_157 : f32 to vector<34x64xf32>
    %236 = arith.cmpf oge, %206, %235 : vector<34x64xf32>
    %cst_158 = arith.constant 0.000000e+00 : f32
    %237 = vector.broadcast %cst_158 : f32 to vector<34x64xf32>
    %238 = arith.subf %237, %234 : vector<34x64xf32>
    %239 = arith.select %236, %234, %238 : vector<34x64xi1>, vector<34x64xf32>
    %cst_159 = arith.constant 1.000000e+00 : f32
    %240 = vector.broadcast %cst_159 : f32 to vector<34x64xf32>
    %241 = arith.addf %240, %239 : vector<34x64xf32>
    %242 = arith.mulf %204, %241 : vector<34x64xf32>
    %c0_160 = arith.constant 0 : index
    %c0_161 = arith.constant 0 : index
    %c0_162 = arith.constant 0 : index
    %243 = vector.load %arg17[%c0_160, %c0_161, %c0_162] : memref<2x64x32xf32, #tpu.memory_space<vmem>>, vector<1x64x32xf32>
    %244 = vector.shape_cast %243 : vector<1x64x32xf32> to vector<64x32xf32>
    %cst_163 = arith.constant dense<0.000000e+00> : vector<34x32xf32>
    %245 = tpu.matmul %242, %244, %cst_163 {dimension_numbers = #tpu.dot_dimension_numbers<[1], [0], [0], [1], [0, 0, 1, 1], [], []>} : vector<34x64xf32>, vector<64x32xf32>, vector<34x32xf32> -> vector<34x32xf32>
    %c0_164 = arith.constant 0 : index
    %c0_165 = arith.constant 0 : index
    %c0_166 = arith.constant 0 : index
    %246 = vector.load %arg18[%c0_164, %c0_165, %c0_166] : memref<2x1x32xf32, #tpu.memory_space<vmem>>, vector<1x1x32xf32>
    %247 = vector.shape_cast %246 : vector<1x1x32xf32> to vector<1x32xf32>
    %248 = vector.broadcast %247 : vector<1x32xf32> to vector<34x32xf32>
    %249 = arith.addf %245, %248 : vector<34x32xf32>
    %250 = arith.addf %195, %249 : vector<34x32xf32>
    %c0_167 = arith.constant 0 : index
    %c0_168 = arith.constant 0 : index
    %c0_169 = arith.constant 0 : index
    %251 = vector.load %arg19[%c0_167, %c0_168, %c0_169] : memref<2x1x32xf32, #tpu.memory_space<vmem>>, vector<1x1x32xf32>
    %252 = vector.shape_cast %251 : vector<1x1x32xf32> to vector<1x32xf32>
    %c0_170 = arith.constant 0 : index
    %c0_171 = arith.constant 0 : index
    %c0_172 = arith.constant 0 : index
    %253 = vector.load %arg20[%c0_170, %c0_171, %c0_172] : memref<2x1x32xf32, #tpu.memory_space<vmem>>, vector<1x1x32xf32>
    %254 = vector.shape_cast %253 : vector<1x1x32xf32> to vector<1x32xf32>
    %cst_173 = arith.constant dense<0.000000e+00> : vector<34xf32>
    %255 = vector.multi_reduction <add>, %250, %cst_173 [1] : vector<34x32xf32> to vector<34xf32>
    %256 = vector.shape_cast %255 : vector<34xf32> to vector<34x1xf32>
    %cst_174 = arith.constant 3.200000e+01 : f32
    %257 = vector.broadcast %cst_174 : f32 to vector<34x1xf32>
    %258 = arith.divf %256, %257 : vector<34x1xf32>
    %259 = vector.broadcast %258 : vector<34x1xf32> to vector<34x32xf32>
    %260 = arith.subf %250, %259 : vector<34x32xf32>
    %261 = arith.mulf %260, %260 : vector<34x32xf32>
    %cst_175 = arith.constant dense<0.000000e+00> : vector<34xf32>
    %262 = vector.multi_reduction <add>, %261, %cst_175 [1] : vector<34x32xf32> to vector<34xf32>
    %263 = vector.shape_cast %262 : vector<34xf32> to vector<34x1xf32>
    %cst_176 = arith.constant 3.200000e+01 : f32
    %264 = vector.broadcast %cst_176 : f32 to vector<34x1xf32>
    %265 = arith.divf %263, %264 : vector<34x1xf32>
    %266 = vector.broadcast %258 : vector<34x1xf32> to vector<34x32xf32>
    %267 = arith.subf %250, %266 : vector<34x32xf32>
    %cst_177 = arith.constant 9.99999974E-6 : f32
    %268 = vector.broadcast %cst_177 : f32 to vector<34x1xf32>
    %269 = arith.addf %265, %268 : vector<34x1xf32>
    %270 = math.rsqrt %269 : vector<34x1xf32>
    %271 = vector.broadcast %270 : vector<34x1xf32> to vector<34x32xf32>
    %272 = arith.mulf %267, %271 : vector<34x32xf32>
    %273 = vector.broadcast %252 : vector<1x32xf32> to vector<34x32xf32>
    %274 = arith.mulf %272, %273 : vector<34x32xf32>
    %275 = vector.broadcast %254 : vector<1x32xf32> to vector<34x32xf32>
    %276 = arith.addf %274, %275 : vector<34x32xf32>
    %c4 = arith.constant 4 : index
    %c0_178 = arith.constant 0 : index
    %c0_179 = arith.constant 0 : index
    %277 = vector.load %arg5[%c4, %c0_178, %c0_179] : memref<8x32x8xf32, #tpu.memory_space<vmem>>, vector<1x32x8xf32>
    %278 = vector.shape_cast %277 : vector<1x32x8xf32> to vector<32x8xf32>
    %cst_180 = arith.constant dense<0.000000e+00> : vector<34x8xf32>
    %279 = tpu.matmul %276, %278, %cst_180 {dimension_numbers = #tpu.dot_dimension_numbers<[1], [0], [0], [1], [0, 0, 1, 1], [], []>} : vector<34x32xf32>, vector<32x8xf32>, vector<34x8xf32> -> vector<34x8xf32>
    %c4_181 = arith.constant 4 : index
    %c0_182 = arith.constant 0 : index
    %c0_183 = arith.constant 0 : index
    %280 = vector.load %arg6[%c4_181, %c0_182, %c0_183] : memref<8x1x8xf32, #tpu.memory_space<vmem>>, vector<1x1x8xf32>
    %281 = vector.shape_cast %280 : vector<1x1x8xf32> to vector<1x8xf32>
    %282 = vector.broadcast %281 : vector<1x8xf32> to vector<34x8xf32>
    %283 = arith.addf %279, %282 : vector<34x8xf32>
    %c4_184 = arith.constant 4 : index
    %c0_185 = arith.constant 0 : index
    %c0_186 = arith.constant 0 : index
    %284 = vector.load %arg7[%c4_184, %c0_185, %c0_186] : memref<8x32x8xf32, #tpu.memory_space<vmem>>, vector<1x32x8xf32>
    %285 = vector.shape_cast %284 : vector<1x32x8xf32> to vector<32x8xf32>
    %cst_187 = arith.constant dense<0.000000e+00> : vector<34x8xf32>
    %286 = tpu.matmul %276, %285, %cst_187 {dimension_numbers = #tpu.dot_dimension_numbers<[1], [0], [0], [1], [0, 0, 1, 1], [], []>} : vector<34x32xf32>, vector<32x8xf32>, vector<34x8xf32> -> vector<34x8xf32>
    %c4_188 = arith.constant 4 : index
    %c0_189 = arith.constant 0 : index
    %c0_190 = arith.constant 0 : index
    %287 = vector.load %arg8[%c4_188, %c0_189, %c0_190] : memref<8x1x8xf32, #tpu.memory_space<vmem>>, vector<1x1x8xf32>
    %288 = vector.shape_cast %287 : vector<1x1x8xf32> to vector<1x8xf32>
    %289 = vector.broadcast %288 : vector<1x8xf32> to vector<34x8xf32>
    %290 = arith.addf %286, %289 : vector<34x8xf32>
    %c4_191 = arith.constant 4 : index
    %c0_192 = arith.constant 0 : index
    %c0_193 = arith.constant 0 : index
    %291 = vector.load %arg9[%c4_191, %c0_192, %c0_193] : memref<8x32x8xf32, #tpu.memory_space<vmem>>, vector<1x32x8xf32>
    %292 = vector.shape_cast %291 : vector<1x32x8xf32> to vector<32x8xf32>
    %cst_194 = arith.constant dense<0.000000e+00> : vector<34x8xf32>
    %293 = tpu.matmul %276, %292, %cst_194 {dimension_numbers = #tpu.dot_dimension_numbers<[1], [0], [0], [1], [0, 0, 1, 1], [], []>} : vector<34x32xf32>, vector<32x8xf32>, vector<34x8xf32> -> vector<34x8xf32>
    %c4_195 = arith.constant 4 : index
    %c0_196 = arith.constant 0 : index
    %c0_197 = arith.constant 0 : index
    %294 = vector.load %arg10[%c4_195, %c0_196, %c0_197] : memref<8x1x8xf32, #tpu.memory_space<vmem>>, vector<1x1x8xf32>
    %295 = vector.shape_cast %294 : vector<1x1x8xf32> to vector<1x8xf32>
    %296 = vector.broadcast %295 : vector<1x8xf32> to vector<34x8xf32>
    %297 = arith.addf %293, %296 : vector<34x8xf32>
    %cst_198 = arith.constant dense<0.000000e+00> : vector<34x34xf32>
    %298 = tpu.matmul %283, %290, %cst_198 {dimension_numbers = #tpu.dot_dimension_numbers<[1], [1], [0], [0], [0, 0, 1, 0], [], []>} : vector<34x8xf32>, vector<34x8xf32>, vector<34x34xf32> -> vector<34x34xf32>
    %cst_199 = arith.constant 0.353553385 : f32
    %299 = vector.broadcast %cst_199 : f32 to vector<34x34xf32>
    %300 = arith.mulf %298, %299 : vector<34x34xf32>
    %301 = arith.addf %300, %5 : vector<34x34xf32>
    %cst_200 = arith.constant dense<0xFF800000> : vector<34xf32>
    %302 = vector.multi_reduction <maximumf>, %301, %cst_200 [1] : vector<34x34xf32> to vector<34xf32>
    %303 = vector.shape_cast %302 : vector<34xf32> to vector<34x1xf32>
    %304 = vector.broadcast %303 : vector<34x1xf32> to vector<34x34xf32>
    %305 = arith.subf %301, %304 : vector<34x34xf32>
    %306 = math.exp %305 : vector<34x34xf32>
    %cst_201 = arith.constant dense<0.000000e+00> : vector<34xf32>
    %307 = vector.multi_reduction <add>, %306, %cst_201 [1] : vector<34x34xf32> to vector<34xf32>
    %308 = vector.shape_cast %307 : vector<34xf32> to vector<34x1xf32>
    %309 = tpu.reciprocal %308 {approx = true} : vector<34x1xf32> -> vector<34x1xf32>
    %310 = vector.broadcast %309 : vector<34x1xf32> to vector<34x34xf32>
    %311 = arith.mulf %306, %310 : vector<34x34xf32>
    %cst_202 = arith.constant dense<0.000000e+00> : vector<34x8xf32>
    %312 = tpu.matmul %311, %297, %cst_202 {dimension_numbers = #tpu.dot_dimension_numbers<[1], [0], [0], [1], [0, 0, 1, 1], [], []>} : vector<34x34xf32>, vector<34x8xf32>, vector<34x8xf32> -> vector<34x8xf32>
    %c4_203 = arith.constant 4 : index
    %c0_204 = arith.constant 0 : index
    %c0_205 = arith.constant 0 : index
    %313 = vector.load %arg11[%c4_203, %c0_204, %c0_205] : memref<8x8x32xf32, #tpu.memory_space<vmem>>, vector<1x8x32xf32>
    %314 = vector.shape_cast %313 : vector<1x8x32xf32> to vector<8x32xf32>
    %cst_206 = arith.constant dense<0.000000e+00> : vector<34x32xf32>
    %315 = tpu.matmul %312, %314, %cst_206 {dimension_numbers = #tpu.dot_dimension_numbers<[1], [0], [0], [1], [0, 0, 1, 1], [], []>} : vector<34x8xf32>, vector<8x32xf32>, vector<34x32xf32> -> vector<34x32xf32>
    %c5 = arith.constant 5 : index
    %c0_207 = arith.constant 0 : index
    %c0_208 = arith.constant 0 : index
    %316 = vector.load %arg5[%c5, %c0_207, %c0_208] : memref<8x32x8xf32, #tpu.memory_space<vmem>>, vector<1x32x8xf32>
    %317 = vector.shape_cast %316 : vector<1x32x8xf32> to vector<32x8xf32>
    %cst_209 = arith.constant dense<0.000000e+00> : vector<34x8xf32>
    %318 = tpu.matmul %276, %317, %cst_209 {dimension_numbers = #tpu.dot_dimension_numbers<[1], [0], [0], [1], [0, 0, 1, 1], [], []>} : vector<34x32xf32>, vector<32x8xf32>, vector<34x8xf32> -> vector<34x8xf32>
    %c5_210 = arith.constant 5 : index
    %c0_211 = arith.constant 0 : index
    %c0_212 = arith.constant 0 : index
    %319 = vector.load %arg6[%c5_210, %c0_211, %c0_212] : memref<8x1x8xf32, #tpu.memory_space<vmem>>, vector<1x1x8xf32>
    %320 = vector.shape_cast %319 : vector<1x1x8xf32> to vector<1x8xf32>
    %321 = vector.broadcast %320 : vector<1x8xf32> to vector<34x8xf32>
    %322 = arith.addf %318, %321 : vector<34x8xf32>
    %c5_213 = arith.constant 5 : index
    %c0_214 = arith.constant 0 : index
    %c0_215 = arith.constant 0 : index
    %323 = vector.load %arg7[%c5_213, %c0_214, %c0_215] : memref<8x32x8xf32, #tpu.memory_space<vmem>>, vector<1x32x8xf32>
    %324 = vector.shape_cast %323 : vector<1x32x8xf32> to vector<32x8xf32>
    %cst_216 = arith.constant dense<0.000000e+00> : vector<34x8xf32>
    %325 = tpu.matmul %276, %324, %cst_216 {dimension_numbers = #tpu.dot_dimension_numbers<[1], [0], [0], [1], [0, 0, 1, 1], [], []>} : vector<34x32xf32>, vector<32x8xf32>, vector<34x8xf32> -> vector<34x8xf32>
    %c5_217 = arith.constant 5 : index
    %c0_218 = arith.constant 0 : index
    %c0_219 = arith.constant 0 : index
    %326 = vector.load %arg8[%c5_217, %c0_218, %c0_219] : memref<8x1x8xf32, #tpu.memory_space<vmem>>, vector<1x1x8xf32>
    %327 = vector.shape_cast %326 : vector<1x1x8xf32> to vector<1x8xf32>
    %328 = vector.broadcast %327 : vector<1x8xf32> to vector<34x8xf32>
    %329 = arith.addf %325, %328 : vector<34x8xf32>
    %c5_220 = arith.constant 5 : index
    %c0_221 = arith.constant 0 : index
    %c0_222 = arith.constant 0 : index
    %330 = vector.load %arg9[%c5_220, %c0_221, %c0_222] : memref<8x32x8xf32, #tpu.memory_space<vmem>>, vector<1x32x8xf32>
    %331 = vector.shape_cast %330 : vector<1x32x8xf32> to vector<32x8xf32>
    %cst_223 = arith.constant dense<0.000000e+00> : vector<34x8xf32>
    %332 = tpu.matmul %276, %331, %cst_223 {dimension_numbers = #tpu.dot_dimension_numbers<[1], [0], [0], [1], [0, 0, 1, 1], [], []>} : vector<34x32xf32>, vector<32x8xf32>, vector<34x8xf32> -> vector<34x8xf32>
    %c5_224 = arith.constant 5 : index
    %c0_225 = arith.constant 0 : index
    %c0_226 = arith.constant 0 : index
    %333 = vector.load %arg10[%c5_224, %c0_225, %c0_226] : memref<8x1x8xf32, #tpu.memory_space<vmem>>, vector<1x1x8xf32>
    %334 = vector.shape_cast %333 : vector<1x1x8xf32> to vector<1x8xf32>
    %335 = vector.broadcast %334 : vector<1x8xf32> to vector<34x8xf32>
    %336 = arith.addf %332, %335 : vector<34x8xf32>
    %cst_227 = arith.constant dense<0.000000e+00> : vector<34x34xf32>
    %337 = tpu.matmul %322, %329, %cst_227 {dimension_numbers = #tpu.dot_dimension_numbers<[1], [1], [0], [0], [0, 0, 1, 0], [], []>} : vector<34x8xf32>, vector<34x8xf32>, vector<34x34xf32> -> vector<34x34xf32>
    %cst_228 = arith.constant 0.353553385 : f32
    %338 = vector.broadcast %cst_228 : f32 to vector<34x34xf32>
    %339 = arith.mulf %337, %338 : vector<34x34xf32>
    %340 = arith.addf %339, %5 : vector<34x34xf32>
    %cst_229 = arith.constant dense<0xFF800000> : vector<34xf32>
    %341 = vector.multi_reduction <maximumf>, %340, %cst_229 [1] : vector<34x34xf32> to vector<34xf32>
    %342 = vector.shape_cast %341 : vector<34xf32> to vector<34x1xf32>
    %343 = vector.broadcast %342 : vector<34x1xf32> to vector<34x34xf32>
    %344 = arith.subf %340, %343 : vector<34x34xf32>
    %345 = math.exp %344 : vector<34x34xf32>
    %cst_230 = arith.constant dense<0.000000e+00> : vector<34xf32>
    %346 = vector.multi_reduction <add>, %345, %cst_230 [1] : vector<34x34xf32> to vector<34xf32>
    %347 = vector.shape_cast %346 : vector<34xf32> to vector<34x1xf32>
    %348 = tpu.reciprocal %347 {approx = true} : vector<34x1xf32> -> vector<34x1xf32>
    %349 = vector.broadcast %348 : vector<34x1xf32> to vector<34x34xf32>
    %350 = arith.mulf %345, %349 : vector<34x34xf32>
    %cst_231 = arith.constant dense<0.000000e+00> : vector<34x8xf32>
    %351 = tpu.matmul %350, %336, %cst_231 {dimension_numbers = #tpu.dot_dimension_numbers<[1], [0], [0], [1], [0, 0, 1, 1], [], []>} : vector<34x34xf32>, vector<34x8xf32>, vector<34x8xf32> -> vector<34x8xf32>
    %c5_232 = arith.constant 5 : index
    %c0_233 = arith.constant 0 : index
    %c0_234 = arith.constant 0 : index
    %352 = vector.load %arg11[%c5_232, %c0_233, %c0_234] : memref<8x8x32xf32, #tpu.memory_space<vmem>>, vector<1x8x32xf32>
    %353 = vector.shape_cast %352 : vector<1x8x32xf32> to vector<8x32xf32>
    %cst_235 = arith.constant dense<0.000000e+00> : vector<34x32xf32>
    %354 = tpu.matmul %351, %353, %cst_235 {dimension_numbers = #tpu.dot_dimension_numbers<[1], [0], [0], [1], [0, 0, 1, 1], [], []>} : vector<34x8xf32>, vector<8x32xf32>, vector<34x32xf32> -> vector<34x32xf32>
    %355 = arith.addf %315, %354 : vector<34x32xf32>
    %c6 = arith.constant 6 : index
    %c0_236 = arith.constant 0 : index
    %c0_237 = arith.constant 0 : index
    %356 = vector.load %arg5[%c6, %c0_236, %c0_237] : memref<8x32x8xf32, #tpu.memory_space<vmem>>, vector<1x32x8xf32>
    %357 = vector.shape_cast %356 : vector<1x32x8xf32> to vector<32x8xf32>
    %cst_238 = arith.constant dense<0.000000e+00> : vector<34x8xf32>
    %358 = tpu.matmul %276, %357, %cst_238 {dimension_numbers = #tpu.dot_dimension_numbers<[1], [0], [0], [1], [0, 0, 1, 1], [], []>} : vector<34x32xf32>, vector<32x8xf32>, vector<34x8xf32> -> vector<34x8xf32>
    %c6_239 = arith.constant 6 : index
    %c0_240 = arith.constant 0 : index
    %c0_241 = arith.constant 0 : index
    %359 = vector.load %arg6[%c6_239, %c0_240, %c0_241] : memref<8x1x8xf32, #tpu.memory_space<vmem>>, vector<1x1x8xf32>
    %360 = vector.shape_cast %359 : vector<1x1x8xf32> to vector<1x8xf32>
    %361 = vector.broadcast %360 : vector<1x8xf32> to vector<34x8xf32>
    %362 = arith.addf %358, %361 : vector<34x8xf32>
    %c6_242 = arith.constant 6 : index
    %c0_243 = arith.constant 0 : index
    %c0_244 = arith.constant 0 : index
    %363 = vector.load %arg7[%c6_242, %c0_243, %c0_244] : memref<8x32x8xf32, #tpu.memory_space<vmem>>, vector<1x32x8xf32>
    %364 = vector.shape_cast %363 : vector<1x32x8xf32> to vector<32x8xf32>
    %cst_245 = arith.constant dense<0.000000e+00> : vector<34x8xf32>
    %365 = tpu.matmul %276, %364, %cst_245 {dimension_numbers = #tpu.dot_dimension_numbers<[1], [0], [0], [1], [0, 0, 1, 1], [], []>} : vector<34x32xf32>, vector<32x8xf32>, vector<34x8xf32> -> vector<34x8xf32>
    %c6_246 = arith.constant 6 : index
    %c0_247 = arith.constant 0 : index
    %c0_248 = arith.constant 0 : index
    %366 = vector.load %arg8[%c6_246, %c0_247, %c0_248] : memref<8x1x8xf32, #tpu.memory_space<vmem>>, vector<1x1x8xf32>
    %367 = vector.shape_cast %366 : vector<1x1x8xf32> to vector<1x8xf32>
    %368 = vector.broadcast %367 : vector<1x8xf32> to vector<34x8xf32>
    %369 = arith.addf %365, %368 : vector<34x8xf32>
    %c6_249 = arith.constant 6 : index
    %c0_250 = arith.constant 0 : index
    %c0_251 = arith.constant 0 : index
    %370 = vector.load %arg9[%c6_249, %c0_250, %c0_251] : memref<8x32x8xf32, #tpu.memory_space<vmem>>, vector<1x32x8xf32>
    %371 = vector.shape_cast %370 : vector<1x32x8xf32> to vector<32x8xf32>
    %cst_252 = arith.constant dense<0.000000e+00> : vector<34x8xf32>
    %372 = tpu.matmul %276, %371, %cst_252 {dimension_numbers = #tpu.dot_dimension_numbers<[1], [0], [0], [1], [0, 0, 1, 1], [], []>} : vector<34x32xf32>, vector<32x8xf32>, vector<34x8xf32> -> vector<34x8xf32>
    %c6_253 = arith.constant 6 : index
    %c0_254 = arith.constant 0 : index
    %c0_255 = arith.constant 0 : index
    %373 = vector.load %arg10[%c6_253, %c0_254, %c0_255] : memref<8x1x8xf32, #tpu.memory_space<vmem>>, vector<1x1x8xf32>
    %374 = vector.shape_cast %373 : vector<1x1x8xf32> to vector<1x8xf32>
    %375 = vector.broadcast %374 : vector<1x8xf32> to vector<34x8xf32>
    %376 = arith.addf %372, %375 : vector<34x8xf32>
    %cst_256 = arith.constant dense<0.000000e+00> : vector<34x34xf32>
    %377 = tpu.matmul %362, %369, %cst_256 {dimension_numbers = #tpu.dot_dimension_numbers<[1], [1], [0], [0], [0, 0, 1, 0], [], []>} : vector<34x8xf32>, vector<34x8xf32>, vector<34x34xf32> -> vector<34x34xf32>
    %cst_257 = arith.constant 0.353553385 : f32
    %378 = vector.broadcast %cst_257 : f32 to vector<34x34xf32>
    %379 = arith.mulf %377, %378 : vector<34x34xf32>
    %380 = arith.addf %379, %5 : vector<34x34xf32>
    %cst_258 = arith.constant dense<0xFF800000> : vector<34xf32>
    %381 = vector.multi_reduction <maximumf>, %380, %cst_258 [1] : vector<34x34xf32> to vector<34xf32>
    %382 = vector.shape_cast %381 : vector<34xf32> to vector<34x1xf32>
    %383 = vector.broadcast %382 : vector<34x1xf32> to vector<34x34xf32>
    %384 = arith.subf %380, %383 : vector<34x34xf32>
    %385 = math.exp %384 : vector<34x34xf32>
    %cst_259 = arith.constant dense<0.000000e+00> : vector<34xf32>
    %386 = vector.multi_reduction <add>, %385, %cst_259 [1] : vector<34x34xf32> to vector<34xf32>
    %387 = vector.shape_cast %386 : vector<34xf32> to vector<34x1xf32>
    %388 = tpu.reciprocal %387 {approx = true} : vector<34x1xf32> -> vector<34x1xf32>
    %389 = vector.broadcast %388 : vector<34x1xf32> to vector<34x34xf32>
    %390 = arith.mulf %385, %389 : vector<34x34xf32>
    %cst_260 = arith.constant dense<0.000000e+00> : vector<34x8xf32>
    %391 = tpu.matmul %390, %376, %cst_260 {dimension_numbers = #tpu.dot_dimension_numbers<[1], [0], [0], [1], [0, 0, 1, 1], [], []>} : vector<34x34xf32>, vector<34x8xf32>, vector<34x8xf32> -> vector<34x8xf32>
    %c6_261 = arith.constant 6 : index
    %c0_262 = arith.constant 0 : index
    %c0_263 = arith.constant 0 : index
    %392 = vector.load %arg11[%c6_261, %c0_262, %c0_263] : memref<8x8x32xf32, #tpu.memory_space<vmem>>, vector<1x8x32xf32>
    %393 = vector.shape_cast %392 : vector<1x8x32xf32> to vector<8x32xf32>
    %cst_264 = arith.constant dense<0.000000e+00> : vector<34x32xf32>
    %394 = tpu.matmul %391, %393, %cst_264 {dimension_numbers = #tpu.dot_dimension_numbers<[1], [0], [0], [1], [0, 0, 1, 1], [], []>} : vector<34x8xf32>, vector<8x32xf32>, vector<34x32xf32> -> vector<34x32xf32>
    %395 = arith.addf %355, %394 : vector<34x32xf32>
    %c7 = arith.constant 7 : index
    %c0_265 = arith.constant 0 : index
    %c0_266 = arith.constant 0 : index
    %396 = vector.load %arg5[%c7, %c0_265, %c0_266] : memref<8x32x8xf32, #tpu.memory_space<vmem>>, vector<1x32x8xf32>
    %397 = vector.shape_cast %396 : vector<1x32x8xf32> to vector<32x8xf32>
    %cst_267 = arith.constant dense<0.000000e+00> : vector<34x8xf32>
    %398 = tpu.matmul %276, %397, %cst_267 {dimension_numbers = #tpu.dot_dimension_numbers<[1], [0], [0], [1], [0, 0, 1, 1], [], []>} : vector<34x32xf32>, vector<32x8xf32>, vector<34x8xf32> -> vector<34x8xf32>
    %c7_268 = arith.constant 7 : index
    %c0_269 = arith.constant 0 : index
    %c0_270 = arith.constant 0 : index
    %399 = vector.load %arg6[%c7_268, %c0_269, %c0_270] : memref<8x1x8xf32, #tpu.memory_space<vmem>>, vector<1x1x8xf32>
    %400 = vector.shape_cast %399 : vector<1x1x8xf32> to vector<1x8xf32>
    %401 = vector.broadcast %400 : vector<1x8xf32> to vector<34x8xf32>
    %402 = arith.addf %398, %401 : vector<34x8xf32>
    %c7_271 = arith.constant 7 : index
    %c0_272 = arith.constant 0 : index
    %c0_273 = arith.constant 0 : index
    %403 = vector.load %arg7[%c7_271, %c0_272, %c0_273] : memref<8x32x8xf32, #tpu.memory_space<vmem>>, vector<1x32x8xf32>
    %404 = vector.shape_cast %403 : vector<1x32x8xf32> to vector<32x8xf32>
    %cst_274 = arith.constant dense<0.000000e+00> : vector<34x8xf32>
    %405 = tpu.matmul %276, %404, %cst_274 {dimension_numbers = #tpu.dot_dimension_numbers<[1], [0], [0], [1], [0, 0, 1, 1], [], []>} : vector<34x32xf32>, vector<32x8xf32>, vector<34x8xf32> -> vector<34x8xf32>
    %c7_275 = arith.constant 7 : index
    %c0_276 = arith.constant 0 : index
    %c0_277 = arith.constant 0 : index
    %406 = vector.load %arg8[%c7_275, %c0_276, %c0_277] : memref<8x1x8xf32, #tpu.memory_space<vmem>>, vector<1x1x8xf32>
    %407 = vector.shape_cast %406 : vector<1x1x8xf32> to vector<1x8xf32>
    %408 = vector.broadcast %407 : vector<1x8xf32> to vector<34x8xf32>
    %409 = arith.addf %405, %408 : vector<34x8xf32>
    %c7_278 = arith.constant 7 : index
    %c0_279 = arith.constant 0 : index
    %c0_280 = arith.constant 0 : index
    %410 = vector.load %arg9[%c7_278, %c0_279, %c0_280] : memref<8x32x8xf32, #tpu.memory_space<vmem>>, vector<1x32x8xf32>
    %411 = vector.shape_cast %410 : vector<1x32x8xf32> to vector<32x8xf32>
    %cst_281 = arith.constant dense<0.000000e+00> : vector<34x8xf32>
    %412 = tpu.matmul %276, %411, %cst_281 {dimension_numbers = #tpu.dot_dimension_numbers<[1], [0], [0], [1], [0, 0, 1, 1], [], []>} : vector<34x32xf32>, vector<32x8xf32>, vector<34x8xf32> -> vector<34x8xf32>
    %c7_282 = arith.constant 7 : index
    %c0_283 = arith.constant 0 : index
    %c0_284 = arith.constant 0 : index
    %413 = vector.load %arg10[%c7_282, %c0_283, %c0_284] : memref<8x1x8xf32, #tpu.memory_space<vmem>>, vector<1x1x8xf32>
    %414 = vector.shape_cast %413 : vector<1x1x8xf32> to vector<1x8xf32>
    %415 = vector.broadcast %414 : vector<1x8xf32> to vector<34x8xf32>
    %416 = arith.addf %412, %415 : vector<34x8xf32>
    %cst_285 = arith.constant dense<0.000000e+00> : vector<34x34xf32>
    %417 = tpu.matmul %402, %409, %cst_285 {dimension_numbers = #tpu.dot_dimension_numbers<[1], [1], [0], [0], [0, 0, 1, 0], [], []>} : vector<34x8xf32>, vector<34x8xf32>, vector<34x34xf32> -> vector<34x34xf32>
    %cst_286 = arith.constant 0.353553385 : f32
    %418 = vector.broadcast %cst_286 : f32 to vector<34x34xf32>
    %419 = arith.mulf %417, %418 : vector<34x34xf32>
    %420 = arith.addf %419, %5 : vector<34x34xf32>
    %cst_287 = arith.constant dense<0xFF800000> : vector<34xf32>
    %421 = vector.multi_reduction <maximumf>, %420, %cst_287 [1] : vector<34x34xf32> to vector<34xf32>
    %422 = vector.shape_cast %421 : vector<34xf32> to vector<34x1xf32>
    %423 = vector.broadcast %422 : vector<34x1xf32> to vector<34x34xf32>
    %424 = arith.subf %420, %423 : vector<34x34xf32>
    %425 = math.exp %424 : vector<34x34xf32>
    %cst_288 = arith.constant dense<0.000000e+00> : vector<34xf32>
    %426 = vector.multi_reduction <add>, %425, %cst_288 [1] : vector<34x34xf32> to vector<34xf32>
    %427 = vector.shape_cast %426 : vector<34xf32> to vector<34x1xf32>
    %428 = tpu.reciprocal %427 {approx = true} : vector<34x1xf32> -> vector<34x1xf32>
    %429 = vector.broadcast %428 : vector<34x1xf32> to vector<34x34xf32>
    %430 = arith.mulf %425, %429 : vector<34x34xf32>
    %cst_289 = arith.constant dense<0.000000e+00> : vector<34x8xf32>
    %431 = tpu.matmul %430, %416, %cst_289 {dimension_numbers = #tpu.dot_dimension_numbers<[1], [0], [0], [1], [0, 0, 1, 1], [], []>} : vector<34x34xf32>, vector<34x8xf32>, vector<34x8xf32> -> vector<34x8xf32>
    %c7_290 = arith.constant 7 : index
    %c0_291 = arith.constant 0 : index
    %c0_292 = arith.constant 0 : index
    %432 = vector.load %arg11[%c7_290, %c0_291, %c0_292] : memref<8x8x32xf32, #tpu.memory_space<vmem>>, vector<1x8x32xf32>
    %433 = vector.shape_cast %432 : vector<1x8x32xf32> to vector<8x32xf32>
    %cst_293 = arith.constant dense<0.000000e+00> : vector<34x32xf32>
    %434 = tpu.matmul %431, %433, %cst_293 {dimension_numbers = #tpu.dot_dimension_numbers<[1], [0], [0], [1], [0, 0, 1, 1], [], []>} : vector<34x8xf32>, vector<8x32xf32>, vector<34x32xf32> -> vector<34x32xf32>
    %435 = arith.addf %395, %434 : vector<34x32xf32>
    %c1_294 = arith.constant 1 : index
    %c0_295 = arith.constant 0 : index
    %c0_296 = arith.constant 0 : index
    %436 = vector.load %arg12[%c1_294, %c0_295, %c0_296] : memref<2x1x32xf32, #tpu.memory_space<vmem>>, vector<1x1x32xf32>
    %437 = vector.shape_cast %436 : vector<1x1x32xf32> to vector<1x32xf32>
    %438 = vector.broadcast %437 : vector<1x32xf32> to vector<34x32xf32>
    %439 = arith.addf %435, %438 : vector<34x32xf32>
    %440 = arith.addf %276, %439 : vector<34x32xf32>
    %c1_297 = arith.constant 1 : index
    %c0_298 = arith.constant 0 : index
    %c0_299 = arith.constant 0 : index
    %441 = vector.load %arg13[%c1_297, %c0_298, %c0_299] : memref<2x1x32xf32, #tpu.memory_space<vmem>>, vector<1x1x32xf32>
    %442 = vector.shape_cast %441 : vector<1x1x32xf32> to vector<1x32xf32>
    %c1_300 = arith.constant 1 : index
    %c0_301 = arith.constant 0 : index
    %c0_302 = arith.constant 0 : index
    %443 = vector.load %arg14[%c1_300, %c0_301, %c0_302] : memref<2x1x32xf32, #tpu.memory_space<vmem>>, vector<1x1x32xf32>
    %444 = vector.shape_cast %443 : vector<1x1x32xf32> to vector<1x32xf32>
    %cst_303 = arith.constant dense<0.000000e+00> : vector<34xf32>
    %445 = vector.multi_reduction <add>, %440, %cst_303 [1] : vector<34x32xf32> to vector<34xf32>
    %446 = vector.shape_cast %445 : vector<34xf32> to vector<34x1xf32>
    %cst_304 = arith.constant 3.200000e+01 : f32
    %447 = vector.broadcast %cst_304 : f32 to vector<34x1xf32>
    %448 = arith.divf %446, %447 : vector<34x1xf32>
    %449 = vector.broadcast %448 : vector<34x1xf32> to vector<34x32xf32>
    %450 = arith.subf %440, %449 : vector<34x32xf32>
    %451 = arith.mulf %450, %450 : vector<34x32xf32>
    %cst_305 = arith.constant dense<0.000000e+00> : vector<34xf32>
    %452 = vector.multi_reduction <add>, %451, %cst_305 [1] : vector<34x32xf32> to vector<34xf32>
    %453 = vector.shape_cast %452 : vector<34xf32> to vector<34x1xf32>
    %cst_306 = arith.constant 3.200000e+01 : f32
    %454 = vector.broadcast %cst_306 : f32 to vector<34x1xf32>
    %455 = arith.divf %453, %454 : vector<34x1xf32>
    %456 = vector.broadcast %448 : vector<34x1xf32> to vector<34x32xf32>
    %457 = arith.subf %440, %456 : vector<34x32xf32>
    %cst_307 = arith.constant 9.99999974E-6 : f32
    %458 = vector.broadcast %cst_307 : f32 to vector<34x1xf32>
    %459 = arith.addf %455, %458 : vector<34x1xf32>
    %460 = math.rsqrt %459 : vector<34x1xf32>
    %461 = vector.broadcast %460 : vector<34x1xf32> to vector<34x32xf32>
    %462 = arith.mulf %457, %461 : vector<34x32xf32>
    %463 = vector.broadcast %442 : vector<1x32xf32> to vector<34x32xf32>
    %464 = arith.mulf %462, %463 : vector<34x32xf32>
    %465 = vector.broadcast %444 : vector<1x32xf32> to vector<34x32xf32>
    %466 = arith.addf %464, %465 : vector<34x32xf32>
    %c1_308 = arith.constant 1 : index
    %c0_309 = arith.constant 0 : index
    %c0_310 = arith.constant 0 : index
    %467 = vector.load %arg15[%c1_308, %c0_309, %c0_310] : memref<2x32x64xf32, #tpu.memory_space<vmem>>, vector<1x32x64xf32>
    %468 = vector.shape_cast %467 : vector<1x32x64xf32> to vector<32x64xf32>
    %cst_311 = arith.constant dense<0.000000e+00> : vector<34x64xf32>
    %469 = tpu.matmul %466, %468, %cst_311 {dimension_numbers = #tpu.dot_dimension_numbers<[1], [0], [0], [1], [0, 0, 1, 1], [], []>} : vector<34x32xf32>, vector<32x64xf32>, vector<34x64xf32> -> vector<34x64xf32>
    %c1_312 = arith.constant 1 : index
    %c0_313 = arith.constant 0 : index
    %c0_314 = arith.constant 0 : index
    %470 = vector.load %arg16[%c1_312, %c0_313, %c0_314] : memref<2x1x64xf32, #tpu.memory_space<vmem>>, vector<1x1x64xf32>
    %471 = vector.shape_cast %470 : vector<1x1x64xf32> to vector<1x64xf32>
    %472 = vector.broadcast %471 : vector<1x64xf32> to vector<34x64xf32>
    %473 = arith.addf %469, %472 : vector<34x64xf32>
    %cst_315 = arith.constant 5.000000e-01 : f32
    %474 = vector.broadcast %cst_315 : f32 to vector<34x64xf32>
    %475 = arith.mulf %474, %473 : vector<34x64xf32>
    %cst_316 = arith.constant 0.707106769 : f32
    %476 = vector.broadcast %cst_316 : f32 to vector<34x64xf32>
    %477 = arith.mulf %473, %476 : vector<34x64xf32>
    %478 = math.absf %477 : vector<34x64xf32>
    %cst_317 = arith.constant 0.327591091 : f32
    %479 = vector.broadcast %cst_317 : f32 to vector<34x64xf32>
    %480 = arith.mulf %479, %478 : vector<34x64xf32>
    %cst_318 = arith.constant 1.000000e+00 : f32
    %481 = vector.broadcast %cst_318 : f32 to vector<34x64xf32>
    %482 = arith.addf %481, %480 : vector<34x64xf32>
    %cst_319 = arith.constant 1.000000e+00 : f32
    %483 = vector.broadcast %cst_319 : f32 to vector<34x64xf32>
    %484 = arith.divf %483, %482 : vector<34x64xf32>
    %cst_320 = arith.constant 1.06140542 : f32
    %485 = vector.broadcast %cst_320 : f32 to vector<34x64xf32>
    %486 = arith.mulf %485, %484 : vector<34x64xf32>
    %cst_321 = arith.constant -1.45315206 : f32
    %487 = vector.broadcast %cst_321 : f32 to vector<34x64xf32>
    %488 = arith.addf %486, %487 : vector<34x64xf32>
    %489 = arith.mulf %488, %484 : vector<34x64xf32>
    %cst_322 = arith.constant 1.42141378 : f32
    %490 = vector.broadcast %cst_322 : f32 to vector<34x64xf32>
    %491 = arith.addf %489, %490 : vector<34x64xf32>
    %492 = arith.mulf %491, %484 : vector<34x64xf32>
    %cst_323 = arith.constant -0.284496725 : f32
    %493 = vector.broadcast %cst_323 : f32 to vector<34x64xf32>
    %494 = arith.addf %492, %493 : vector<34x64xf32>
    %495 = arith.mulf %494, %484 : vector<34x64xf32>
    %cst_324 = arith.constant 0.254829586 : f32
    %496 = vector.broadcast %cst_324 : f32 to vector<34x64xf32>
    %497 = arith.addf %495, %496 : vector<34x64xf32>
    %498 = arith.mulf %497, %484 : vector<34x64xf32>
    %cst_325 = arith.constant 0.000000e+00 : f32
    %499 = vector.broadcast %cst_325 : f32 to vector<34x64xf32>
    %500 = arith.subf %499, %478 : vector<34x64xf32>
    %501 = arith.mulf %500, %478 : vector<34x64xf32>
    %502 = math.exp %501 : vector<34x64xf32>
    %503 = arith.mulf %498, %502 : vector<34x64xf32>
    %cst_326 = arith.constant 1.000000e+00 : f32
    %504 = vector.broadcast %cst_326 : f32 to vector<34x64xf32>
    %505 = arith.subf %504, %503 : vector<34x64xf32>
    %cst_327 = arith.constant 0.000000e+00 : f32
    %506 = vector.broadcast %cst_327 : f32 to vector<34x64xf32>
    %507 = arith.cmpf oge, %477, %506 : vector<34x64xf32>
    %cst_328 = arith.constant 0.000000e+00 : f32
    %508 = vector.broadcast %cst_328 : f32 to vector<34x64xf32>
    %509 = arith.subf %508, %505 : vector<34x64xf32>
    %510 = arith.select %507, %505, %509 : vector<34x64xi1>, vector<34x64xf32>
    %cst_329 = arith.constant 1.000000e+00 : f32
    %511 = vector.broadcast %cst_329 : f32 to vector<34x64xf32>
    %512 = arith.addf %511, %510 : vector<34x64xf32>
    %513 = arith.mulf %475, %512 : vector<34x64xf32>
    %c1_330 = arith.constant 1 : index
    %c0_331 = arith.constant 0 : index
    %c0_332 = arith.constant 0 : index
    %514 = vector.load %arg17[%c1_330, %c0_331, %c0_332] : memref<2x64x32xf32, #tpu.memory_space<vmem>>, vector<1x64x32xf32>
    %515 = vector.shape_cast %514 : vector<1x64x32xf32> to vector<64x32xf32>
    %cst_333 = arith.constant dense<0.000000e+00> : vector<34x32xf32>
    %516 = tpu.matmul %513, %515, %cst_333 {dimension_numbers = #tpu.dot_dimension_numbers<[1], [0], [0], [1], [0, 0, 1, 1], [], []>} : vector<34x64xf32>, vector<64x32xf32>, vector<34x32xf32> -> vector<34x32xf32>
    %c1_334 = arith.constant 1 : index
    %c0_335 = arith.constant 0 : index
    %c0_336 = arith.constant 0 : index
    %517 = vector.load %arg18[%c1_334, %c0_335, %c0_336] : memref<2x1x32xf32, #tpu.memory_space<vmem>>, vector<1x1x32xf32>
    %518 = vector.shape_cast %517 : vector<1x1x32xf32> to vector<1x32xf32>
    %519 = vector.broadcast %518 : vector<1x32xf32> to vector<34x32xf32>
    %520 = arith.addf %516, %519 : vector<34x32xf32>
    %521 = arith.addf %466, %520 : vector<34x32xf32>
    %c1_337 = arith.constant 1 : index
    %c0_338 = arith.constant 0 : index
    %c0_339 = arith.constant 0 : index
    %522 = vector.load %arg19[%c1_337, %c0_338, %c0_339] : memref<2x1x32xf32, #tpu.memory_space<vmem>>, vector<1x1x32xf32>
    %523 = vector.shape_cast %522 : vector<1x1x32xf32> to vector<1x32xf32>
    %c1_340 = arith.constant 1 : index
    %c0_341 = arith.constant 0 : index
    %c0_342 = arith.constant 0 : index
    %524 = vector.load %arg20[%c1_340, %c0_341, %c0_342] : memref<2x1x32xf32, #tpu.memory_space<vmem>>, vector<1x1x32xf32>
    %525 = vector.shape_cast %524 : vector<1x1x32xf32> to vector<1x32xf32>
    %cst_343 = arith.constant dense<0.000000e+00> : vector<34xf32>
    %526 = vector.multi_reduction <add>, %521, %cst_343 [1] : vector<34x32xf32> to vector<34xf32>
    %527 = vector.shape_cast %526 : vector<34xf32> to vector<34x1xf32>
    %cst_344 = arith.constant 3.200000e+01 : f32
    %528 = vector.broadcast %cst_344 : f32 to vector<34x1xf32>
    %529 = arith.divf %527, %528 : vector<34x1xf32>
    %530 = vector.broadcast %529 : vector<34x1xf32> to vector<34x32xf32>
    %531 = arith.subf %521, %530 : vector<34x32xf32>
    %532 = arith.mulf %531, %531 : vector<34x32xf32>
    %cst_345 = arith.constant dense<0.000000e+00> : vector<34xf32>
    %533 = vector.multi_reduction <add>, %532, %cst_345 [1] : vector<34x32xf32> to vector<34xf32>
    %534 = vector.shape_cast %533 : vector<34xf32> to vector<34x1xf32>
    %cst_346 = arith.constant 3.200000e+01 : f32
    %535 = vector.broadcast %cst_346 : f32 to vector<34x1xf32>
    %536 = arith.divf %534, %535 : vector<34x1xf32>
    %537 = vector.broadcast %529 : vector<34x1xf32> to vector<34x32xf32>
    %538 = arith.subf %521, %537 : vector<34x32xf32>
    %cst_347 = arith.constant 9.99999974E-6 : f32
    %539 = vector.broadcast %cst_347 : f32 to vector<34x1xf32>
    %540 = arith.addf %536, %539 : vector<34x1xf32>
    %541 = math.rsqrt %540 : vector<34x1xf32>
    %542 = vector.broadcast %541 : vector<34x1xf32> to vector<34x32xf32>
    %543 = arith.mulf %538, %542 : vector<34x32xf32>
    %544 = vector.broadcast %523 : vector<1x32xf32> to vector<34x32xf32>
    %545 = arith.mulf %543, %544 : vector<34x32xf32>
    %546 = vector.broadcast %525 : vector<1x32xf32> to vector<34x32xf32>
    %547 = arith.addf %545, %546 : vector<34x32xf32>
    %c0_348 = arith.constant 0 : index
    %c0_349 = arith.constant 0 : index
    %548 = vector.load %arg4[%c0_348, %c0_349] : memref<2x34xf32, #tpu.memory_space<vmem>>, vector<2x34xf32>
    %cst_350 = arith.constant dense<0.000000e+00> : vector<2x32xf32>
    %549 = tpu.matmul %548, %547, %cst_350 {dimension_numbers = #tpu.dot_dimension_numbers<[1], [0], [0], [1], [0, 0, 1, 1], [], []>} : vector<2x34xf32>, vector<34x32xf32>, vector<2x32xf32> -> vector<2x32xf32>
    %c0_351 = arith.constant 0 : index
    %c0_352 = arith.constant 0 : index
    %550 = vector.load %arg21[%c0_351, %c0_352] : memref<1x32xf32, #tpu.memory_space<vmem>>, vector<1x32xf32>
    %c0_353 = arith.constant 0 : index
    %c0_354 = arith.constant 0 : index
    %551 = vector.load %arg22[%c0_353, %c0_354] : memref<1x32xf32, #tpu.memory_space<vmem>>, vector<1x32xf32>
    %cst_355 = arith.constant dense<0.000000e+00> : vector<2xf32>
    %552 = vector.multi_reduction <add>, %549, %cst_355 [1] : vector<2x32xf32> to vector<2xf32>
    %553 = vector.shape_cast %552 : vector<2xf32> to vector<2x1xf32>
    %cst_356 = arith.constant 3.200000e+01 : f32
    %554 = vector.broadcast %cst_356 : f32 to vector<2x1xf32>
    %555 = arith.divf %553, %554 : vector<2x1xf32>
    %556 = vector.broadcast %555 : vector<2x1xf32> to vector<2x32xf32>
    %557 = arith.subf %549, %556 : vector<2x32xf32>
    %558 = arith.mulf %557, %557 : vector<2x32xf32>
    %cst_357 = arith.constant dense<0.000000e+00> : vector<2xf32>
    %559 = vector.multi_reduction <add>, %558, %cst_357 [1] : vector<2x32xf32> to vector<2xf32>
    %560 = vector.shape_cast %559 : vector<2xf32> to vector<2x1xf32>
    %cst_358 = arith.constant 3.200000e+01 : f32
    %561 = vector.broadcast %cst_358 : f32 to vector<2x1xf32>
    %562 = arith.divf %560, %561 : vector<2x1xf32>
    %563 = vector.broadcast %555 : vector<2x1xf32> to vector<2x32xf32>
    %564 = arith.subf %549, %563 : vector<2x32xf32>
    %cst_359 = arith.constant 9.99999974E-6 : f32
    %565 = vector.broadcast %cst_359 : f32 to vector<2x1xf32>
    %566 = arith.addf %562, %565 : vector<2x1xf32>
    %567 = math.rsqrt %566 : vector<2x1xf32>
    %568 = vector.broadcast %567 : vector<2x1xf32> to vector<2x32xf32>
    %569 = arith.mulf %564, %568 : vector<2x32xf32>
    %570 = vector.broadcast %550 : vector<1x32xf32> to vector<2x32xf32>
    %571 = arith.mulf %569, %570 : vector<2x32xf32>
    %572 = vector.broadcast %551 : vector<1x32xf32> to vector<2x32xf32>
    %573 = arith.addf %571, %572 : vector<2x32xf32>
    %c0_360 = arith.constant 0 : index
    %c0_361 = arith.constant 0 : index
    %574 = vector.load %arg23[%c0_360, %c0_361] : memref<32x10xf32, #tpu.memory_space<vmem>>, vector<32x10xf32>
    %cst_362 = arith.constant dense<0.000000e+00> : vector<2x10xf32>
    %575 = tpu.matmul %573, %574, %cst_362 {dimension_numbers = #tpu.dot_dimension_numbers<[1], [0], [0], [1], [0, 0, 1, 1], [], []>} : vector<2x32xf32>, vector<32x10xf32>, vector<2x10xf32> -> vector<2x10xf32>
    %c0_363 = arith.constant 0 : index
    %c0_364 = arith.constant 0 : index
    %576 = vector.load %arg24[%c0_363, %c0_364] : memref<1x10xf32, #tpu.memory_space<vmem>>, vector<1x10xf32>
    %577 = vector.broadcast %576 : vector<1x10xf32> to vector<2x10xf32>
    %578 = arith.addf %575, %577 : vector<2x10xf32>
    %c0_365 = arith.constant 0 : index
    %c0_366 = arith.constant 0 : index
    %579 = vector.load %arg25[%c0_365, %c0_366] : memref<2x10xf32, #tpu.memory_space<vmem>>, vector<2x10xf32>
    tpu.vector_store %arg25[%c0_365, %c0_366], %578 {strides = array<i32>} : memref<2x10xf32, #tpu.memory_space<vmem>>, vector<2x10xf32>,
    return
  }
}

</mosaic_0001>

<bundles_post_ra>
// kernel: tile.9
= control target key start
LH: loop header
LB: loop body
LE: loop exit
PB: predicated region body
PF: predicated region fallthrough
CT: control target
= control target key end

     0   :  { %vm3_vm0 = vcmask 261120   ;;  %s11_s6 = smov 3  ;;  %s74_s0 = inlined_call_operand.vmem [shape: f32[2,17,32], index: 0, kind: input, shape index: {}]   ;;  %s75_s1 = inlined_call_operand.vmem [shape: f32[34,32], index: 1, kind: output, shape index: {}]  }
   0x1   :  { %v2_v0 = vld [vmem:[%s74_s0] sm:$0xff]   ;;  %v26_v1 = vld [vmem:[%s74_s0 + $0x8] sm:$0xff]  }
   0x2   :  { %v28_v2 = vld [vmem:[%s74_s0 + $0x10] ss:$8 sm:%s11_s6]   ;;  %4 = vst.msk [vmem:[%s75_s1] sm:$0xff] %vm3_vm0, %v2_v0  }
   0x3   :  { %v30_v3 = vld [vmem:[%s74_s0 + $0x19] sm:$0xff]   ;;  %27 = vst.msk [vmem:[%s75_s1 + $0x8] sm:$0xff] %vm3_vm0, %v26_v1   ;;  %v32_v4 = vld [vmem:[%s74_s0 + $0x21] sm:$0xff]  }
   0x4   :  { %29 = vst.msk [vmem:[%s75_s1 + $0x10] sm:$0x3] %vm3_vm0, %v28_v2  }
   0x5   :  { %31 = vst.msk [vmem:[%s75_s1 + $0x12] sm:$0xff] %vm3_vm0, %v30_v3  }
   0x6   :  { %33 = vst.msk [vmem:[%s75_s1 + $0x1a] sm:$0xff] %vm3_vm0, %v32_v4  }

// kernel: vit_forward.1
= control target key start
LH: loop header
LB: loop body
LE: loop exit
PB: predicated region body
PF: predicated region fallthrough
CT: control target
= control target key end

     0   :  { %s7022_s0 = inlined_call_operand.vmem [shape: f32[34,48], index: 0, kind: input, shape index: {}]   ;;  %s7023_s1 = inlined_call_operand.vmem [shape: f32[48,32], index: 1, kind: input, shape index: {}]   ;;  %s7024_s2 = inlined_call_operand.vmem [shape: f32[34,32], index: 2, kind: input, shape index: {}]   ;;  %s7025_s3 = inlined_call_operand.vmem [shape: f32[34,34], index: 3, kind: input, shape index: {}]   ;;  %s7026_s4 = inlined_call_operand.vmem [shape: f32[2,34], index: 4, kind: input, shape index: {}]   ;;  %s7027_s5 = inlined_call_operand.vmem [shape: f32[8,32,8], index: 5, kind: input, shape index: {}]   ;;  %s7028_s6 = inlined_call_operand.vmem [shape: f32[8,1,8], index: 6, kind: input, shape index: {}]   ;;  %s7029_s7 = inlined_call_operand.vmem [shape: f32[8,32,8], index: 7, kind: input, shape index: {}]   ;;  %s7030_s8 = inlined_call_operand.vmem [shape: f32[8,1,8], index: 8, kind: input, shape index: {}]   ;;  %s7031_s9 = inlined_call_operand.vmem [shape: f32[8,32,8], index: 9, kind: input, shape index: {}]   ;;  %s7032_s10 = inlined_call_operand.vmem [shape: f32[8,1,8], index: 10, kind: input, shape index: {}]   ;;  %s7033_s11 = inlined_call_operand.vmem [shape: f32[8,8,32], index: 11, kind: input, shape index: {}]   ;;  %s7034_s12 = inlined_call_operand.vmem [shape: f32[2,1,32], index: 12, kind: input, shape index: {}]   ;;  %s7035_s13 = inlined_call_operand.vmem [shape: f32[2,1,32], index: 13, kind: input, shape index: {}]   ;;  %s7036_s14 = inlined_call_operand.vmem [shape: f32[2,1,32], index: 14, kind: input, shape index: {}]   ;;  %s7037_s15 = inlined_call_operand.vmem [shape: f32[2,32,64], index: 15, kind: input, shape index: {}]   ;;  %s7038_s16 = inlined_call_operand.vmem [shape: f32[2,1,64], index: 16, kind: input, shape index: {}]   ;;  %s7039_s17 = inlined_call_operand.vmem [shape: f32[2,64,32], index: 17, kind: input, shape index: {}]   ;;  %s7040_s18 = inlined_call_operand.vmem [shape: f32[2,1,32], index: 18, kind: input, shape index: {}]   ;;  %s7041_s19 = inlined_call_operand.vmem [shape: f32[2,1,32], index: 19, kind: input, shape index: {}]   ;;  %s7042_s20 = inlined_call_operand.vmem [shape: f32[2,1,32], index: 20, kind: input, shape index: {}]   ;;  %s7043_s21 = inlined_call_operand.vmem [shape: f32[1,32], index: 21, kind: input, shape index: {}]   ;;  %s7044_s22 = inlined_call_operand.vmem [shape: f32[1,32], index: 22, kind: input, shape index: {}]   ;;  %s7045_s23 = inlined_call_operand.vmem [shape: f32[32,10], index: 23, kind: input, shape index: {}]   ;;  %s7046_s24 = inlined_call_operand.vmem [shape: f32[1,10], index: 24, kind: input, shape index: {}]   ;;  %s7047_s25 = inlined_call_operand.hbm [shape: f32[2,10], index: 25, kind: output, shape index: {}]  }
   0x1   :  { %7057 = sst [smem:[#allocation5_spill]] %s7022_s0 }
   0x2   :  { %7058 = sst [smem:[#allocation6_spill]] %s7023_s1 }
   0x3   :  { %7059 = sst [smem:[#allocation7_spill]] %s7024_s2 }
   0x4   :  { %7060 = sst [smem:[#allocation8_spill]] %s7025_s3 }
   0x5   :  { %7061 = sst [smem:[#allocation9_spill]] %s7026_s4 }
   0x6   :  { %7062 = sst [smem:[#allocation10_spill]] %s7027_s5 }
   0x7   :  { %7063 = sst [smem:[#allocation11_spill]] %s7028_s6 }
   0x8   :  { %7064 = sst [smem:[#allocation12_spill]] %s7029_s7 }
   0x9   :  { %7065 = sst [smem:[#allocation13_spill]] %s7030_s8 }
   0xa   :  { %7066 = sst [smem:[#allocation14_spill]] %s7031_s9 }
   0xb   :  { %7067 = sst [smem:[#allocation15_spill]] %s7047_s25 }
   0xc   :  { %s7068_s6 = sld [smem:[#allocation6_spill]]  ;;  %vm97_vm0 = vcmask 392192  }
   0xd   :  { %s7069_s29 = sld [smem:[#allocation5_spill]] }
   0xe   :  { %s7070_s7 = sld [smem:[#allocation10_spill]] }
   0xf   :  { %s7071_s1 = sld [smem:[#allocation12_spill]] }
  0x12   :  { %v91_v0 = vld [vmem:[%s7068_s6 + $0x28] sm:$0xff]  ;;  %v90_v1 = vld [vmem:[%s7068_s6 + $0x20] sm:$0xff]  ;;  %v89_v2 = vld [vmem:[%s7068_s6 + $0x18] sm:$0xff] }
  0x13   :  { %123 = vmatpush.msra.mxu0 %v91_v0  ;;  %v88_v3 = vld [vmem:[%s7068_s6 + $0x10] sm:$0xff]  ;;  %v87_v4 = vld [vmem:[%s7068_s6 + $0x8] sm:$0xff]  ;;  %v86_v5 = vld [vmem:[%s7068_s6] sm:$0xff] }
  0x14   :  { %v81_v6 = vld [vmem:[%s7069_s29] sm:$0xff]  ;;  %v153_v7 = vld [vmem:[%s7070_s7 + $0x18] sm:$0xff]  ;;  %v152_v9 = vld [vmem:[%s7070_s7 + $0x10] sm:$0xff] }
  0x15   :  { %124 = vmatpush.msra.mxu0 %v90_v1  ;;  %v209_v8 = vld [vmem:[%s7071_s1 + $0x18] sm:$0xff]  ;;  %v208_v10 = vld [vmem:[%s7071_s1 + $0x10] sm:$0xff]  ;;  %4765 = vmatpush.msra.mxu1 %v153_v7  ;;  %v82_v11 = vld [vmem:[%s7069_s29 + $0x8] sm:$0xff] }
  0x16   :  { %226 = vmatpush.msra.mxu2 %v209_v8  ;;  %4766 = vmatpush.msra.mxu3 %v153_v7 }
  0x17   :  { %125 = vmatpush.msra.mxu0 %v89_v2  ;;  %4767 = vmatpush.msra.mxu1 %v152_v9 }
  0x18   :  { %227 = vmatpush.msra.mxu2 %v208_v10  ;;  %4768 = vmatpush.msra.mxu3 %v152_v9 }
  0x19   :  { %126 = vmatpush.msra.mxu0 %v88_v3 }
  0x1b   :  { %127 = vmatpush.msra.mxu0 %v87_v4 }
  0x1d   :  { %128 = vmatpush.msra.mxu0 %v86_v5 }
  0x1e   :  { %4318 = vmatmul.msk.f32.vlgmr.msra.gmra.mxu0 %vm97_vm0, %v81_v6 }
  0x1f   :  { %186 = vmatpush.msrb.mxu0 %v153_v7 }
  0x21   :  { %187 = vmatpush.msrb.mxu0 %v152_v9 }
  0x22   :  { %30 = vsyncpa [#allocation3], 0  ;;  %v83_v12 = vld [vmem:[%s7069_s29 + $0x10] sm:$0xff]  ;;  %v84_v13 = vld [vmem:[%s7069_s29 + $0x18] sm:$0xff]  ;;  %s7072_s9 = sld [smem:[#allocation7_spill]]  ;;  %vm158_vm1 = vcmask 261120  }
  0x23   :  { %v85_v14 = vld [vmem:[%s7069_s29 + $0x20] sm:$0x3]  ;;  %v151_v15 = vld [vmem:[%s7070_s7 + $0x8] sm:$0xff]  ;;  %v4367_v19 = vld [vmem:[%s7071_s1 + $0x38] sm:$0xff]  ;;  %s7073_s29 = sld [smem:[#allocation14_spill]]  ;;  %vm286_vm2 = vcmask 64512  }
  0x24   :  { %v207_v16 = vld [vmem:[%s7071_s1 + $0x8] sm:$0xff]  ;;  %188 = vmatpush.msrb.mxu0 %v151_v15  ;;  %v150_v17 = vld [vmem:[%s7070_s7] sm:$0xff]  ;;  %4769 = vmatpush.msra.mxu1 %v151_v15  ;;  %v4366_v20 = vld [vmem:[%s7071_s1 + $0x30] sm:$0xff]  ;;  %s7074_s30 = sld [smem:[#allocation13_spill]]  ;;  %vm431_vm3 = vcmask 1041408   ;;  %vm359_vm4 = vcmask 277504  }
  0x25   :  { %228 = vmatpush.msra.mxu2 %v207_v16  ;;  %v206_v18 = vld [vmem:[%s7071_s1] sm:$0xff]  ;;  %4770 = vmatpush.msra.mxu3 %v151_v15  ;;  %v4365_v21 = vld [vmem:[%s7071_s1 + $0x28] sm:$0xff]  ;;  %v4357_v42 = vld [vmem:[%s7070_s7 + $0x38] sm:$0xff]  ;;  %s7075_s8 = sld [smem:[#allocation11_spill]]  ;;  %vm372_vm5 = vcmask 271360   ;;  %vm1609_vm6 = vcmask 254976  }
  0x26   :  { %4319 = vmatmul.msk.f32.gmra.mxu0 %vm97_vm0, %v82_v11  ;;  %4771 = vmatpush.msra.mxu1 %v150_v17  ;;  %v4364_v22 = vld [vmem:[%s7071_s1 + $0x20] sm:$0xff]  ;;  %v4356_v43 = vld [vmem:[%s7070_s7 + $0x30] sm:$0xff]  ;;  %v4355_v44 = vld [vmem:[%s7070_s7 + $0x28] sm:$0xff]  ;;  %s7076_s28 = sld [smem:[#allocation8_spill]]  ;;  %s5103_s4 = smov [#allocation2]  }
  0x27   :  { %189 = vmatpush.msrb.mxu0 %v150_v17  ;;  %229 = vmatpush.msra.mxu2 %v206_v18  ;;  %v4354_v45 = vld [vmem:[%s7070_s7 + $0x20] sm:$0xff]  ;;  %s7077_s3 = sld [smem:[#allocation9_spill]] }
  0x28   :  { %4772 = vmatpush.msra.mxu3 %v150_v17  ;;  %v92_v23 = vld [vmem:[%s7072_s9] sm:$0xff]  ;;  %v93_v28 = vld [vmem:[%s7072_s9 + $0x8] sm:$0xff]  ;;  %v94_v33 = vld [vmem:[%s7072_s9 + $0x10] sm:$0xff] }
  0x29   :  { %532 = vmatpush.msra.mxu0 %v4367_v19  ;;  %v249_v26 = vld [vmem:[%s7073_s29 + $0x18] sm:$0xff]  ;;  %v248_v27 = vld [vmem:[%s7073_s29 + $0x10] sm:$0xff]  ;;  %v247_v29 = vld [vmem:[%s7073_s29 + $0x8] sm:$0xff] }
  0x2a   :  { %266 = vmatpush.msrb.mxu3 %v249_v26  ;;  %v246_v32 = vld [vmem:[%s7073_s29] sm:$0xff]  ;;  %v95_v36 = vld [vmem:[%s7072_s9 + $0x18] sm:$0xff]  ;;  %v4376_v4 = vld [vmem:[%s7073_s29 + $0x30] sm:$0xff] }
  0x2b   :  { %533 = vmatpush.msra.mxu0 %v4366_v20  ;;  %v96_v39 = vld [vmem:[%s7072_s9 + $0x20] sm:$0x3]  ;;  %v4377_v2 = vld [vmem:[%s7073_s29 + $0x38] sm:$0xff]  ;;  %v4375_v5 = vld [vmem:[%s7073_s29 + $0x28] sm:$0xff] }
  0x2c   :  { %267 = vmatpush.msrb.mxu3 %v248_v27  ;;  %v4777_v51 = vld [vmem:[%s7074_s30] ss:$0 sm:$0xff] }
  0x2d   :  { %534 = vmatpush.msra.mxu0 %v4365_v21  ;;  %v4776_v60 = vld [vmem:[%s7075_s8] ss:$0 sm:$0xff] }
  0x2e   :  { %4320 = vmatmul.msk.f32.gmra.mxu0 %vm97_vm0, %v83_v12  ;;  %268 = vmatpush.msrb.mxu3 %v247_v29  ;;  %v4374_v8 = vld [vmem:[%s7073_s29 + $0x20] sm:$0xff] }
  0x2f   :  { %535 = vmatpush.msra.mxu0 %v4364_v22  ;;  %v4778_v22 = vld [vmem:[%s7074_s30 + $0x1] ss:$0 sm:$0xff] }
  0x30   :  { %269 = vmatpush.msrb.mxu3 %v246_v32 }
  0x36   :  { %4321 = vmatmul.msk.f32.gmra.mxu0 %vm97_vm0, %v84_v13  ;;  %v4779_v13 = vld [vmem:[%s7032_s10] ss:$0 sm:$0xff] }
  0x3e   :  { %4322 = vmatmul.msk.f32.gmra.mxu0 %vm97_vm0, %v85_v14 }
  0x9b   :  { %v130_v24 = vpop.f32.mrf.mxu0 }
  0x9c   :  { %v5311_v25 = vadd.f32 %v130_v24, %v92_v23 }
  0x9e   :  { %4323 = vmatmul.msk.f32.vlgmr.msrb.gmra.mxu0 %vm158_vm1, %v5311_v25  ;;  %4328 = vmatmul.msk.f32.vlgmr.msra.gmra.mxu2 %vm158_vm1, %v5311_v25 }
  0xa3   :  { %v133_v30 = vpop.f32.mrf.mxu0 }
  0xa4   :  { %v5329_v31 = vadd.f32 %v133_v30, %v93_v28 }
  0xa6   :  { %4324 = vmatmul.msk.f32.vlgmr.msra.gmra.mxu1 %vm158_vm1, %v5329_v31  ;;  %4329 = vmatmul.msk.f32.gmra.mxu2 %vm158_vm1, %v5329_v31 }
  0xa7   :  { %4369 = vmatmul.msk.f32.vlgmr.msra.gmra.mxu0 %vm158_vm1, %v5311_v25 }
  0xab   :  { %v136_v34 = vpop.f32.mrf.mxu0 }
  0xac   :  { %v5343_v35 = vadd.f32 %v136_v34, %v94_v33  ;;  %v5460_v33 = vld [vmem:[%s7076_s28] sm:$0xff] }
  0xae   :  { %4325 = vmatmul.msk.f32.gmra.mxu1 %vm158_vm1, %v5343_v35  ;;  %4330 = vmatmul.msk.f32.gmra.mxu2 %vm158_vm1, %v5343_v35 }
  0xaf   :  { %4370 = vmatmul.msk.f32.gmra.mxu0 %vm158_vm1, %v5329_v31 }
  0xb3   :  { %v139_v37 = vpop.f32.mrf.mxu0 }
  0xb4   :  { %v5354_v38 = vadd.f32 %v139_v37, %v95_v36 }
  0xb6   :  { %4326 = vmatmul.msk.f32.gmra.mxu1 %vm158_vm1, %v5354_v38  ;;  %4331 = vmatmul.msk.f32.gmra.mxu2 %vm158_vm1, %v5354_v38 }
  0xb7   :  { %4371 = vmatmul.msk.f32.gmra.mxu0 %vm158_vm1, %v5343_v35 }
  0xbb   :  { %v142_v40 = vpop.f32.mrf.mxu0 }
  0xbc   :  { %v5365_v41 = vadd.f32 %v142_v40, %v96_v39  ;;  %v5467_v40 = vld [vmem:[%s7076_s28 + $0x8] sm:$0xff] }
  0xbe   :  { %4327 = vmatmul.msk.f32.vlgmr.msra.gmra.mxu3 %vm158_vm1, %v5365_v41  ;;  %4332 = vmatmul.msk.f32.gmra.mxu2 %vm158_vm1, %v5365_v41 }
  0xbf   :  { %4372 = vmatmul.msk.f32.gmra.mxu0 %vm158_vm1, %v5354_v38  ;;  %490 = vmatpush.msra.mxu3 %v4357_v42 }
  0xc1   :  { %491 = vmatpush.msra.mxu3 %v4356_v43 }
  0xc3   :  { %492 = vmatpush.msra.mxu3 %v4355_v44 }
  0xc5   :  { %493 = vmatpush.msra.mxu3 %v4354_v45 }
  0xc6   :  { %4333 = vmatmul.msk.f32.vlgmr.msrb.gmra.mxu3 %vm158_vm1, %v5311_v25 }
  0xc7   :  { %4373 = vmatmul.msk.f32.gmra.mxu0 %vm158_vm1, %v5365_v41 }
  0xce   :  { %4334 = vmatmul.msk.f32.gmra.mxu3 %vm158_vm1, %v5329_v31 }
  0xd6   :  { %4335 = vmatmul.msk.f32.gmra.mxu3 %vm158_vm1, %v5343_v35 }
  0xde   :  { %4336 = vmatmul.msk.f32.gmra.mxu3 %vm158_vm1, %v5354_v38 }
  0xe6   :  { %4337 = vmatmul.msk.f32.gmra.mxu3 %vm158_vm1, %v5365_v41 }
  0xee   :  { %4359 = vmatmul.msk.f32.vlgmr.msra.gmra.mxu3 %vm158_vm1, %v5311_v25 }
  0xf6   :  { %4360 = vmatmul.msk.f32.gmra.mxu3 %vm158_vm1, %v5329_v31 }
  0xfe   :  { %4361 = vmatmul.msk.f32.gmra.mxu3 %vm158_vm1, %v5343_v35 }
 0x106   :  { %4362 = vmatmul.msk.f32.gmra.mxu3 %vm158_vm1, %v5354_v38 }
 0x10e   :  { %4363 = vmatmul.msk.f32.gmra.mxu3 %vm158_vm1, %v5365_v41 }
 0x11b   :  { %v191_v50 = vpop.f32.mrf.mxu0 }
 0x11c   :  { %v192_v0 = vadd.f32 %v4776_v60, %v191_v50 }
 0x121   :  { %v231_v46 = vpop.f32.mrf.mxu2 }
 0x122   :  { %v232_v62 = vadd.f32 %v4777_v51, %v231_v46  ;;  %v5474_v46 = vld [vmem:[%s7076_s28 + $0x10] sm:$0xff] }
 0x123   :  { %v194_v1 = vpop.f32.mrf.mxu1 }
 0x124   :  { %v537_v56 = vpop.f32.mrf.mxu0  ;;  %v195_v7 = vadd.f32 %v4776_v60, %v194_v1 }
 0x125   :  { %v538_v30 = vadd.f32 %v4778_v22, %v537_v56  ;;  %v5488_v56 = vld [vmem:[%s7076_s28 + $0x20] sm:$0x3] }
 0x129   :  { %v234_v47 = vpop.f32.mrf.mxu2 }
 0x12a   :  { %v235_v59 = vadd.f32 %v4777_v51, %v234_v47 }
 0x12b   :  { %v197_v9 = vpop.f32.mrf.mxu1 }
 0x12c   :  { %v540_v63 = vpop.f32.mrf.mxu0  ;;  %v198_v11 = vadd.f32 %v4776_v60, %v197_v9 }
 0x12d   :  { %v541_v29 = vadd.f32 %v4778_v22, %v540_v63 }
 0x131   :  { %v237_v48 = vpop.f32.mrf.mxu2 }
 0x132   :  { %v238_v58 = vadd.f32 %v4777_v51, %v237_v48 }
 0x133   :  { %v200_v15 = vpop.f32.mrf.mxu1 }
 0x134   :  { %v543_v6 = vpop.f32.mrf.mxu0  ;;  %v201_v18 = vadd.f32 %v4776_v60, %v200_v15 }
 0x135   :  { %v544_v28 = vadd.f32 %v4778_v22, %v543_v6 }
 0x139   :  { %v240_v49 = vpop.f32.mrf.mxu2 }
 0x13a   :  { %v241_v55 = vadd.f32 %v4777_v51, %v240_v49 }
 0x13c   :  { %v546_v12 = vpop.f32.mrf.mxu0 }
 0x13d   :  { %v547_v27 = vadd.f32 %v4778_v22, %v546_v12 }
 0x141   :  { %v203_v52 = vpop.f32.mrf.mxu3  ;;  %v243_v53 = vpop.f32.mrf.mxu2 }
 0x142   :  { %v244_v54 = vadd.f32 %v4777_v51, %v243_v53  ;;  %v204_v26 = vadd.f32 %v4776_v60, %v203_v52  ;;  %v5481_v51 = vld [vmem:[%s7076_s28 + $0x18] sm:$0xff] }
 0x144   :  { %4338 = vmatpush.xpose.msk.msrb.mxu1 %vm286_vm2, %v244_v54  ;;  %v549_v20 = vpop.f32.mrf.mxu0 }
 0x145   :  { %v550_v24 = vadd.f32 %v4778_v22, %v549_v20 }
 0x148   :  { %4339 = vmatpush.xpose.msk.msrb.mxu1 %vm286_vm2, %v241_v55 }
 0x149   :  { %v271_v57 = vpop.f32.mrf.mxu3 }
 0x14a   :  { %v272_v23 = vadd.f32 %v4779_v13, %v271_v57 }
 0x14c   :  { %4340 = vmatpush.xpose.msk.msrb.mxu1 %vm286_vm2, %v238_v58 }
 0x150   :  { %4341 = vmatpush.xpose.msk.msrb.mxu1 %vm286_vm2, %v235_v59 }
 0x151   :  { %v274_v61 = vpop.f32.mrf.mxu3 }
 0x152   :  { %v275_v21 = vadd.f32 %v4779_v13, %v274_v61 }
 0x154   :  { %4342 = vmatpush.xpose.msk.msrb.mxu1 %vm286_vm2, %v232_v62 }
 0x157   :  { %4343 = vmatmul.msk.f32.vlgmr.msrb.gmra.mxu1 %vm286_vm2, %v192_v0  ;;  %v4781_v0 = vld [vmem:[%s7032_s10 + $0x1] ss:$0 sm:$0xff] }
 0x158   :  { %574 = vmatpush.msra.mxu1 %v4377_v2 }
 0x159   :  { %v277_v3 = vpop.f32.mrf.mxu3 }
 0x15a   :  { %575 = vmatpush.msra.mxu1 %v4376_v4  ;;  %v278_v19 = vadd.f32 %v4779_v13, %v277_v3 }
 0x15c   :  { %576 = vmatpush.msra.mxu1 %v4375_v5 }
 0x15e   :  { %577 = vmatpush.msra.mxu1 %v4374_v8 }
 0x15f   :  { %4344 = vmatmul.msk.f32.gmra.mxu1 %vm286_vm2, %v195_v7 }
 0x161   :  { %v280_v10 = vpop.f32.mrf.mxu3 }
 0x162   :  { %v281_v17 = vadd.f32 %v4779_v13, %v280_v10 }
 0x167   :  { %4345 = vmatmul.msk.f32.gmra.mxu1 %vm286_vm2, %v198_v11 }
 0x169   :  { %v283_v14 = vpop.f32.mrf.mxu3 }
 0x16a   :  { %v284_v16 = vadd.f32 %v4779_v13, %v283_v14 }
 0x16c   :  { %4348 = vmatpush.msk.msrb.mxu2 %vm431_vm3, %v284_v16 }
 0x16e   :  { %447 = vmatpush.msrb.mxu2 %v281_v17 }
 0x16f   :  { %4346 = vmatmul.msk.f32.gmra.mxu1 %vm286_vm2, %v201_v18 }
 0x170   :  { %448 = vmatpush.msrb.mxu2 %v278_v19 }
 0x172   :  { %449 = vmatpush.msrb.mxu2 %v275_v21 }
 0x174   :  { %450 = vmatpush.msrb.mxu2 %v272_v23 }
 0x176   :  { %4384 = vmatpush.xpose.msk.msra.mxu2 %vm286_vm2, %v550_v24 }
 0x177   :  { %4347 = vmatmul.msk.f32.gmra.mxu1 %vm286_vm2, %v204_v26 }
 0x17a   :  { %4385 = vmatpush.xpose.msk.msra.mxu2 %vm286_vm2, %v547_v27 }
 0x17e   :  { %4386 = vmatpush.xpose.msk.msra.mxu2 %vm286_vm2, %v544_v28 }
 0x17f   :  { %4379 = vmatmul.msk.f32.vlgmr.msra.gmra.mxu1 %vm158_vm1, %v5311_v25 }
 0x182   :  { %4387 = vmatpush.xpose.msk.msra.mxu2 %vm286_vm2, %v541_v29 }
 0x186   :  { %4388 = vmatpush.xpose.msk.msra.mxu2 %vm286_vm2, %v538_v30 }
 0x187   :  { %4380 = vmatmul.msk.f32.gmra.mxu1 %vm158_vm1, %v5329_v31 }
 0x18f   :  { %4381 = vmatmul.msk.f32.gmra.mxu1 %vm158_vm1, %v5343_v35 }
 0x197   :  { %4382 = vmatmul.msk.f32.gmra.mxu1 %vm158_vm1, %v5354_v38 }
 0x19f   :  { %4383 = vmatmul.msk.f32.gmra.mxu1 %vm158_vm1, %v5365_v41 }
 0x1d4   :  { %v334_v32 = vpop.f32.mrf.mxu1 }
 0x1d5   :  { %v349_v34 = vmul.f32 0.35355338, %v334_v32 }
 0x1d7   :  { %v354_v36 = vadd.f32 %v349_v34, %v5460_v33 }
 0x1d9   :  { %v360_v37 = vsel %vm359_vm4, %v354_v36, -inf }
 0x1da   :  { %361 = vmax.xlane.f32.xlu0 %v360_v37 }
 0x1dc   :  { %v337_v39 = vpop.f32.mrf.mxu1 }
 0x1dd   :  { %v350_v42 = vmul.f32 0.35355338, %v337_v39 }
 0x1df   :  { %v355_v43 = vadd.f32 %v350_v42, %v5467_v40 }
 0x1e1   :  { %v363_v44 = vsel %vm359_vm4, %v355_v43, -inf }
 0x1e2   :  { %364 = vmax.xlane.f32.xlu0 %v363_v44 }
 0x1e4   :  { %v340_v45 = vpop.f32.mrf.mxu1 }
 0x1e5   :  { %v351_v47 = vmul.f32 0.35355338, %v340_v45 }
 0x1e7   :  { %v356_v48 = vadd.f32 %v351_v47, %v5474_v46 }
 0x1e9   :  { %v366_v49 = vsel %vm359_vm4, %v356_v48, -inf }
 0x1ea   :  { %367 = vmax.xlane.f32.xlu1 %v366_v49 }
 0x1ec   :  { %v343_v50 = vpop.f32.mrf.mxu1 }
 0x1ed   :  { %v352_v52 = vmul.f32 0.35355338, %v343_v50 }
 0x1ef   :  { %v357_v53 = vadd.f32 %v352_v52, %v5481_v51 }
 0x1f1   :  { %v369_v54 = vsel %vm359_vm4, %v357_v53, -inf }
 0x1f2   :  { %370 = vmax.xlane.f32.xlu1 %v369_v54  ;;  %v495_v54 = vpop.f32.mrf.mxu3 }
 0x1f4   :  { %v346_v55 = vpop.f32.mrf.mxu1 }
 0x1f5   :  { %v353_v57 = vmul.f32 0.35355338, %v346_v55 }
 0x1f7   :  { %v358_v58 = vadd.f32 %v353_v57, %v5488_v56 }
 0x1f9   :  { %v373_v59 = vsel %vm372_vm5, %v358_v58, -inf }
 0x1fa   :  { %374 = vmax.xlane.f32.xlu2 %v373_v59  ;;  %v498_v59 = vpop.f32.mrf.mxu3 }
 0x1fc   :  { %v579_v60 = vpop.f32.mrf.mxu1 }
 0x1fd   :  { %v580_v6 = vadd.f32 %v4781_v0, %v579_v60 }
 0x204   :  { %v582_v61 = vpop.f32.mrf.mxu1 }
 0x205   :  { %v583_v5 = vadd.f32 %v4781_v0, %v582_v61 }
 0x20c   :  { %v585_v62 = vpop.f32.mrf.mxu1 }
 0x20d   :  { %v586_v4 = vadd.f32 %v4781_v0, %v585_v62  ;;  %v501_v62 = vpop.f32.mrf.mxu3 }
 0x214   :  { %v588_v63 = vpop.f32.mrf.mxu1 }
 0x215   :  { %v589_v3 = vadd.f32 %v4781_v0, %v588_v63 }
 0x21c   :  { %v591_v1 = vpop.f32.mrf.mxu1 }
 0x21d   :  { %v592_v2 = vadd.f32 %v4781_v0, %v591_v1  ;;  %v504_v0 = vpop.f32.mrf.mxu3 }
 0x21f   :  { %4394 = vmatpush.msk.msrb.mxu3 %vm431_vm3, %v592_v2 }
 0x221   :  { %751 = vmatpush.msrb.mxu3 %v589_v3 }
 0x223   :  { %752 = vmatpush.msrb.mxu3 %v586_v4  ;;  %v467_v4 = vld [vmem:[%s7033_s11] sm:$0xff] }
 0x224   :  { %850 = vmatpush.msrb.mxu1 %v467_v4 }
 0x225   :  { %753 = vmatpush.msrb.mxu3 %v583_v5  ;;  %v507_v2 = vpop.f32.mrf.mxu3 }
 0x227   :  { %754 = vmatpush.msrb.mxu3 %v580_v6  ;;  %v4414_v6 = vld [vmem:[%s7070_s7 + $0x58] sm:$0xff] }
 0x24d   :  { %v362_v7 = vpop.xlane.xlu0 %361 }
 0x24e   :  { %v376_v8 = vsub.f32 %v354_v36, %v362_v7  ;;  %v4413_v7 = vld [vmem:[%s7070_s7 + $0x50] sm:$0xff] }
 0x250   :  { %v381_v9 = vmul.f32 1.442695, %v376_v8  ;;  %v4412_v8 = vld [vmem:[%s7070_s7 + $0x48] sm:$0xff] }
 0x252   :  { %4817 = vpow2.f32 %v381_v9 }
 0x255   :  { %v365_v10 = vpop.xlane.xlu0 %364 }
 0x256   :  { %v377_v11 = vsub.f32 %v355_v43, %v365_v10  ;;  %v4411_v10 = vld [vmem:[%s7070_s7 + $0x40] sm:$0xff] }
 0x258   :  { %v4818_v12 = vpop.eup %4817  ;;  %v383_v13 = vmul.f32 1.442695, %v377_v11 }
 0x259   :  { %v391_v14 = vsel %vm359_vm4, %v4818_v12, 0.0 }
 0x25a   :  { %4819 = vpow2.f32 %v383_v13  ;;  %392 = vadd.xlane.f32.xlu2 %v391_v14 }
 0x25d   :  { %v368_v15 = vpop.xlane.xlu1 %367 }
 0x25e   :  { %v378_v16 = vsub.f32 %v356_v48, %v368_v15 }
 0x260   :  { %v4820_v17 = vpop.eup %4819  ;;  %v385_v18 = vmul.f32 1.442695, %v378_v16 }
 0x261   :  { %v394_v19 = vsel %vm359_vm4, %v4820_v17, 0.0 }
 0x262   :  { %4821 = vpow2.f32 %v385_v18  ;;  %395 = vadd.xlane.f32.xlu0 %v394_v19 }
 0x265   :  { %v371_v20 = vpop.xlane.xlu1 %370 }
 0x266   :  { %v379_v21 = vsub.f32 %v357_v53, %v371_v20 }
 0x268   :  { %v4822_v22 = vpop.eup %4821  ;;  %v387_v23 = vmul.f32 1.442695, %v379_v21 }
 0x269   :  { %v397_v24 = vsel %vm359_vm4, %v4822_v22, 0.0 }
 0x26a   :  { %4823 = vpow2.f32 %v387_v23  ;;  %398 = vadd.xlane.f32.xlu1 %v397_v24 }
 0x26d   :  { %v375_v26 = vpop.xlane.xlu2 %374 }
 0x26e   :  { %v380_v27 = vsub.f32 %v358_v58, %v375_v26  ;;  %v4780_v58 = vld [vmem:[%s7075_s8 + $0x1] ss:$0 sm:$0xff] }
 0x26f   :  { %v496_v60 = vadd.f32 %v4780_v58, %v495_v54  ;;  %v499_v61 = vadd.f32 %v4780_v58, %v498_v59  ;;  %v502_v63 = vadd.f32 %v4780_v58, %v501_v62  ;;  %v505_v1 = vadd.f32 %v4780_v58, %v504_v0 }
 0x270   :  { %v4824_v28 = vpop.eup %4823  ;;  %v389_v29 = vmul.f32 1.442695, %v380_v27  ;;  %v508_v3 = vadd.f32 %v4780_v58, %v507_v2 }
 0x271   :  { %v400_v30 = vsel %vm359_vm4, %v4824_v28, 0.0 }
 0x272   :  { %4825 = vpow2.f32 %v389_v29  ;;  %401 = vadd.xlane.f32.xlu2 %v400_v30 }
 0x278   :  { %v4826_v32 = vpop.eup %4825 }
 0x279   :  { %v403_v34 = vsel %vm372_vm5, %v4826_v32, 0.0 }
 0x27a   :  { %404 = vadd.xlane.f32.xlu0 %v403_v34 }
 0x2cd   :  { %v393_v36 = vpop.xlane.xlu2 %392 }
 0x2ce   :  { %4827 = vrcp.f32 %v393_v36 }
 0x2d4   :  { %v4828_v37 = vpop.eup %4827 }
 0x2d5   :  { %v396_v39 = vpop.xlane.xlu0 %395  ;;  %v411_v42 = vmul.f32 %v4828_v37, %v4818_v12 }
 0x2d6   :  { %4829 = vrcp.f32 %v396_v39 }
 0x2d7   :  { %4349 = vmatmul.msk.f32.vlgmr.msrb.gmra.mxu2 %vm359_vm4, %v411_v42 }
 0x2d8   :  { %4773 = vmatpush.msrb.mxu2 %v467_v4 }
 0x2dc   :  { %v4830_v43 = vpop.eup %4829 }
 0x2dd   :  { %v399_v44 = vpop.xlane.xlu1 %398  ;;  %v412_v45 = vmul.f32 %v4830_v43, %v4820_v17 }
 0x2de   :  { %4831 = vrcp.f32 %v399_v44 }
 0x2df   :  { %4350 = vmatmul.msk.f32.gmra.mxu2 %vm359_vm4, %v412_v45 }
 0x2e4   :  { %v4832_v47 = vpop.eup %4831 }
 0x2e5   :  { %v402_v48 = vpop.xlane.xlu2 %401  ;;  %v413_v49 = vmul.f32 %v4832_v47, %v4822_v22 }
 0x2e6   :  { %4833 = vrcp.f32 %v402_v48 }
 0x2e7   :  { %4351 = vmatmul.msk.f32.gmra.mxu2 %vm359_vm4, %v413_v49 }
 0x2ec   :  { %v4834_v50 = vpop.eup %4833 }
 0x2ed   :  { %v405_v52 = vpop.xlane.xlu0 %404  ;;  %v414_v53 = vmul.f32 %v4834_v50, %v4824_v28 }
 0x2ee   :  { %4835 = vrcp.f32 %v405_v52 }
 0x2ef   :  { %4352 = vmatmul.msk.f32.gmra.mxu2 %vm359_vm4, %v414_v53 }
 0x2f4   :  { %v4836_v55 = vpop.eup %4835 }
 0x2f5   :  { %v415_v57 = vmul.f32 %v4836_v55, %v4826_v32 }
 0x2f7   :  { %4353 = vmatmul.msk.f32.gmra.mxu2 %vm359_vm4, %v415_v57 }
 0x2ff   :  { %4389 = vmatmul.msk.f32.vlgmr.msra.gmra.mxu2 %vm286_vm2, %v496_v60 }
 0x300   :  { %889 = vmatpush.msra.mxu2 %v4414_v6  ;;  %v4424_v6 = vld [vmem:[%s7071_s1 + $0x58] sm:$0xff] }
 0x301   :  { %931 = vmatpush.msra.mxu3 %v4424_v6 }
 0x302   :  { %890 = vmatpush.msra.mxu2 %v4413_v7 }
 0x304   :  { %891 = vmatpush.msra.mxu2 %v4412_v8 }
 0x306   :  { %892 = vmatpush.msra.mxu2 %v4411_v10  ;;  %v4423_v10 = vld [vmem:[%s7071_s1 + $0x50] sm:$0xff] }
 0x307   :  { %4390 = vmatmul.msk.f32.gmra.mxu2 %vm286_vm2, %v499_v61  ;;  %932 = vmatpush.msra.mxu3 %v4423_v10 }
 0x30f   :  { %4391 = vmatmul.msk.f32.gmra.mxu2 %vm286_vm2, %v502_v63 }
 0x317   :  { %4392 = vmatmul.msk.f32.gmra.mxu2 %vm286_vm2, %v505_v1 }
 0x31f   :  { %4393 = vmatmul.msk.f32.gmra.mxu2 %vm286_vm2, %v508_v3 }
 0x35a   :  { %v452_v5 = vpop.f32.mrf.mxu2 }
 0x35b   :  { %4406 = vmatmul.msk.f32.vlgmr.msrb.gmra.mxu1 %vm286_vm2, %v452_v5 }
 0x362   :  { %v455_v9 = vpop.f32.mrf.mxu2 }
 0x363   :  { %4407 = vmatmul.msk.f32.gmra.mxu1 %vm286_vm2, %v455_v9 }
 0x36a   :  { %v458_v11 = vpop.f32.mrf.mxu2 }
 0x36b   :  { %4408 = vmatmul.msk.f32.gmra.mxu1 %vm286_vm2, %v458_v11  ;;  %v4422_v11 = vld [vmem:[%s7071_s1 + $0x48] sm:$0xff] }
 0x36c   :  { %933 = vmatpush.msra.mxu3 %v4422_v11 }
 0x372   :  { %v461_v12 = vpop.f32.mrf.mxu2 }
 0x373   :  { %4409 = vmatmul.msk.f32.gmra.mxu1 %vm286_vm2, %v461_v12  ;;  %v4421_v12 = vld [vmem:[%s7071_s1 + $0x40] sm:$0xff] }
 0x374   :  { %934 = vmatpush.msra.mxu3 %v4421_v12 }
 0x37a   :  { %v464_v13 = vpop.f32.mrf.mxu2 }
 0x37b   :  { %4410 = vmatmul.msk.f32.vlgmr.msrb.gmra.mxu2 %vm286_vm2, %v464_v13 }
 0x382   :  { %v641_v14 = vpop.f32.mrf.mxu2 }
 0x383   :  { %v656_v15 = vmul.f32 0.35355338, %v641_v14  ;;  %4416 = vmatmul.msk.f32.vlgmr.msra.gmra.mxu2 %vm158_vm1, %v5311_v25 }
 0x385   :  { %v661_v16 = vadd.f32 %v656_v15, %v5460_v33 }
 0x387   :  { %v666_v17 = vsel %vm359_vm4, %v661_v16, -inf }
 0x388   :  { %667 = vmax.xlane.f32.xlu1 %v666_v17 }
 0x38a   :  { %v644_v18 = vpop.f32.mrf.mxu2 }
 0x38b   :  { %v657_v19 = vmul.f32 0.35355338, %v644_v18  ;;  %4417 = vmatmul.msk.f32.gmra.mxu2 %vm158_vm1, %v5329_v31 }
 0x38d   :  { %v662_v20 = vadd.f32 %v657_v19, %v5467_v40 }
 0x38f   :  { %v669_v21 = vsel %vm359_vm4, %v662_v20, -inf }
 0x390   :  { %670 = vmax.xlane.f32.xlu2 %v669_v21 }
 0x392   :  { %v647_v22 = vpop.f32.mrf.mxu2 }
 0x393   :  { %v658_v23 = vmul.f32 0.35355338, %v647_v22  ;;  %4418 = vmatmul.msk.f32.gmra.mxu2 %vm158_vm1, %v5343_v35 }
 0x395   :  { %v663_v24 = vadd.f32 %v658_v23, %v5474_v46 }
 0x397   :  { %v672_v26 = vsel %vm359_vm4, %v663_v24, -inf }
 0x398   :  { %673 = vmax.xlane.f32.xlu0 %v672_v26 }
 0x39a   :  { %v650_v27 = vpop.f32.mrf.mxu2 }
 0x39b   :  { %v659_v28 = vmul.f32 0.35355338, %v650_v27  ;;  %4419 = vmatmul.msk.f32.gmra.mxu2 %vm158_vm1, %v5354_v38  ;;  %v4434_v27 = vld [vmem:[%s7073_s29 + $0x58] sm:$0xff] }
 0x39d   :  { %v664_v29 = vadd.f32 %v659_v28, %v5481_v51  ;;  %v4433_v28 = vld [vmem:[%s7073_s29 + $0x50] sm:$0xff] }
 0x39f   :  { %v675_v30 = vsel %vm359_vm4, %v664_v29, -inf }
 0x3a0   :  { %676 = vmax.xlane.f32.xlu1 %v675_v30 }
 0x3a2   :  { %v653_v32 = vpop.f32.mrf.mxu2 }
 0x3a3   :  { %v660_v34 = vmul.f32 0.35355338, %v653_v32  ;;  %4420 = vmatmul.msk.f32.gmra.mxu2 %vm158_vm1, %v5365_v41  ;;  %v4431_v32 = vld [vmem:[%s7073_s29 + $0x40] sm:$0xff] }
 0x3a5   :  { %v665_v36 = vadd.f32 %v660_v34, %v5488_v56 }
 0x3a7   :  { %v678_v37 = vsel %vm372_vm5, %v665_v36, -inf }
 0x3a8   :  { %679 = vmax.xlane.f32.xlu2 %v678_v37 }
 0x3fb   :  { %v668_v39 = vpop.xlane.xlu1 %667 }
 0x3fc   :  { %v681_v42 = vsub.f32 %v661_v16, %v668_v39 }
 0x3fe   :  { %v686_v43 = vmul.f32 1.442695, %v681_v42  ;;  %v4466_v42 = vld [vmem:[%s7070_s7 + $0x78] sm:$0xff] }
 0x400   :  { %4837 = vpow2.f32 %v686_v43  ;;  %v4465_v43 = vld [vmem:[%s7070_s7 + $0x70] sm:$0xff] }
 0x403   :  { %v671_v44 = vpop.xlane.xlu2 %670 }
 0x404   :  { %v682_v45 = vsub.f32 %v662_v20, %v671_v44  ;;  %v4464_v44 = vld [vmem:[%s7070_s7 + $0x68] sm:$0xff] }
 0x406   :  { %v4838_v47 = vpop.eup %4837  ;;  %v688_v48 = vmul.f32 1.442695, %v682_v45  ;;  %v4463_v45 = vld [vmem:[%s7070_s7 + $0x60] sm:$0xff] }
 0x407   :  { %v696_v49 = vsel %vm359_vm4, %v4838_v47, 0.0 }
 0x408   :  { %4839 = vpow2.f32 %v688_v48  ;;  %697 = vadd.xlane.f32.xlu0 %v696_v49 }
 0x40b   :  { %v674_v50 = vpop.xlane.xlu0 %673 }
 0x40c   :  { %v683_v52 = vsub.f32 %v663_v24, %v674_v50  ;;  %v4400_v24 = vld [vmem:[%s7033_s11 + $0x8] sm:$0xff]  ;;  %v5626_v50 = vpop.f32.mrf.mxu2 }
 0x40d   :  { %803 = vmatpush.msrb.mxu0 %v4400_v24 }
 0x40e   :  { %v4840_v53 = vpop.eup %4839  ;;  %v690_v54 = vmul.f32 1.442695, %v683_v52  ;;  %v4783_v52 = vld [vmem:[%s7074_s30 + $0x2] ss:$0 sm:$0xff] }
 0x40f   :  { %v699_v55 = vsel %vm359_vm4, %v4840_v53, 0.0  ;;  %973 = vmatpush.msra.mxu0 %v4434_v27 }
 0x410   :  { %4841 = vpow2.f32 %v690_v54  ;;  %700 = vadd.xlane.f32.xlu1 %v699_v55 }
 0x411   :  { %974 = vmatpush.msra.mxu0 %v4433_v28 }
 0x413   :  { %v677_v57 = vpop.xlane.xlu1 %676 }
 0x414   :  { %v684_v58 = vsub.f32 %v664_v29, %v677_v57  ;;  %v4432_v29 = vld [vmem:[%s7073_s29 + $0x48] sm:$0xff]  ;;  %v894_v57 = vpop.f32.mrf.mxu2 }
 0x415   :  { %975 = vmatpush.msra.mxu0 %v4432_v29 }
 0x416   :  { %v4842_v59 = vpop.eup %4841  ;;  %v692_v60 = vmul.f32 1.442695, %v684_v58 }
 0x417   :  { %v702_v61 = vsel %vm359_vm4, %v4842_v59, 0.0  ;;  %976 = vmatpush.msra.mxu0 %v4431_v32 }
 0x418   :  { %4843 = vpow2.f32 %v692_v60  ;;  %703 = vadd.xlane.f32.xlu2 %v702_v61  ;;  %v4782_v60 = vld [vmem:[%s7075_s8 + $0x2] ss:$0 sm:$0xff] }
 0x41b   :  { %v680_v62 = vpop.xlane.xlu2 %679 }
 0x41c   :  { %v685_v63 = vsub.f32 %v665_v36, %v680_v62  ;;  %v897_v62 = vpop.f32.mrf.mxu2 }
 0x41e   :  { %v4844_v0 = vpop.eup %4843  ;;  %v694_v1 = vmul.f32 1.442695, %v685_v63  ;;  %v895_v63 = vadd.f32 %v4782_v60, %v894_v57 }
 0x41f   :  { %v705_v2 = vsel %vm359_vm4, %v4844_v0, 0.0 }
 0x420   :  { %4845 = vpow2.f32 %v694_v1  ;;  %706 = vadd.xlane.f32.xlu0 %v705_v2  ;;  %v4475_v1 = vld [vmem:[%s7071_s1 + $0x70] sm:$0xff]  ;;  %v4474_v2 = vld [vmem:[%s7071_s1 + $0x68] sm:$0xff] }
 0x426   :  { %v4846_v3 = vpop.eup %4845 }
 0x427   :  { %v708_v4 = vsel %vm372_vm5, %v4846_v3, 0.0 }
 0x428   :  { %709 = vadd.xlane.f32.xlu1 %v708_v4  ;;  %v4473_v4 = vld [vmem:[%s7071_s1 + $0x60] sm:$0xff] }
 0x47b   :  { %v698_v5 = vpop.xlane.xlu0 %697 }
 0x47c   :  { %4847 = vrcp.f32 %v698_v5  ;;  %v900_v5 = vpop.f32.mrf.mxu2 }
 0x47d   :  { %v901_v6 = vadd.f32 %v4782_v60, %v900_v5 }
 0x482   :  { %v4848_v7 = vpop.eup %4847 }
 0x483   :  { %v716_v8 = vmul.f32 %v4848_v7, %v4838_v47  ;;  %v701_v9 = vpop.xlane.xlu1 %700 }
 0x484   :  { %4849 = vrcp.f32 %v701_v9  ;;  %v903_v7 = vpop.f32.mrf.mxu2 }
 0x485   :  { %4395 = vmatmul.msk.f32.vlgmr.msrb.gmra.mxu3 %vm359_vm4, %v716_v8  ;;  %v904_v8 = vadd.f32 %v4782_v60, %v903_v7 }
 0x48a   :  { %v4850_v13 = vpop.eup %4849 }
 0x48b   :  { %v704_v14 = vpop.xlane.xlu2 %703  ;;  %v717_v15 = vmul.f32 %v4850_v13, %v4840_v53 }
 0x48c   :  { %4851 = vrcp.f32 %v704_v14  ;;  %v906_v9 = vpop.f32.mrf.mxu2 }
 0x48d   :  { %4396 = vmatmul.msk.f32.gmra.mxu3 %vm359_vm4, %v717_v15  ;;  %v907_v10 = vadd.f32 %v4782_v60, %v906_v9 }
 0x492   :  { %v4852_v16 = vpop.eup %4851 }
 0x493   :  { %v707_v17 = vpop.xlane.xlu0 %706  ;;  %v718_v18 = vmul.f32 %v4852_v16, %v4842_v59 }
 0x494   :  { %4853 = vrcp.f32 %v707_v17 }
 0x495   :  { %4397 = vmatmul.msk.f32.gmra.mxu3 %vm359_vm4, %v718_v18  ;;  %v5688_v18 = vpop.f32.mrf.mxu1 }
 0x49a   :  { %v4854_v19 = vpop.eup %4853 }
 0x49b   :  { %v710_v20 = vpop.xlane.xlu1 %709  ;;  %v719_v21 = vmul.f32 %v4854_v19, %v4844_v0  ;;  %v4476_v0 = vld [vmem:[%s7071_s1 + $0x78] sm:$0xff] }
 0x49c   :  { %4855 = vrcp.f32 %v710_v20 }
 0x49d   :  { %4398 = vmatmul.msk.f32.gmra.mxu3 %vm359_vm4, %v719_v21  ;;  %v5690_v21 = vpop.f32.mrf.mxu1 }
 0x4a2   :  { %v4856_v22 = vpop.eup %4855 }
 0x4a3   :  { %v720_v23 = vmul.f32 %v4856_v22, %v4846_v3  ;;  %v898_v3 = vadd.f32 %v4782_v60, %v897_v62  ;;  %v4784_v22 = vld [vmem:[%s7032_s10 + $0x2] ss:$0 sm:$0xff] }
 0x4a5   :  { %4399 = vmatmul.msk.f32.gmra.mxu3 %vm359_vm4, %v720_v23 }
 0x4ad   :  { %4426 = vmatmul.msk.f32.vlgmr.msra.gmra.mxu3 %vm158_vm1, %v5311_v25 }
 0x4b5   :  { %4427 = vmatmul.msk.f32.gmra.mxu3 %vm158_vm1, %v5329_v31 }
 0x4bd   :  { %4428 = vmatmul.msk.f32.gmra.mxu3 %vm158_vm1, %v5343_v35 }
 0x4c5   :  { %4429 = vmatmul.msk.f32.gmra.mxu3 %vm158_vm1, %v5354_v38 }
 0x4cd   :  { %4430 = vmatmul.msk.f32.gmra.mxu3 %vm158_vm1, %v5365_v41 }
 0x508   :  { %v756_v26 = vpop.f32.mrf.mxu3 }
 0x509   :  { %4401 = vmatmul.msk.f32.vlgmr.msrb.gmra.mxu0 %vm286_vm2, %v756_v26  ;;  %v5695_v26 = vpop.f32.mrf.mxu1 }
 0x50a   :  { %1246 = vmatpush.msrb.mxu0 %v4466_v42 }
 0x50c   :  { %1247 = vmatpush.msrb.mxu0 %v4465_v43 }
 0x50e   :  { %1248 = vmatpush.msrb.mxu0 %v4464_v44 }
 0x510   :  { %v759_v30 = vpop.f32.mrf.mxu3  ;;  %1249 = vmatpush.msrb.mxu0 %v4463_v45 }
 0x511   :  { %4402 = vmatmul.msk.f32.gmra.mxu0 %vm286_vm2, %v759_v30  ;;  %v5698_v32 = vpop.f32.mrf.mxu1 }
 0x518   :  { %v762_v34 = vpop.f32.mrf.mxu3 }
 0x519   :  { %4403 = vmatmul.msk.f32.gmra.mxu0 %vm286_vm2, %v762_v34 }
 0x520   :  { %v765_v36 = vpop.f32.mrf.mxu3 }
 0x521   :  { %4404 = vmatmul.msk.f32.gmra.mxu0 %vm286_vm2, %v765_v36 }
 0x528   :  { %v768_v37 = vpop.f32.mrf.mxu3 }
 0x529   :  { %4405 = vmatmul.msk.f32.gmra.mxu0 %vm286_vm2, %v768_v37 }
 0x530   :  { %v936_v39 = vpop.f32.mrf.mxu3 }
 0x531   :  { %4436 = vmatmul.msk.f32.vlgmr.msra.gmra.mxu0 %vm158_vm1, %v5311_v25  ;;  %v937_v61 = vadd.f32 %v4783_v52, %v936_v39 }
 0x538   :  { %v939_v47 = vpop.f32.mrf.mxu3 }
 0x539   :  { %4437 = vmatmul.msk.f32.gmra.mxu0 %vm158_vm1, %v5329_v31  ;;  %v940_v59 = vadd.f32 %v4783_v52, %v939_v47 }
 0x540   :  { %v942_v48 = vpop.f32.mrf.mxu3 }
 0x541   :  { %4438 = vmatmul.msk.f32.gmra.mxu0 %vm158_vm1, %v5343_v35  ;;  %v943_v58 = vadd.f32 %v4783_v52, %v942_v48 }
 0x548   :  { %v945_v49 = vpop.f32.mrf.mxu3 }
 0x549   :  { %4439 = vmatmul.msk.f32.gmra.mxu0 %vm158_vm1, %v5354_v38  ;;  %v946_v55 = vadd.f32 %v4783_v52, %v945_v49 }
 0x550   :  { %v948_v53 = vpop.f32.mrf.mxu3 }
 0x551   :  { %v949_v54 = vadd.f32 %v4783_v52, %v948_v53  ;;  %4440 = vmatmul.msk.f32.gmra.mxu0 %vm158_vm1, %v5365_v41 }
 0x553   :  { %4441 = vmatpush.xpose.msk.msra.mxu1 %vm286_vm2, %v949_v54 }
 0x557   :  { %4442 = vmatpush.xpose.msk.msra.mxu1 %vm286_vm2, %v946_v55 }
 0x559   :  { %4468 = vmatmul.msk.f32.vlgmr.msrb.gmra.mxu0 %vm158_vm1, %v5311_v25 }
 0x55b   :  { %4443 = vmatpush.xpose.msk.msra.mxu1 %vm286_vm2, %v943_v58 }
 0x55f   :  { %4444 = vmatpush.xpose.msk.msra.mxu1 %vm286_vm2, %v940_v59 }
 0x561   :  { %4469 = vmatmul.msk.f32.gmra.mxu0 %vm158_vm1, %v5329_v31 }
 0x563   :  { %4445 = vmatpush.xpose.msk.msra.mxu1 %vm286_vm2, %v937_v61 }
 0x566   :  { %4446 = vmatmul.msk.f32.vlgmr.msra.gmra.mxu1 %vm286_vm2, %v895_v63 }
 0x567   :  { %1288 = vmatpush.msrb.mxu1 %v4476_v0 }
 0x569   :  { %4470 = vmatmul.msk.f32.gmra.mxu0 %vm158_vm1, %v5343_v35  ;;  %1289 = vmatpush.msrb.mxu1 %v4475_v1 }
 0x56b   :  { %1290 = vmatpush.msrb.mxu1 %v4474_v2 }
 0x56d   :  { %1291 = vmatpush.msrb.mxu1 %v4473_v4 }
 0x56e   :  { %4447 = vmatmul.msk.f32.gmra.mxu1 %vm286_vm2, %v898_v3 }
 0x571   :  { %4471 = vmatmul.msk.f32.gmra.mxu0 %vm158_vm1, %v5354_v38 }
 0x576   :  { %4448 = vmatmul.msk.f32.gmra.mxu1 %vm286_vm2, %v901_v6 }
 0x579   :  { %4472 = vmatmul.msk.f32.gmra.mxu0 %vm158_vm1, %v5365_v41 }
 0x57e   :  { %4449 = vmatmul.msk.f32.gmra.mxu1 %vm286_vm2, %v904_v8 }
 0x586   :  { %v5667_v11 = vpop.f32.mrf.mxu0  ;;  %4450 = vmatmul.msk.f32.gmra.mxu1 %vm286_vm2, %v907_v10 }
 0x58e   :  { %v5670_v12 = vpop.f32.mrf.mxu0  ;;  %4478 = vmatmul.msk.f32.vlgmr.msrb.gmra.mxu1 %vm158_vm1, %v5311_v25 }
 0x596   :  { %v5674_v13 = vpop.f32.mrf.mxu0  ;;  %4479 = vmatmul.msk.f32.gmra.mxu1 %vm158_vm1, %v5329_v31 }
 0x59e   :  { %v5678_v14 = vpop.f32.mrf.mxu0  ;;  %4480 = vmatmul.msk.f32.gmra.mxu1 %vm158_vm1, %v5343_v35 }
 0x5a6   :  { %v5682_v15 = vpop.f32.mrf.mxu0  ;;  %4481 = vmatmul.msk.f32.gmra.mxu1 %vm158_vm1, %v5354_v38 }
 0x5ae   :  { %v978_v16 = vpop.f32.mrf.mxu0  ;;  %4482 = vmatmul.msk.f32.gmra.mxu1 %vm158_vm1, %v5365_v41 }
 0x5af   :  { %v979_v30 = vadd.f32 %v4784_v22, %v978_v16 }
 0x5b6   :  { %v981_v17 = vpop.f32.mrf.mxu0 }
 0x5b7   :  { %v982_v29 = vadd.f32 %v4784_v22, %v981_v17 }
 0x5be   :  { %v984_v19 = vpop.f32.mrf.mxu0 }
 0x5bf   :  { %v985_v28 = vadd.f32 %v4784_v22, %v984_v19 }
 0x5c6   :  { %v987_v20 = vpop.f32.mrf.mxu0 }
 0x5c7   :  { %v988_v27 = vadd.f32 %v4784_v22, %v987_v20 }
 0x5ce   :  { %v990_v23 = vpop.f32.mrf.mxu0 }
 0x5cf   :  { %v991_v24 = vadd.f32 %v4784_v22, %v990_v23 }
 0x5d1   :  { %4451 = vmatpush.msk.msrb.mxu2 %vm431_vm3, %v991_v24 }
 0x5d3   :  { %1150 = vmatpush.msrb.mxu2 %v988_v27 }
 0x5d5   :  { %1151 = vmatpush.msrb.mxu2 %v985_v28 }
 0x5d7   :  { %1152 = vmatpush.msrb.mxu2 %v982_v29 }
 0x5d9   :  { %1153 = vmatpush.msrb.mxu2 %v979_v30 }
 0x5e3   :  { %v1040_v34 = vpop.f32.mrf.mxu1 }
 0x5e4   :  { %v1055_v36 = vmul.f32 0.35355338, %v1040_v34 }
 0x5e6   :  { %v1060_v37 = vadd.f32 %v1055_v36, %v5460_v33 }
 0x5e8   :  { %v1065_v39 = vsel %vm359_vm4, %v1060_v37, -inf }
 0x5e9   :  { %1066 = vmax.xlane.f32.xlu2 %v1065_v39 }
 0x5eb   :  { %v1043_v42 = vpop.f32.mrf.mxu1 }
 0x5ec   :  { %v1056_v43 = vmul.f32 0.35355338, %v1043_v42 }
 0x5ee   :  { %v1061_v44 = vadd.f32 %v1056_v43, %v5467_v40 }
 0x5f0   :  { %v1068_v45 = vsel %vm359_vm4, %v1061_v44, -inf }
 0x5f1   :  { %1069 = vmax.xlane.f32.xlu0 %v1068_v45 }
 0x5f3   :  { %v1046_v47 = vpop.f32.mrf.mxu1 }
 0x5f4   :  { %v1057_v48 = vmul.f32 0.35355338, %v1046_v47 }
 0x5f6   :  { %v1062_v49 = vadd.f32 %v1057_v48, %v5474_v46  ;;  %v4457_v46 = vld [vmem:[%s7033_s11 + $0x10] sm:$0xff] }
 0x5f7   :  { %1202 = vmatpush.msrb.mxu3 %v4457_v46 }
 0x5f8   :  { %v1071_v52 = vsel %vm359_vm4, %v1062_v49, -inf }
 0x5f9   :  { %1072 = vmax.xlane.f32.xlu1 %v1071_v52 }
 0x5fb   :  { %v1049_v53 = vpop.f32.mrf.mxu1 }
 0x5fc   :  { %v1058_v54 = vmul.f32 0.35355338, %v1049_v53  ;;  %v4486_v53 = vld [vmem:[%s7073_s29 + $0x78] sm:$0xff] }
 0x5fd   :  { %1330 = vmatpush.msra.mxu2 %v4486_v53  ;;  %v5061_v53 = vld [vmem:[%s7076_s28] sm:$0xff] }
 0x5fe   :  { %v1063_v33 = vadd.f32 %v1058_v54, %v5481_v51  ;;  %v4786_v51 = vld [vmem:[%s7074_s30 + $0x3] ss:$0 sm:$0xff]  ;;  %v4485_v54 = vld [vmem:[%s7073_s29 + $0x70] sm:$0xff] }
 0x5ff   :  { %1331 = vmatpush.msra.mxu2 %v4485_v54 }
 0x600   :  { %v1074_v55 = vsel %vm359_vm4, %v1063_v33, -inf }
 0x601   :  { %1075 = vmax.xlane.f32.xlu2 %v1074_v55  ;;  %v4483_v55 = vld [vmem:[%s7073_s29 + $0x60] sm:$0xff] }
 0x603   :  { %v1052_v57 = vpop.f32.mrf.mxu1 }
 0x604   :  { %v1059_v58 = vmul.f32 0.35355338, %v1052_v57 }
 0x606   :  { %v1064_v40 = vadd.f32 %v1059_v58, %v5488_v56 }
 0x608   :  { %v1077_v59 = vsel %vm372_vm5, %v1064_v40, -inf }
 0x609   :  { %1078 = vmax.xlane.f32.xlu0 %v1077_v59 }
 0x60b   :  { %v1293_v60 = vpop.f32.mrf.mxu1 }
 0x60c   :  { %v1294_v4 = vadd.f32 %v4786_v51, %v1293_v60 }
 0x613   :  { %v1296_v61 = vpop.f32.mrf.mxu1 }
 0x614   :  { %v1297_v3 = vadd.f32 %v4786_v51, %v1296_v61 }
 0x61b   :  { %v1299_v62 = vpop.f32.mrf.mxu1 }
 0x61c   :  { %v1300_v2 = vadd.f32 %v4786_v51, %v1299_v62 }
 0x623   :  { %v1302_v63 = vpop.f32.mrf.mxu1 }
 0x624   :  { %v1303_v56 = vadd.f32 %v4786_v51, %v1302_v63 }
 0x62b   :  { %v1305_v0 = vpop.f32.mrf.mxu1 }
 0x62c   :  { %v1306_v1 = vadd.f32 %v4786_v51, %v1305_v0 }
 0x62e   :  { %4493 = vmatpush.xpose.msk.msra.mxu3 %vm286_vm2, %v1306_v1 }
 0x632   :  { %4494 = vmatpush.xpose.msk.msra.mxu3 %vm286_vm2, %v1303_v56 }
 0x636   :  { %4495 = vmatpush.xpose.msk.msra.mxu3 %vm286_vm2, %v1300_v2 }
 0x63a   :  { %4496 = vmatpush.xpose.msk.msra.mxu3 %vm286_vm2, %v1297_v3 }
 0x63e   :  { %4497 = vmatpush.xpose.msk.msra.mxu3 %vm286_vm2, %v1294_v4  ;;  %v1251_v4 = vpop.f32.mrf.mxu0 }
 0x65c   :  { %v1067_v5 = vpop.xlane.xlu2 %1066 }
 0x65d   :  { %v1080_v6 = vsub.f32 %v1060_v37, %v1067_v5 }
 0x65f   :  { %v1085_v7 = vmul.f32 1.442695, %v1080_v6  ;;  %v4785_v6 = vld [vmem:[%s7075_s8 + $0x3] ss:$0 sm:$0xff] }
 0x661   :  { %4857 = vpow2.f32 %v1085_v7  ;;  %v1254_v7 = vpop.f32.mrf.mxu0 }
 0x664   :  { %v1070_v8 = vpop.xlane.xlu0 %1069 }
 0x665   :  { %v1081_v9 = vsub.f32 %v1061_v44, %v1070_v8  ;;  %v1252_v8 = vadd.f32 %v4785_v6, %v1251_v4 }
 0x667   :  { %v4858_v10 = vpop.eup %4857  ;;  %v1087_v16 = vmul.f32 1.442695, %v1081_v9 }
 0x668   :  { %v1095_v17 = vsel %vm359_vm4, %v4858_v10, 0.0 }
 0x669   :  { %4859 = vpow2.f32 %v1087_v16  ;;  %1096 = vadd.xlane.f32.xlu1 %v1095_v17  ;;  %v1257_v16 = vpop.f32.mrf.mxu0 }
 0x66c   :  { %v1073_v19 = vpop.xlane.xlu1 %1072 }
 0x66d   :  { %v1082_v20 = vsub.f32 %v1062_v49, %v1073_v19  ;;  %v1258_v19 = vadd.f32 %v4785_v6, %v1257_v16 }
 0x66f   :  { %v4860_v22 = vpop.eup %4859  ;;  %v1089_v23 = vmul.f32 1.442695, %v1082_v20 }
 0x670   :  { %v1098_v24 = vsel %vm359_vm4, %v4860_v22, 0.0 }
 0x671   :  { %4861 = vpow2.f32 %v1089_v23  ;;  %1099 = vadd.xlane.f32.xlu2 %v1098_v24 }
 0x674   :  { %v1076_v27 = vpop.xlane.xlu2 %1075 }
 0x675   :  { %v1083_v28 = vsub.f32 %v1063_v33, %v1076_v27  ;;  %v4484_v33 = vld [vmem:[%s7073_s29 + $0x68] sm:$0xff] }
 0x676   :  { %1332 = vmatpush.msra.mxu2 %v4484_v33 }
 0x677   :  { %v4862_v29 = vpop.eup %4861  ;;  %v1091_v30 = vmul.f32 1.442695, %v1083_v28 }
 0x678   :  { %v1101_v34 = vsel %vm359_vm4, %v4862_v29, 0.0  ;;  %1333 = vmatpush.msra.mxu2 %v4483_v55 }
 0x679   :  { %4863 = vpow2.f32 %v1091_v30  ;;  %1102 = vadd.xlane.f32.xlu0 %v1101_v34 }
 0x67c   :  { %v1079_v36 = vpop.xlane.xlu0 %1078 }
 0x67d   :  { %v1084_v37 = vsub.f32 %v1064_v40, %v1079_v36 }
 0x67f   :  { %v4864_v39 = vpop.eup %4863  ;;  %v1093_v42 = vmul.f32 1.442695, %v1084_v37 }
 0x680   :  { %v1104_v43 = vsel %vm359_vm4, %v4864_v39, 0.0 }
 0x681   :  { %4865 = vpow2.f32 %v1093_v42  ;;  %1105 = vadd.xlane.f32.xlu1 %v1104_v43 }
 0x687   :  { %v4866_v44 = vpop.eup %4865 }
 0x688   :  { %v1107_v45 = vsel %vm372_vm5, %v4866_v44, 0.0 }
 0x689   :  { %1108 = vadd.xlane.f32.xlu2 %v1107_v45 }
 0x6dc   :  { %v1097_v47 = vpop.xlane.xlu1 %1096 }
 0x6dd   :  { %4867 = vrcp.f32 %v1097_v47 }
 0x6e3   :  { %v4868_v48 = vpop.eup %4867 }
 0x6e4   :  { %v1115_v49 = vmul.f32 %v4868_v48, %v4858_v10  ;;  %v1100_v52 = vpop.xlane.xlu2 %1099  ;;  %v1255_v10 = vadd.f32 %v4785_v6, %v1254_v7 }
 0x6e5   :  { %4869 = vrcp.f32 %v1100_v52 }
 0x6e6   :  { %4452 = vmatmul.msk.f32.vlgmr.msrb.gmra.mxu2 %vm359_vm4, %v1115_v49 }
 0x6eb   :  { %v4870_v57 = vpop.eup %4869 }
 0x6ec   :  { %v1103_v58 = vpop.xlane.xlu0 %1102  ;;  %v1116_v40 = vmul.f32 %v4870_v57, %v4860_v22  ;;  %v1260_v22 = vpop.f32.mrf.mxu0 }
 0x6ed   :  { %4871 = vrcp.f32 %v1103_v58  ;;  %v1261_v23 = vadd.f32 %v4785_v6, %v1260_v22  ;;  %v5062_v58 = vld [vmem:[%s7076_s28 + $0x8] sm:$0xff] }
 0x6ee   :  { %4453 = vmatmul.msk.f32.gmra.mxu2 %vm359_vm4, %v1116_v40 }
 0x6f3   :  { %v4872_v59 = vpop.eup %4871 }
 0x6f4   :  { %v1106_v60 = vpop.xlane.xlu1 %1105  ;;  %v1117_v46 = vmul.f32 %v4872_v59, %v4862_v29  ;;  %v1263_v27 = vpop.f32.mrf.mxu0  ;;  %v4787_v29 = vld [vmem:[%s7032_s10 + $0x3] ss:$0 sm:$0xff] }
 0x6f5   :  { %4873 = vrcp.f32 %v1106_v60  ;;  %v1264_v28 = vadd.f32 %v4785_v6, %v1263_v27 }
 0x6f6   :  { %4454 = vmatmul.msk.f32.gmra.mxu2 %vm359_vm4, %v1117_v46 }
 0x6fb   :  { %v4874_v61 = vpop.eup %4873 }
 0x6fc   :  { %v1109_v62 = vpop.xlane.xlu2 %1108  ;;  %v1118_v63 = vmul.f32 %v4874_v61, %v4864_v39  ;;  %v5063_v61 = vld [vmem:[%s7076_s28 + $0x10] sm:$0xff] }
 0x6fd   :  { %4875 = vrcp.f32 %v1109_v62 }
 0x6fe   :  { %4455 = vmatmul.msk.f32.gmra.mxu2 %vm359_vm4, %v1118_v63 }
 0x703   :  { %v4876_v51 = vpop.eup %4875 }
 0x704   :  { %v1119_v0 = vmul.f32 %v4876_v51, %v4866_v44 }
 0x706   :  { %4456 = vmatmul.msk.f32.gmra.mxu2 %vm359_vm4, %v1119_v0 }
 0x70e   :  { %4488 = vmatmul.msk.f32.vlgmr.msra.gmra.mxu2 %vm158_vm1, %v5311_v25 }
 0x716   :  { %4489 = vmatmul.msk.f32.gmra.mxu2 %vm158_vm1, %v5329_v31 }
 0x71e   :  { %4490 = vmatmul.msk.f32.gmra.mxu2 %vm158_vm1, %v5343_v35 }
 0x726   :  { %4491 = vmatmul.msk.f32.gmra.mxu2 %vm158_vm1, %v5354_v38 }
 0x72e   :  { %4492 = vmatmul.msk.f32.gmra.mxu2 %vm158_vm1, %v5365_v41 }
 0x769   :  { %v1155_v1 = vpop.f32.mrf.mxu2 }
 0x76a   :  { %4458 = vmatmul.msk.f32.vlgmr.msrb.gmra.mxu3 %vm286_vm2, %v1155_v1  ;;  %v5064_v1 = vld [vmem:[%s7076_s28 + $0x18] sm:$0xff] }
 0x771   :  { %v1158_v56 = vpop.f32.mrf.mxu2 }
 0x772   :  { %4459 = vmatmul.msk.f32.gmra.mxu3 %vm286_vm2, %v1158_v56 }
 0x779   :  { %v1161_v2 = vpop.f32.mrf.mxu2 }
 0x77a   :  { %4460 = vmatmul.msk.f32.gmra.mxu3 %vm286_vm2, %v1161_v2 }
 0x781   :  { %v1164_v3 = vpop.f32.mrf.mxu2 }
 0x782   :  { %4461 = vmatmul.msk.f32.gmra.mxu3 %vm286_vm2, %v1164_v3 }
 0x789   :  { %v1167_v5 = vpop.f32.mrf.mxu2 }
 0x78a   :  { %4462 = vmatmul.msk.f32.gmra.mxu3 %vm286_vm2, %v1167_v5  ;;  %v5065_v5 = vld [vmem:[%s7076_s28 + $0x20] sm:$0x3] }
 0x791   :  { %v1335_v9 = vpop.f32.mrf.mxu2 }
 0x792   :  { %4498 = vmatmul.msk.f32.vlgmr.msra.gmra.mxu3 %vm286_vm2, %v1252_v8  ;;  %v1336_v42 = vadd.f32 %v4787_v29, %v1335_v9 }
 0x799   :  { %v1338_v17 = vpop.f32.mrf.mxu2 }
 0x79a   :  { %4499 = vmatmul.msk.f32.gmra.mxu3 %vm286_vm2, %v1255_v10  ;;  %v1339_v39 = vadd.f32 %v4787_v29, %v1338_v17 }
 0x7a1   :  { %v1341_v20 = vpop.f32.mrf.mxu2 }
 0x7a2   :  { %4500 = vmatmul.msk.f32.gmra.mxu3 %vm286_vm2, %v1258_v19  ;;  %v1342_v37 = vadd.f32 %v4787_v29, %v1341_v20 }
 0x7a9   :  { %v1344_v24 = vpop.f32.mrf.mxu2 }
 0x7aa   :  { %4501 = vmatmul.msk.f32.gmra.mxu3 %vm286_vm2, %v1261_v23  ;;  %v1345_v36 = vadd.f32 %v4787_v29, %v1344_v24 }
 0x7b1   :  { %v1347_v30 = vpop.f32.mrf.mxu2 }
 0x7b2   :  { %v1348_v34 = vadd.f32 %v4787_v29, %v1347_v30  ;;  %4502 = vmatmul.msk.f32.gmra.mxu3 %vm286_vm2, %v1264_v28 }
 0x7b4   :  { %4503 = vmatpush.msk.msra.mxu0 %vm431_vm3, %v1348_v34 }
 0x7b6   :  { %1507 = vmatpush.msra.mxu0 %v1345_v36 }
 0x7b8   :  { %1508 = vmatpush.msra.mxu0 %v1342_v37 }
 0x7ba   :  { %1509 = vmatpush.msra.mxu0 %v1339_v39 }
 0x7bc   :  { %1510 = vmatpush.msra.mxu0 %v1336_v42 }
 0x7ed   :  { %v5770_v43 = vpop.f32.mrf.mxu3 }
 0x7f5   :  { %v5772_v44 = vpop.f32.mrf.mxu3 }
 0x7fd   :  { %v5774_v45 = vpop.f32.mrf.mxu3 }
 0x805   :  { %v5776_v47 = vpop.f32.mrf.mxu3 }
 0x80d   :  { %v5778_v48 = vpop.f32.mrf.mxu3 }
 0x815   :  { %v1397_v49 = vpop.f32.mrf.mxu3 }
 0x816   :  { %v1412_v52 = vmul.f32 0.35355338, %v1397_v49 }
 0x818   :  { %v1417_v54 = vadd.f32 %v5061_v53, %v1412_v52 }
 0x81a   :  { %v1422_v33 = vsel %vm359_vm4, %v1417_v54, -inf }
 0x81b   :  { %1423 = vmax.xlane.f32.xlu0 %v1422_v33 }
 0x81d   :  { %v1400_v55 = vpop.f32.mrf.mxu3 }
 0x81e   :  { %v1413_v57 = vmul.f32 0.35355338, %v1400_v55 }
 0x820   :  { %v1418_v40 = vadd.f32 %v5062_v58, %v1413_v57 }
 0x822   :  { %v1425_v59 = vsel %vm359_vm4, %v1418_v40, -inf }
 0x823   :  { %1426 = vmax.xlane.f32.xlu1 %v1425_v59 }
 0x825   :  { %v1403_v60 = vpop.f32.mrf.mxu3 }
 0x826   :  { %v1414_v46 = vmul.f32 0.35355338, %v1403_v60  ;;  %v4509_v60 = vld [vmem:[%s7033_s11 + $0x18] sm:$0xff] }
 0x827   :  { %1559 = vmatpush.msra.mxu1 %v4509_v60 }
 0x828   :  { %v1419_v62 = vadd.f32 %v5063_v61, %v1414_v46 }
 0x82a   :  { %v1428_v63 = vsel %vm359_vm4, %v1419_v62, -inf }
 0x82b   :  { %1429 = vmax.xlane.f32.xlu2 %v1428_v63 }
 0x82d   :  { %v1406_v51 = vpop.f32.mrf.mxu3 }
 0x82e   :  { %v1415_v0 = vmul.f32 0.35355338, %v1406_v51 }
 0x830   :  { %v1420_v56 = vadd.f32 %v5064_v1, %v1415_v0 }
 0x832   :  { %v1431_v2 = vsel %vm359_vm4, %v1420_v56, -inf }
 0x833   :  { %1432 = vmax.xlane.f32.xlu0 %v1431_v2 }
 0x835   :  { %v1409_v3 = vpop.f32.mrf.mxu3 }
 0x836   :  { %v1416_v4 = vmul.f32 0.35355338, %v1409_v3 }
 0x838   :  { %v1421_v6 = vadd.f32 %v5065_v5, %v1416_v4 }
 0x83a   :  { %v1434_v7 = vsel %vm372_vm5, %v1421_v6, -inf }
 0x83b   :  { %1435 = vmax.xlane.f32.xlu1 %v1434_v7 }
 0x88e   :  { %v1424_v8 = vpop.xlane.xlu0 %1423 }
 0x88f   :  { %v1437_v9 = vsub.f32 %v1417_v54, %v1424_v8 }
 0x891   :  { %v1442_v10 = vmul.f32 1.442695, %v1437_v9 }
 0x893   :  { %4877 = vpow2.f32 %v1442_v10  ;;  %v853_v10 = vadd.f32 %v5688_v18, %v5667_v11 }
 0x896   :  { %v1427_v16 = vpop.xlane.xlu1 %1426 }
 0x897   :  { %v1438_v17 = vsub.f32 %v1418_v40, %v1427_v16  ;;  %v1219_v16 = vadd.f32 %v5770_v43, %v853_v10  ;;  %v859_v43 = vadd.f32 %v5695_v26, %v5674_v13 }
 0x899   :  { %v4878_v19 = vpop.eup %4877  ;;  %v1444_v20 = vmul.f32 1.442695, %v1438_v17  ;;  %v4788_v17 = vld [vmem:[%s7034_s12] ss:$0 sm:$0xff] }
 0x89a   :  { %v1452_v22 = vsel %vm359_vm4, %v4878_v19, 0.0 }
 0x89b   :  { %4879 = vpow2.f32 %v1444_v20  ;;  %1453 = vadd.xlane.f32.xlu2 %v1452_v22 }
 0x89e   :  { %v1430_v23 = vpop.xlane.xlu2 %1429 }
 0x89f   :  { %v1439_v24 = vsub.f32 %v1419_v62, %v1430_v23  ;;  %v856_v23 = vadd.f32 %v5690_v21, %v5670_v12 }
 0x8a1   :  { %v4880_v27 = vpop.eup %4879  ;;  %v1446_v28 = vmul.f32 1.442695, %v1439_v24 }
 0x8a2   :  { %v1455_v29 = vsel %vm359_vm4, %v4880_v27, 0.0 }
 0x8a3   :  { %4881 = vpow2.f32 %v1446_v28  ;;  %1456 = vadd.xlane.f32.xlu0 %v1455_v29 }
 0x8a6   :  { %v1433_v30 = vpop.xlane.xlu0 %1432 }
 0x8a7   :  { %v1440_v34 = vsub.f32 %v1420_v56, %v1433_v30 }
 0x8a9   :  { %v4882_v36 = vpop.eup %4881  ;;  %v1448_v37 = vmul.f32 1.442695, %v1440_v34  ;;  %v1221_v34 = vadd.f32 %v5774_v45, %v859_v43  ;;  %v865_v45 = vadd.f32 %v5626_v50, %v5682_v15 }
 0x8aa   :  { %v1458_v39 = vsel %vm359_vm4, %v4882_v36, 0.0 }
 0x8ab   :  { %4883 = vpow2.f32 %v1448_v37  ;;  %1459 = vadd.xlane.f32.xlu1 %v1458_v39 }
 0x8ae   :  { %v1436_v42 = vpop.xlane.xlu1 %1435 }
 0x8af   :  { %v1441_v49 = vsub.f32 %v1421_v6, %v1436_v42 }
 0x8b1   :  { %v4884_v52 = vpop.eup %4883  ;;  %v1450_v53 = vmul.f32 1.442695, %v1441_v49 }
 0x8b2   :  { %v1461_v54 = vsel %vm359_vm4, %v4884_v52, 0.0 }
 0x8b3   :  { %4885 = vpow2.f32 %v1450_v53  ;;  %1462 = vadd.xlane.f32.xlu2 %v1461_v54 }
 0x8b9   :  { %v4886_v33 = vpop.eup %4885 }
 0x8ba   :  { %v1464_v55 = vsel %vm372_vm5, %v4886_v33, 0.0 }
 0x8bb   :  { %1465 = vadd.xlane.f32.xlu0 %v1464_v55 }
 0x90e   :  { %v1454_v57 = vpop.xlane.xlu2 %1453 }
 0x90f   :  { %4887 = vrcp.f32 %v1454_v57 }
 0x915   :  { %v4888_v58 = vpop.eup %4887 }
 0x916   :  { %v1472_v40 = vmul.f32 %v4888_v58, %v4878_v19  ;;  %v1457_v59 = vpop.xlane.xlu0 %1456 }
 0x917   :  { %4889 = vrcp.f32 %v1457_v59 }
 0x918   :  { %4504 = vmatmul.msk.f32.vlgmr.msra.gmra.mxu0 %vm359_vm4, %v1472_v40 }
 0x91d   :  { %v4890_v46 = vpop.eup %4889 }
 0x91e   :  { %v1460_v61 = vpop.xlane.xlu1 %1459  ;;  %v1473_v62 = vmul.f32 %v4890_v46, %v4880_v27  ;;  %v1220_v27 = vadd.f32 %v5772_v44, %v856_v23  ;;  %v862_v44 = vadd.f32 %v5698_v32, %v5678_v14  ;;  %v1732_v23 = vld [vmem:[%s7037_s15 + $0x8] sm:$0xff] }
 0x91f   :  { %4891 = vrcp.f32 %v1460_v61 }
 0x920   :  { %4505 = vmatmul.msk.f32.gmra.mxu0 %vm359_vm4, %v1473_v62  ;;  %v1222_v39 = vadd.f32 %v5776_v47, %v862_v44 }
 0x925   :  { %v4892_v63 = vpop.eup %4891 }
 0x926   :  { %v1463_v51 = vpop.xlane.xlu2 %1462  ;;  %v1474_v0 = vmul.f32 %v4892_v63, %v4882_v36 }
 0x927   :  { %4893 = vrcp.f32 %v1463_v51 }
 0x928   :  { %4506 = vmatmul.msk.f32.gmra.mxu0 %vm359_vm4, %v1474_v0 }
 0x92d   :  { %v4894_v1 = vpop.eup %4893 }
 0x92e   :  { %v1466_v56 = vpop.xlane.xlu0 %1465  ;;  %v1475_v2 = vmul.f32 %v4894_v1, %v4884_v52  ;;  %v1223_v52 = vadd.f32 %v5778_v48, %v865_v45 }
 0x92f   :  { %4895 = vrcp.f32 %v1466_v56 }
 0x930   :  { %4507 = vmatmul.msk.f32.gmra.mxu0 %vm359_vm4, %v1475_v2 }
 0x935   :  { %v4896_v3 = vpop.eup %4895 }
 0x936   :  { %v1476_v4 = vmul.f32 %v4896_v3, %v4886_v33  ;;  %v5102_v33 = vmov 32.0  }
 0x937   :  { %4897 = vrcp.f32 %v5102_v33 }
 0x938   :  { %4508 = vmatmul.msk.f32.gmra.mxu0 %vm359_vm4, %v1476_v4 }
 0x93d   :  { %v4898_v55 = vpop.eup %4897 }
 0x93e   :  { %v1614_v50 = vmul.f32 32.0, %v4898_v55  ;;  %vm1618_vm7 = vweird.f32 %v4898_v55 }
 0x940   :  { %v1615_v15 = vsub.f32 1.0, %v1614_v50 }
 0x995   :  { %v1512_v5 = vpop.f32.mrf.mxu0 }
 0x996   :  { %4510 = vmatmul.msk.f32.vlgmr.msra.gmra.mxu1 %vm286_vm2, %v1512_v5 }
 0x99d   :  { %v1515_v6 = vpop.f32.mrf.mxu0 }
 0x99e   :  { %4511 = vmatmul.msk.f32.gmra.mxu1 %vm286_vm2, %v1515_v6 }
 0x9a5   :  { %v1518_v7 = vpop.f32.mrf.mxu0 }
 0x9a6   :  { %4512 = vmatmul.msk.f32.gmra.mxu1 %vm286_vm2, %v1518_v7 }
 0x9ad   :  { %v1521_v8 = vpop.f32.mrf.mxu0 }
 0x9ae   :  { %4513 = vmatmul.msk.f32.gmra.mxu1 %vm286_vm2, %v1521_v8 }
 0x9b5   :  { %v1524_v9 = vpop.f32.mrf.mxu0 }
 0x9b6   :  { %4514 = vmatmul.msk.f32.gmra.mxu1 %vm286_vm2, %v1524_v9 }
 0xa13   :  { %v1561_v19 = vpop.f32.mrf.mxu1 }
 0xa14   :  { %v1576_v20 = vadd.f32 %v1561_v19, %v1219_v16 }
 0xa16   :  { %v1585_v22 = vadd.f32 %v4788_v17, %v1576_v20  ;;  %v1734_v20 = vld [vmem:[%s7037_s15 + $0x18] sm:$0xff] }
 0xa17   :  { %1766 = vmatpush.msrb.mxu2 %v1734_v20 }
 0xa18   :  { %v1590_v24 = vadd.f32 %v1585_v22, %v5311_v25  ;;  %v1733_v22 = vld [vmem:[%s7037_s15 + $0x10] sm:$0xff] }
 0xa19   :  { %1767 = vmatpush.msrb.mxu2 %v1733_v22 }
 0xa1a   :  { %v1597_v28 = vsel %vm158_vm1, %v1590_v24, 0.0 }
 0xa1b   :  { %v1564_v29 = vpop.f32.mrf.mxu1  ;;  %1598 = vadd.xlane.f32.xlu1 %v1597_v28  ;;  %1768 = vmatpush.msrb.mxu2 %v1732_v23 }
 0xa1c   :  { %v1577_v11 = vadd.f32 %v1564_v29, %v1220_v27 }
 0xa1e   :  { %v1586_v18 = vadd.f32 %v4788_v17, %v1577_v11 }
 0xa20   :  { %v1591_v30 = vadd.f32 %v1586_v18, %v5329_v31 }
 0xa22   :  { %v1600_v36 = vsel %vm158_vm1, %v1591_v30, 0.0 }
 0xa23   :  { %1601 = vadd.xlane.f32.xlu2 %v1600_v36  ;;  %v1567_v12 = vpop.f32.mrf.mxu1 }
 0xa24   :  { %v1578_v25 = vadd.f32 %v1567_v12, %v1221_v34 }
 0xa26   :  { %v1587_v21 = vadd.f32 %v4788_v17, %v1578_v25 }
 0xa28   :  { %v1592_v37 = vadd.f32 %v1587_v21, %v5343_v35 }
 0xa2a   :  { %v1603_v42 = vsel %vm158_vm1, %v1592_v37, 0.0 }
 0xa2b   :  { %1604 = vadd.xlane.f32.xlu0 %v1603_v42  ;;  %v1570_v13 = vpop.f32.mrf.mxu1 }
 0xa2c   :  { %v1579_v31 = vadd.f32 %v1570_v13, %v1222_v39 }
 0xa2e   :  { %v1588_v26 = vadd.f32 %v4788_v17, %v1579_v31  ;;  %v5896_v31 = vld [vmem:[%s7035_s13] ss:$0 sm:$0xff] }
 0xa30   :  { %v1593_v49 = vadd.f32 %v1588_v26, %v5354_v38  ;;  %v1616_v38 = vmul.f32 %v4898_v55, %v1615_v15 }
 0xa32   :  { %v1606_v53 = vsel %vm158_vm1, %v1593_v49, 0.0  ;;  %v1617_v57 = vadd.f32 %v4898_v55, %v1616_v38 }
 0xa33   :  { %1607 = vadd.xlane.f32.xlu1 %v1606_v53  ;;  %v1573_v14 = vpop.f32.mrf.mxu1 }
 0xa34   :  { %v1580_v35 = vadd.f32 %v1573_v14, %v1223_v52  ;;  %v5846_v48 = vsel %vm1618_vm7, %v4898_v55, %v1617_v57 }
 0xa36   :  { %v1589_v32 = vadd.f32 %v4788_v17, %v1580_v35 }
 0xa38   :  { %v1594_v47 = vadd.f32 %v1589_v32, %v5365_v41 }
 0xa3a   :  { %v1610_v54 = vsel %vm1609_vm6, %v1594_v47, 0.0 }
 0xa3b   :  { %1611 = vadd.xlane.f32.xlu2 %v1610_v54 }
 0xa8e   :  { %v1599_v58 = vpop.xlane.xlu1 %1598 }
 0xa8f   :  { %v1620_v40 = vmul.f32 %v5846_v48, %v1599_v58 }
 0xa91   :  { %v5849_v59 = vsub.f32 %v1590_v24, %v1620_v40  ;;  %v1731_v24 = vld [vmem:[%s7037_s15] sm:$0xff] }
 0xa92   :  { %1769 = vmatpush.msrb.mxu2 %v1731_v24 }
 0xa93   :  { %v1630_v41 = vmul.f32 %v5849_v59, %v5849_v59 }
 0xa95   :  { %v1635_v60 = vsel %vm158_vm1, %v1630_v41, 0.0 }
 0xa96   :  { %v1602_v46 = vpop.xlane.xlu2 %1601  ;;  %1636 = vadd.xlane.f32.xlu0 %v1635_v60 }
 0xa97   :  { %v1621_v61 = vmul.f32 %v5846_v48, %v1602_v46 }
 0xa99   :  { %v5855_v62 = vsub.f32 %v1591_v30, %v1621_v61 }
 0xa9b   :  { %v1631_v63 = vmul.f32 %v5855_v62, %v5855_v62 }
 0xa9d   :  { %v1638_v51 = vsel %vm158_vm1, %v1631_v63, 0.0 }
 0xa9e   :  { %v1605_v0 = vpop.xlane.xlu0 %1604  ;;  %1639 = vadd.xlane.f32.xlu1 %v1638_v51 }
 0xa9f   :  { %v1622_v1 = vmul.f32 %v5846_v48, %v1605_v0 }
 0xaa1   :  { %v5861_v56 = vsub.f32 %v1592_v37, %v1622_v1 }
 0xaa3   :  { %v1632_v2 = vmul.f32 %v5861_v56, %v5861_v56 }
 0xaa5   :  { %v1641_v3 = vsel %vm158_vm1, %v1632_v2, 0.0 }
 0xaa6   :  { %v1608_v4 = vpop.xlane.xlu1 %1607  ;;  %1642 = vadd.xlane.f32.xlu2 %v1641_v3 }
 0xaa7   :  { %v1623_v5 = vmul.f32 %v5846_v48, %v1608_v4 }
 0xaa9   :  { %v5867_v6 = vsub.f32 %v1593_v49, %v1623_v5  ;;  %v5901_v49 = vld [vmem:[%s7036_s14] ss:$0 sm:$0xff] }
 0xaab   :  { %v1633_v7 = vmul.f32 %v5867_v6, %v5867_v6 }
 0xaad   :  { %v1644_v8 = vsel %vm158_vm1, %v1633_v7, 0.0 }
 0xaae   :  { %1645 = vadd.xlane.f32.xlu0 %v1644_v8  ;;  %v1612_v9 = vpop.xlane.xlu2 %1611 }
 0xaaf   :  { %v1624_v10 = vmul.f32 %v5846_v48, %v1612_v9 }
 0xab1   :  { %v5873_v16 = vsub.f32 %v1594_v47, %v1624_v10 }
 0xab3   :  { %v1634_v17 = vmul.f32 %v5873_v16, %v5873_v16 }
 0xab5   :  { %v1647_v19 = vsel %vm1609_vm6, %v1634_v17, 0.0 }
 0xab6   :  { %1648 = vadd.xlane.f32.xlu1 %v1647_v19 }
 0xb09   :  { %v1637_v27 = vpop.xlane.xlu0 %1636 }
 0xb0a   :  { %v1650_v28 = vmul.f32 %v1637_v27, %v5846_v48 }
 0xb0c   :  { %v1655_v29 = vadd.f32 1e-05, %v1650_v28 }
 0xb0e   :  { %4899 = vrsqrt.f32 %v1655_v29  ;;  %vm1666_vm9 = vweird.f32 %v1655_v29 }
 0xb11   :  { %v1640_v11 = vpop.xlane.xlu1 %1639 }
 0xb12   :  { %v1651_v18 = vmul.f32 %v1640_v11, %v5846_v48 }
 0xb14   :  { %v4900_v43 = vpop.eup %4899  ;;  %v1656_v30 = vadd.f32 1e-05, %v1651_v18 }
 0xb15   :  { %v1661_v34 = vmul.f32 %v4900_v43, %v1655_v29  ;;  %vm1667_vm8 = vweird.f32 %v4900_v43 }
 0xb16   :  { %4901 = vrsqrt.f32 %v1656_v30  ;;  %vm1668_vm10 = vmor %vm1666_vm9, %vm1667_vm8  ;;  %vm1676_vm12 = vweird.f32 %v1656_v30 }
 0xb17   :  { %v1662_v36 = vmul.f32 %v4900_v43, %v1661_v34 }
 0xb19   :  { %v1663_v12 = vmul.f32 0.5, %v1662_v36  ;;  %v1643_v25 = vpop.xlane.xlu2 %1642 }
 0xb1a   :  { %v1652_v21 = vmul.f32 %v1643_v25, %v5846_v48 }
 0xb1b   :  { %v1664_v44 = vsub.f32 1.5, %v1663_v12 }
 0xb1c   :  { %v4902_v37 = vpop.eup %4901  ;;  %v1657_v39 = vadd.f32 1e-05, %v1652_v21 }
 0xb1d   :  { %v1665_v42 = vmul.f32 %v4900_v43, %v1664_v44  ;;  %v1671_v13 = vmul.f32 %v4902_v37, %v1656_v30  ;;  %vm1677_vm11 = vweird.f32 %v4902_v37 }
 0xb1e   :  { %4903 = vrsqrt.f32 %v1657_v39  ;;  %vm1678_vm13 = vmor %vm1676_vm12, %vm1677_vm11  ;;  %vm1686_vm15 = vweird.f32 %v1657_v39 }
 0xb1f   :  { %v1669_v26 = vsel %vm1668_vm10, %v4900_v43, %v1665_v42  ;;  %v1672_v45 = vmul.f32 %v4902_v37, %v1671_v13  ;;  %v5943_v43 = vld [vmem:[%s7038_s16] ss:$0 sm:$0xff]  ;;  %v1992_v13 = vld [vmem:[%s7039_s17 + $0x30] sm:$0xff] }
 0xb20   :  { %v1710_v52 = vmul.f32 %v1669_v26, %v5849_v59 }
 0xb21   :  { %v1673_v53 = vmul.f32 0.5, %v1672_v45  ;;  %v1646_v14 = vpop.xlane.xlu0 %1645 }
 0xb22   :  { %v1718_v35 = vmul.f32 %v5896_v31, %v1710_v52  ;;  %v1653_v32 = vmul.f32 %v1646_v14, %v5846_v48  ;;  %v1991_v52 = vld [vmem:[%s7039_s17 + $0x28] sm:$0xff] }
 0xb23   :  { %v1674_v47 = vsub.f32 1.5, %v1673_v53 }
 0xb24   :  { %v4904_v54 = vpop.eup %4903  ;;  %v5907_v33 = vadd.f32 %v5901_v49, %v1718_v35  ;;  %v1658_v55 = vadd.f32 1e-05, %v1653_v32  ;;  %v1990_v32 = vld [vmem:[%s7039_s17 + $0x20] sm:$0xff] }
 0xb25   :  { %v1675_v50 = vmul.f32 %v4902_v37, %v1674_v47  ;;  %v1681_v15 = vmul.f32 %v4904_v54, %v1657_v39  ;;  %vm1687_vm14 = vweird.f32 %v4904_v54  ;;  %v1993_v39 = vld [vmem:[%s7039_s17 + $0x38] sm:$0xff] }
 0xb26   :  { %4905 = vrsqrt.f32 %v1658_v55  ;;  %4515 = vmatmul.msk.f32.vlgmr.msrb.gmra.mxu2 %vm158_vm1, %v5907_v33  ;;  %vm1688_vm0 = vmor %vm1686_vm15, %vm1687_vm14  ;;  %vm1696_vm8 = vweird.f32 %v1658_v55  ;;  %2022 = vmatpush.msrb.mxu3 %v1993_v39 }
 0xb27   :  { %v1679_v38 = vsel %vm1678_vm13, %v4902_v37, %v1675_v50  ;;  %v1682_v57 = vmul.f32 %v4904_v54, %v1681_v15 }
 0xb28   :  { %v1711_v58 = vmul.f32 %v1679_v38, %v5855_v62  ;;  %2023 = vmatpush.msrb.mxu3 %v1992_v13  ;;  %v1989_v38 = vld [vmem:[%s7039_s17 + $0x18] sm:$0xff] }
 0xb29   :  { %v1683_v40 = vmul.f32 0.5, %v1682_v57  ;;  %v1649_v59 = vpop.xlane.xlu1 %1648 }
 0xb2a   :  { %v1654_v41 = vmul.f32 %v1649_v59, %v5846_v48  ;;  %v1719_v60 = vmul.f32 %v5896_v31, %v1711_v58  ;;  %2024 = vmatpush.msrb.mxu3 %v1991_v52  ;;  %v1988_v58 = vld [vmem:[%s7039_s17 + $0x10] sm:$0xff] }
 0xb2b   :  { %v1684_v46 = vsub.f32 1.5, %v1683_v40 }
 0xb2c   :  { %v4906_v61 = vpop.eup %4905  ;;  %v1659_v63 = vadd.f32 1e-05, %v1654_v41  ;;  %v5915_v51 = vadd.f32 %v5901_v49, %v1719_v60  ;;  %2025 = vmatpush.msrb.mxu3 %v1990_v32 }
 0xb2d   :  { %v1685_v0 = vmul.f32 %v4904_v54, %v1684_v46  ;;  %v1691_v1 = vmul.f32 %v4906_v61, %v1658_v55  ;;  %vm1697_vm7 = vweird.f32 %v4906_v61 }
 0xb2e   :  { %4907 = vrsqrt.f32 %v1659_v63  ;;  %4516 = vmatmul.msk.f32.gmra.mxu2 %vm158_vm1, %v5915_v51  ;;  %vm1698_vm9 = vmor %vm1696_vm8, %vm1697_vm7  ;;  %vm1706_vm11 = vweird.f32 %v1659_v63  ;;  %2026 = vmatpush.msrb.mxu3 %v1989_v38 }
 0xb2f   :  { %v1689_v62 = vsel %vm1688_vm0, %v4904_v54, %v1685_v0  ;;  %v1692_v2 = vmul.f32 %v4906_v61, %v1691_v1 }
 0xb30   :  { %v1712_v3 = vmul.f32 %v1689_v62, %v5861_v56  ;;  %2027 = vmatpush.msrb.mxu3 %v1988_v58 }
 0xb31   :  { %v1693_v4 = vmul.f32 0.5, %v1692_v2 }
 0xb32   :  { %v1720_v5 = vmul.f32 %v5896_v31, %v1712_v3  ;;  %v1986_v3 = vld [vmem:[%s7039_s17] sm:$0xff] }
 0xb33   :  { %v1694_v7 = vsub.f32 1.5, %v1693_v4 }
 0xb34   :  { %v4908_v8 = vpop.eup %4907  ;;  %v5922_v9 = vadd.f32 %v5901_v49, %v1720_v5 }
 0xb35   :  { %v1695_v10 = vmul.f32 %v4906_v61, %v1694_v7  ;;  %v1701_v17 = vmul.f32 %v4908_v8, %v1659_v63  ;;  %vm1707_vm10 = vweird.f32 %v4908_v8 }
 0xb36   :  { %4517 = vmatmul.msk.f32.gmra.mxu2 %vm158_vm1, %v5922_v9  ;;  %vm1708_vm12 = vmor %vm1706_vm11, %vm1707_vm10 }
 0xb37   :  { %v1699_v19 = vsel %vm1698_vm9, %v4906_v61, %v1695_v10  ;;  %v1702_v20 = vmul.f32 %v4908_v8, %v1701_v17  ;;  %v1987_v61 = vld [vmem:[%s7039_s17 + $0x8] sm:$0xff] }
 0xb38   :  { %v1713_v56 = vmul.f32 %v1699_v19, %v5867_v6  ;;  %2028 = vmatpush.msrb.mxu3 %v1987_v61 }
 0xb39   :  { %v1703_v22 = vmul.f32 0.5, %v1702_v20 }
 0xb3a   :  { %v1721_v23 = vmul.f32 %v5896_v31, %v1713_v56  ;;  %2029 = vmatpush.msrb.mxu3 %v1986_v3 }
 0xb3b   :  { %v1704_v24 = vsub.f32 1.5, %v1703_v22 }
 0xb3c   :  { %v5929_v27 = vadd.f32 %v5901_v49, %v1721_v23 }
 0xb3d   :  { %v1705_v28 = vmul.f32 %v4908_v8, %v1704_v24 }
 0xb3e   :  { %4518 = vmatmul.msk.f32.gmra.mxu2 %vm158_vm1, %v5929_v27 }
 0xb3f   :  { %v1709_v29 = vsel %vm1708_vm12, %v4908_v8, %v1705_v28 }
 0xb40   :  { %v1714_v11 = vmul.f32 %v1709_v29, %v5873_v16 }
 0xb42   :  { %v1722_v18 = vmul.f32 %v5896_v31, %v1714_v11 }
 0xb44   :  { %v5936_v6 = vadd.f32 %v5901_v49, %v1722_v18 }
 0xb46   :  { %4519 = vmatmul.msk.f32.gmra.mxu2 %vm158_vm1, %v5936_v6 }
 0xba9   :  { %v1771_v30 = vpop.f32.mrf.mxu2 }
 0xbaa   :  { %v5946_v34 = vadd.f32 %v5943_v43, %v1771_v30 }
 0xbac   :  { %v5949_v36 = vmul.f32 0.70710677, %v5946_v34 }
 0xbae   :  { %v1796_v16 = vand.u32 2147483647, %v5949_v36 }
 0xbb0   :  { %v1801_v12 = vmul.f32 0.3275911, %v1796_v16  ;;  %v1931_v1 = vsub.f32 0.0, %v1796_v16 }
 0xbb1   :  { %v1774_v25 = vpop.f32.mrf.mxu2 }
 0xbb2   :  { %v1806_v21 = vadd.f32 1.0, %v1801_v12  ;;  %v5953_v44 = vadd.f32 %v5943_v43, %v1774_v25  ;;  %v1936_v10 = vmul.f32 %v1931_v1, %v1796_v16 }
 0xbb4   :  { %4909 = vrcp.f32 %v1806_v21  ;;  %v5956_v37 = vmul.f32 0.70710677, %v5953_v44  ;;  %v1822_v54 = vand.u32 2147483648, %v1806_v21  ;;  %v1820_v15 = vand.u32 2147483647, %v1806_v21 }
 0xbb5   :  { %vm1816_vm14 = vweird.f32 %v1806_v21  ;;  %v1941_v30 = vmul.f32 1.442695, %v1936_v10 }
 0xbb6   :  { %v5962_v42 = vand.u32 2147483647, %v5956_v37  ;;  %v1823_v41 = vor.u32 1.1754944e-38, %v1822_v54  ;;  %vm1821_vm0 = vcmp.eq.f32.partialorder %v1820_v15, 8.507059e+37 }
 0xbb8   :  { %v1802_v31 = vmul.f32 0.3275911, %v5962_v42 }
 0xbb9   :  { %v1777_v26 = vpop.f32.mrf.mxu2 }
 0xbba   :  { %v4910_v45 = vpop.eup %4909  ;;  %v5969_v49 = vadd.f32 %v5943_v43, %v1777_v26  ;;  %v1807_v14 = vadd.f32 1.0, %v1802_v31 }
 0xbbb   :  { %v1812_v53 = vmul.f32 %v4910_v45, %v1806_v21  ;;  %vm1817_vm13 = vweird.f32 %v4910_v45  ;;  %v1932_v21 = vsub.f32 0.0, %v5962_v42 }
 0xbbc   :  { %v5975_v35 = vmul.f32 0.70710677, %v5969_v49  ;;  %4911 = vrcp.f32 %v1807_v14  ;;  %vm1818_vm15 = vmor %vm1816_vm14, %vm1817_vm13  ;;  %v1837_v17 = vand.u32 2147483648, %v1807_v14  ;;  %v1835_v20 = vand.u32 2147483647, %v1807_v14 }
 0xbbd   :  { %v1813_v47 = vsub.f32 1.0, %v1812_v53  ;;  %vm1831_vm8 = vweird.f32 %v1807_v14  ;;  %v1937_v54 = vmul.f32 %v1932_v21, %v5962_v42 }
 0xbbe   :  { %v5981_v55 = vand.u32 2147483647, %v5975_v35  ;;  %v1838_v16 = vor.u32 1.1754944e-38, %v1837_v17  ;;  %vm1836_vm10 = vcmp.eq.f32.partialorder %v1835_v20, 8.507059e+37 }
 0xbbf   :  { %v1814_v50 = vmul.f32 %v4910_v45, %v1813_v47 }
 0xbc0   :  { %v1803_v57 = vmul.f32 0.3275911, %v5981_v55 }
 0xbc1   :  { %v1815_v40 = vadd.f32 %v4910_v45, %v1814_v50  ;;  %v1780_v59 = vpop.f32.mrf.mxu2 }
 0xbc2   :  { %v5990_v60 = vadd.f32 1.0, %v1803_v57  ;;  %v5993_v46 = vadd.f32 %v5943_v43, %v1780_v59  ;;  %v4912_v63 = vpop.eup %4911 }
 0xbc3   :  { %v1819_v0 = vsel %vm1818_vm15, %v4910_v45, %v1815_v40  ;;  %v1827_v2 = vmul.f32 %v4912_v63, %v1807_v14  ;;  %vm1832_vm7 = vweird.f32 %v4912_v63  ;;  %v1933_v40 = vsub.f32 0.0, %v5981_v55 }
 0xbc4   :  { %v5998_v62 = vsel %vm1821_vm0, %v1823_v41, %v1819_v0  ;;  %4913 = vrcp.f32 %v5990_v60  ;;  %v6006_v7 = vmul.f32 0.70710677, %v5993_v46  ;;  %vm1833_vm9 = vmor %vm1831_vm8, %vm1832_vm7  ;;  %v1852_v52 = vand.u32 2147483648, %v5990_v60 }
 0xbc5   :  { %v1886_v4 = vmul.f32 1.0614054, %v5998_v62  ;;  %v1828_v5 = vsub.f32 1.0, %v1827_v2  ;;  %v1850_v32 = vand.u32 2147483647, %v5990_v60  ;;  %vm1846_vm12 = vweird.f32 %v5990_v60 }
 0xbc6   :  { %v6009_v56 = vand.u32 2147483647, %v6006_v7  ;;  %v1853_v58 = vor.u32 1.1754944e-38, %v1852_v52  ;;  %v1943_v0 = vmul.f32 1.442695, %v1937_v54  ;;  %v1938_v10 = vmul.f32 %v1933_v40, %v5981_v55 }
 0xbc7   :  { %v1891_v8 = vadd.f32 -1.4531521, %v1886_v4  ;;  %v1829_v19 = vmul.f32 %v4912_v63, %v1828_v5  ;;  %vm1851_vm14 = vcmp.eq.f32.partialorder %v1850_v32, 8.507059e+37  ;;  %vm1961_vm0 = vcmp.ge.f32.partialorder %v5949_v36, 0.0 }
 0xbc8   :  { %v1804_v29 = vmul.f32 0.3275911, %v6009_v56  ;;  %v1934_v54 = vsub.f32 0.0, %v6009_v56 }
 0xbc9   :  { %v1896_v22 = vmul.f32 %v1891_v8, %v5998_v62  ;;  %v1783_v23 = vpop.f32.mrf.mxu2  ;;  %v1830_v28 = vadd.f32 %v4912_v63, %v1829_v19 }
 0xbca   :  { %v4914_v24 = vpop.eup %4913  ;;  %v6014_v11 = vadd.f32 %v5943_v43, %v1783_v23  ;;  %v1809_v39 = vadd.f32 1.0, %v1804_v29 }
 0xbcb   :  { %v1901_v18 = vadd.f32 1.4214138, %v1896_v22  ;;  %v1842_v12 = vmul.f32 %v4914_v24, %v5990_v60  ;;  %v1834_v25 = vsel %vm1833_vm9, %v4912_v63, %v1830_v28  ;;  %vm1847_vm11 = vweird.f32 %v4914_v24 }
 0xbcc   :  { %v6019_v31 = vsel %vm1836_vm10, %v1838_v16, %v1834_v25  ;;  %v6022_v45 = vmul.f32 0.70710677, %v6014_v11  ;;  %4915 = vrcp.f32 %v1809_v39  ;;  %vm1848_vm13 = vmor %vm1846_vm12, %vm1847_vm11  ;;  %v1865_v23 = vand.u32 2147483647, %v1809_v39 }
 0xbcd   :  { %v1906_v13 = vmul.f32 %v1901_v18, %v5998_v62  ;;  %v1843_v26 = vsub.f32 1.0, %v1842_v12  ;;  %v1887_v43 = vmul.f32 1.0614054, %v6019_v31  ;;  %4917 = vpow2.f32 %v1941_v30 }
 0xbce   :  { %v6029_v50 = vand.u32 2147483647, %v6022_v45  ;;  %v1786_v18 = vmul.f32 0.5, %v5946_v34  ;;  %v1945_v30 = vmul.f32 1.442695, %v1938_v10  ;;  %vm1861_vm7 = vweird.f32 %v1809_v39 }
 0xbcf   :  { %v1911_v53 = vadd.f32 -0.28449672, %v1906_v13  ;;  %v1844_v14 = vmul.f32 %v4914_v24, %v1843_v26  ;;  %v1892_v47 = vadd.f32 -1.4531521, %v1887_v43  ;;  %vm1866_vm9 = vcmp.eq.f32.partialorder %v1865_v23, 8.507059e+37 }
 0xbd0   :  { %v1805_v59 = vmul.f32 0.3275911, %v6029_v50  ;;  %vm1998_vm10 = vcmask 523264  }
 0xbd1   :  { %v1916_v15 = vmul.f32 %v1911_v53, %v5998_v62  ;;  %v1845_v38 = vadd.f32 %v4914_v24, %v1844_v14  ;;  %v1897_v57 = vmul.f32 %v1892_v47, %v6019_v31 }
 0xbd2   :  { %v4916_v42 = vpop.eup %4915  ;;  %v6038_v2 = vadd.f32 1.0, %v1805_v59 }
 0xbd3   :  { %v1921_v41 = vadd.f32 0.2548296, %v1916_v15  ;;  %v1849_v61 = vsel %vm1848_vm13, %v4914_v24, %v1845_v38  ;;  %v1902_v63 = vadd.f32 1.4214138, %v1897_v57  ;;  %v1857_v4 = vmul.f32 %v4916_v42, %v1809_v39  ;;  %v4918_v5 = vpop.eup %4917 }
 0xbd4   :  { %v6036_v1 = vsel %vm1851_vm14, %v1853_v58, %v1849_v61  ;;  %4919 = vrcp.f32 %v6038_v2  ;;  %v1867_v24 = vand.u32 2147483648, %v1809_v39  ;;  %vm1862_vm15 = vweird.f32 %v4916_v42 }
 0xbd5   :  { %v1926_v60 = vmul.f32 %v1921_v41, %v5998_v62  ;;  %v1888_v3 = vmul.f32 1.0614054, %v6036_v1  ;;  %v1907_v8 = vmul.f32 %v1902_v63, %v6019_v31  ;;  %v1858_v20 = vsub.f32 1.0, %v1857_v4  ;;  %vm1863_vm8 = vmor %vm1861_vm7, %vm1862_vm15 }
 0xbd6   :  { %4921 = vpow2.f32 %v1943_v0  ;;  %v1868_v26 = vor.u32 1.1754944e-38, %v1867_v24  ;;  %v1880_v40 = vand.u32 2147483647, %v6038_v2  ;;  %v1882_v59 = vand.u32 2147483648, %v6038_v2 }
 0xbd7   :  { %v1951_v17 = vmul.f32 %v4918_v5, %v1926_v60  ;;  %v1893_v19 = vadd.f32 -1.4531521, %v1888_v3  ;;  %v1912_v22 = vadd.f32 -0.28449672, %v1907_v8  ;;  %v1859_v29 = vmul.f32 %v4916_v42, %v1858_v20 }
 0xbd8   :  { %4923 = vpow2.f32 %v1945_v30  ;;  %vm1876_vm12 = vweird.f32 %v6038_v2  ;;  %v1787_v4 = vmul.f32 0.5, %v5953_v44  ;;  %vm1962_vm13 = vcmp.ge.f32.partialorder %v5956_v37, 0.0 }
 0xbd9   :  { %v1956_v28 = vsub.f32 1.0, %v1951_v17  ;;  %v1898_v62 = vmul.f32 %v1893_v19, %v6036_v1  ;;  %v1917_v55 = vmul.f32 %v1912_v22, %v6019_v31  ;;  %v1860_v25 = vadd.f32 %v4916_v42, %v1859_v29 }
 0xbda   :  { %v4920_v21 = vpop.eup %4919  ;;  %v1883_v8 = vor.u32 1.1754944e-38, %v1882_v59  ;;  %vm1881_vm15 = vcmp.eq.f32.partialorder %v1880_v40, 8.507059e+37  ;;  %v1935_v24 = vsub.f32 0.0, %v6029_v50  ;;  %vm1964_vm7 = vcmp.ge.f32.partialorder %v6006_v7, 0.0 }
 0xbdb   :  { %v1966_v16 = vsub.f32 0.0, %v1956_v28  ;;  %v1903_v12 = vadd.f32 1.4214138, %v1898_v62  ;;  %v1922_v13 = vadd.f32 0.2548296, %v1917_v55  ;;  %v1864_v53 = vsel %vm1863_vm8, %v4916_v42, %v1860_v25 }
 0xbdc   :  { %v1872_v34 = vmul.f32 %v4920_v21, %v6038_v2  ;;  %v4922_v36 = vpop.eup %4921  ;;  %v1869_v47 = vsel %vm1866_vm9, %v1868_v26, %v1864_v53  ;;  %vm1877_vm11 = vweird.f32 %v4920_v21  ;;  %v1940_v30 = vmul.f32 %v1935_v24, %v6029_v50 }
 0xbdd   :  { %v1971_v43 = vsel %vm1961_vm0, %v1956_v28, %v1966_v16  ;;  %v1908_v52 = vmul.f32 %v1903_v12, %v6036_v1  ;;  %v1927_v32 = vmul.f32 %v1922_v13, %v6019_v31  ;;  %v1889_v15 = vmul.f32 1.0614054, %v1869_v47  ;;  %vm1878_vm14 = vmor %vm1876_vm12, %vm1877_vm11 }
 0xbde   :  { %v1976_v14 = vadd.f32 1.0, %v1971_v43  ;;  %v1873_v38 = vsub.f32 1.0, %v1872_v34  ;;  %v1939_v31 = vmul.f32 %v1934_v54, %v6009_v56  ;;  %v4924_v10 = vpop.eup %4923  ;;  %vm1963_vm0 = vcmp.ge.f32.partialorder %v5975_v35, 0.0 }
 0xbdf   :  { %v1913_v39 = vadd.f32 -0.28449672, %v1908_v52  ;;  %v1952_v58 = vmul.f32 %v4922_v36, %v1927_v32  ;;  %v1894_v61 = vadd.f32 -1.4531521, %v1889_v15  ;;  %v1788_v26 = vmul.f32 0.5, %v5969_v49 }
 0xbe0   :  { %v1981_v57 = vmul.f32 %v1976_v14, %v1786_v18  ;;  %v1874_v42 = vmul.f32 %v4920_v21, %v1873_v38  ;;  %v1947_v22 = vmul.f32 1.442695, %v1939_v31  ;;  %v1949_v52 = vmul.f32 1.442695, %v1940_v30 }
 0xbe1   :  { %v1918_v41 = vmul.f32 %v1913_v39, %v6036_v1  ;;  %v1957_v63 = vsub.f32 1.0, %v1952_v58  ;;  %v1899_v60 = vmul.f32 %v1894_v61, %v1869_v47  ;;  %v1789_v58 = vmul.f32 0.5, %v5993_v46  ;;  %v4792_v46 = vld [vmem:[%s7040_s18] ss:$0 sm:$0xff] }
 0xbe2   :  { %4520 = vmatmul.msk.f32.vlgmr.msrb.gmra.mxu3 %vm1998_vm10, %v1981_v57  ;;  %v1875_v3 = vadd.f32 %v4920_v21, %v1874_v42  ;;  %4925 = vpow2.f32 %v1947_v22  ;;  %vm1965_vm8 = vcmp.ge.f32.partialorder %v6022_v45, 0.0 }
 0xbe3   :  { %v1923_v0 = vadd.f32 0.2548296, %v1918_v41  ;;  %v1967_v5 = vsub.f32 0.0, %v1957_v63  ;;  %v1904_v19 = vadd.f32 1.4214138, %v1899_v60  ;;  %4927 = vpow2.f32 %v1949_v52 }
 0xbe4   :  { %v1879_v20 = vsel %vm1878_vm14, %v4920_v21, %v1875_v3 }
 0xbe5   :  { %v1928_v17 = vmul.f32 %v1923_v0, %v6036_v1  ;;  %v1972_v56 = vsel %vm1962_vm13, %v1957_v63, %v1967_v5  ;;  %v1884_v23 = vsel %vm1881_vm15, %v1883_v8, %v1879_v20  ;;  %v1909_v62 = vmul.f32 %v1904_v19, %v1869_v47 }
 0xbe6   :  { %v1977_v28 = vadd.f32 1.0, %v1972_v56  ;;  %v1890_v44 = vmul.f32 1.0614054, %v1884_v23  ;;  %v1790_v63 = vmul.f32 0.5, %v6014_v11 }
 0xbe7   :  { %v1953_v2 = vmul.f32 %v4924_v10, %v1928_v17  ;;  %v1914_v18 = vadd.f32 -0.28449672, %v1909_v62 }
 0xbe8   :  { %v1982_v29 = vmul.f32 %v1977_v28, %v1787_v4  ;;  %v1895_v55 = vadd.f32 -1.4531521, %v1890_v44  ;;  %v4926_v36 = vpop.eup %4925 }
 0xbe9   :  { %v1958_v37 = vsub.f32 1.0, %v1953_v2  ;;  %v1919_v16 = vmul.f32 %v1914_v18, %v1869_v47  ;;  %v4928_v49 = vpop.eup %4927 }
 0xbea   :  { %v1900_v12 = vmul.f32 %v1895_v55, %v1884_v23  ;;  %4521 = vmatmul.msk.f32.gmra.mxu3 %vm1998_vm10, %v1982_v29 }
 0xbeb   :  { %v1968_v1 = vsub.f32 0.0, %v1958_v37  ;;  %v1924_v21 = vadd.f32 0.2548296, %v1919_v16 }
 0xbec   :  { %v1905_v13 = vadd.f32 1.4214138, %v1900_v12 }
 0xbed   :  { %v1973_v25 = vsel %vm1963_vm0, %v1958_v37, %v1968_v1  ;;  %v1929_v53 = vmul.f32 %v1924_v21, %v1869_v47 }
 0xbee   :  { %v1978_v43 = vadd.f32 1.0, %v1973_v25  ;;  %v1910_v34 = vmul.f32 %v1905_v13, %v1884_v23 }
 0xbef   :  { %v1954_v32 = vmul.f32 %v4926_v36, %v1929_v53 }
 0xbf0   :  { %v1983_v14 = vmul.f32 %v1978_v43, %v1788_v26  ;;  %v1915_v50 = vadd.f32 -0.28449672, %v1910_v34 }
 0xbf1   :  { %v1959_v54 = vsub.f32 1.0, %v1954_v32 }
 0xbf2   :  { %v1920_v39 = vmul.f32 %v1915_v50, %v1884_v23  ;;  %4522 = vmatmul.msk.f32.gmra.mxu3 %vm1998_vm10, %v1983_v14 }
 0xbf3   :  { %v1969_v15 = vsub.f32 0.0, %v1959_v54 }
 0xbf4   :  { %v1925_v35 = vadd.f32 0.2548296, %v1920_v39  ;;  %v4528_v39 = vld [vmem:[%s7070_s7 + $0x98] sm:$0xff] }
 0xbf5   :  { %v1974_v38 = vsel %vm1964_vm7, %v1959_v54, %v1969_v15  ;;  %v4538_v54 = vld [vmem:[%s7071_s1 + $0x98] sm:$0xff]  ;;  %2216 = vmatpush.msrb.mxu0 %v4528_v39 }
 0xbf6   :  { %v1930_v57 = vmul.f32 %v1925_v35, %v1884_v23  ;;  %v1979_v47 = vadd.f32 1.0, %v1974_v38  ;;  %v4548_v15 = vld [vmem:[%s7073_s29 + $0x98] sm:$0xff]  ;;  %2258 = vmatpush.msrb.mxu1 %v4538_v54  ;;  %v4527_v35 = vld [vmem:[%s7070_s7 + $0x90] sm:$0xff] }
 0xbf7   :  { %2300 = vmatpush.msra.mxu2 %v4548_v15  ;;  %v4537_v38 = vld [vmem:[%s7071_s1 + $0x90] sm:$0xff]  ;;  %2217 = vmatpush.msrb.mxu0 %v4527_v35  ;;  %v4582_v35 = vld [vmem:[%s7071_s1 + $0xa0] sm:$0xff] }
 0xbf8   :  { %v1955_v40 = vmul.f32 %v4928_v49, %v1930_v57  ;;  %v1984_v59 = vmul.f32 %v1979_v47, %v1789_v58  ;;  %v4547_v57 = vld [vmem:[%s7073_s29 + $0x90] sm:$0xff]  ;;  %2259 = vmatpush.msrb.mxu1 %v4537_v38  ;;  %v4526_v49 = vld [vmem:[%s7070_s7 + $0x88] sm:$0xff] }
 0xbf9   :  { %2301 = vmatpush.msra.mxu2 %v4547_v57  ;;  %v4536_v58 = vld [vmem:[%s7071_s1 + $0x88] sm:$0xff]  ;;  %2218 = vmatpush.msrb.mxu0 %v4526_v49 }
 0xbfa   :  { %v1960_v41 = vsub.f32 1.0, %v1955_v40  ;;  %4523 = vmatmul.msk.f32.gmra.mxu3 %vm1998_vm10, %v1984_v59  ;;  %v4546_v47 = vld [vmem:[%s7073_s29 + $0x88] sm:$0xff]  ;;  %2260 = vmatpush.msrb.mxu1 %v4536_v58  ;;  %v4525_v40 = vld [vmem:[%s7070_s7 + $0x80] sm:$0xff] }
 0xbfb   :  { %2302 = vmatpush.msra.mxu2 %v4546_v47  ;;  %v4535_v59 = vld [vmem:[%s7071_s1 + $0x80] sm:$0xff]  ;;  %2219 = vmatpush.msrb.mxu0 %v4525_v40 }
 0xbfc   :  { %v1970_v61 = vsub.f32 0.0, %v1960_v41  ;;  %2261 = vmatpush.msrb.mxu1 %v4535_v59 }
 0xbfe   :  { %v1975_v42 = vsel %vm1965_vm8, %v1960_v41, %v1970_v61  ;;  %v4545_v41 = vld [vmem:[%s7073_s29 + $0x80] sm:$0xff] }
 0xbff   :  { %v1980_v31 = vadd.f32 1.0, %v1975_v42  ;;  %2303 = vmatpush.msra.mxu2 %v4545_v41 }
 0xc01   :  { %v1985_v0 = vmul.f32 %v1980_v31, %v1790_v63 }
 0xc03   :  { %4524 = vmatmul.msk.f32.gmra.mxu3 %vm1998_vm10, %v1985_v0 }
 0xc65   :  { %v2031_v7 = vpop.f32.mrf.mxu3 }
 0xc66   :  { %v2032_v60 = vadd.f32 %v4792_v46, %v2031_v7 }
 0xc68   :  { %v2046_v3 = vadd.f32 %v2032_v60, %v5907_v33 }
 0xc6a   :  { %v2053_v4 = vsel %vm158_vm1, %v2046_v3, 0.0 }
 0xc6b   :  { %2054 = vadd.xlane.f32.xlu2 %v2053_v4 }
 0xc6d   :  { %v2034_v5 = vpop.f32.mrf.mxu3 }
 0xc6e   :  { %v2035_v45 = vadd.f32 %v4792_v46, %v2034_v5 }
 0xc70   :  { %v2047_v8 = vadd.f32 %v2035_v45, %v5915_v51 }
 0xc72   :  { %v2056_v11 = vsel %vm158_vm1, %v2047_v8, 0.0 }
 0xc73   :  { %2057 = vadd.xlane.f32.xlu0 %v2056_v11 }
 0xc75   :  { %v2037_v10 = vpop.f32.mrf.mxu3 }
 0xc76   :  { %v2038_v17 = vadd.f32 %v4792_v46, %v2037_v10 }
 0xc78   :  { %v2048_v19 = vadd.f32 %v2038_v17, %v5922_v9 }
 0xc7a   :  { %v2059_v20 = vsel %vm158_vm1, %v2048_v19, 0.0 }
 0xc7b   :  { %2060 = vadd.xlane.f32.xlu1 %v2059_v20 }
 0xc7d   :  { %v2040_v56 = vpop.f32.mrf.mxu3 }
 0xc7e   :  { %v2041_v22 = vadd.f32 %v4792_v46, %v2040_v56 }
 0xc80   :  { %v2049_v33 = vadd.f32 %v2041_v22, %v5929_v27  ;;  %v6164_v22 = vld [vmem:[%s7042_s20] ss:$0 sm:$0xff] }
 0xc82   :  { %v2062_v23 = vsel %vm158_vm1, %v2049_v33, 0.0 }
 0xc83   :  { %2063 = vadd.xlane.f32.xlu2 %v2062_v23 }
 0xc86   :  { %v2043_v24 = vpop.f32.mrf.mxu3 }
 0xc87   :  { %v2044_v28 = vadd.f32 %v4792_v46, %v2043_v24 }
 0xc89   :  { %v2050_v51 = vadd.f32 %v2044_v28, %v5936_v6 }
 0xc8b   :  { %v2065_v2 = vsel %vm1609_vm6, %v2050_v51, 0.0 }
 0xc8c   :  { %2066 = vadd.xlane.f32.xlu0 %v2065_v2 }
 0xcde   :  { %v2055_v62 = vpop.xlane.xlu2 %2054 }
 0xcdf   :  { %v2068_v9 = vmul.f32 %v2055_v62, %v5846_v48 }
 0xce1   :  { %v6088_v44 = vsub.f32 %v2046_v3, %v2068_v9 }
 0xce3   :  { %v2078_v29 = vmul.f32 %v6088_v44, %v6088_v44 }
 0xce5   :  { %v2083_v27 = vsel %vm158_vm1, %v2078_v29, 0.0 }
 0xce6   :  { %2084 = vadd.xlane.f32.xlu1 %v2083_v27  ;;  %v2058_v37 = vpop.xlane.xlu0 %2057 }
 0xce7   :  { %v2069_v18 = vmul.f32 %v2058_v37, %v5846_v48 }
 0xce9   :  { %v6094_v55 = vsub.f32 %v2047_v8, %v2069_v18 }
 0xceb   :  { %v2079_v6 = vmul.f32 %v6094_v55, %v6094_v55 }
 0xced   :  { %v2086_v30 = vsel %vm158_vm1, %v2079_v6, 0.0 }
 0xcee   :  { %2087 = vadd.xlane.f32.xlu2 %v2086_v30  ;;  %v2061_v1 = vpop.xlane.xlu1 %2060 }
 0xcef   :  { %v2070_v16 = vmul.f32 %v2061_v1, %v5846_v48  ;;  %v4575_v1 = vld [vmem:[%s7070_s7 + $0xb8] sm:$0xff] }
 0xcf0   :  { %2521 = vmatpush.msra.mxu1 %v4575_v1  ;;  %v4795_v1 = vld [vmem:[%s7075_s8 + $0x4] ss:$0 sm:$0xff] }
 0xcf1   :  { %v6100_v12 = vsub.f32 %v2048_v19, %v2070_v16  ;;  %v6159_v19 = vld [vmem:[%s7041_s19] ss:$0 sm:$0xff]  ;;  %v4585_v16 = vld [vmem:[%s7071_s1 + $0xb8] sm:$0xff] }
 0xcf2   :  { %2563 = vmatpush.msrb.mxu2 %v4585_v16 }
 0xcf3   :  { %v2080_v25 = vmul.f32 %v6100_v12, %v6100_v12 }
 0xcf5   :  { %v2089_v21 = vsel %vm158_vm1, %v2080_v25, 0.0  ;;  %v4574_v25 = vld [vmem:[%s7070_s7 + $0xb0] sm:$0xff] }
 0xcf6   :  { %2090 = vadd.xlane.f32.xlu0 %v2089_v21  ;;  %v2064_v13 = vpop.xlane.xlu2 %2063  ;;  %2522 = vmatpush.msra.mxu1 %v4574_v25 }
 0xcf7   :  { %v2071_v26 = vmul.f32 %v2064_v13, %v5846_v48  ;;  %v4584_v13 = vld [vmem:[%s7071_s1 + $0xb0] sm:$0xff] }
 0xcf8   :  { %2564 = vmatpush.msrb.mxu2 %v4584_v13 }
 0xcf9   :  { %v6106_v43 = vsub.f32 %v2049_v33, %v2071_v26 }
 0xcfb   :  { %v2081_v52 = vmul.f32 %v6106_v43, %v6106_v43 }
 0xcfd   :  { %v2092_v53 = vsel %vm158_vm1, %v2081_v52, 0.0  ;;  %v4573_v52 = vld [vmem:[%s7070_s7 + $0xa8] sm:$0xff] }
 0xcfe   :  { %2093 = vadd.xlane.f32.xlu1 %v2092_v53  ;;  %v4583_v53 = vld [vmem:[%s7071_s1 + $0xa8] sm:$0xff]  ;;  %2523 = vmatpush.msra.mxu1 %v4573_v52 }
 0xcff   :  { %v2067_v34 = vpop.xlane.xlu0 %2066  ;;  %2565 = vmatpush.msrb.mxu2 %v4583_v53  ;;  %v4593_v53 = vld [vmem:[%s7073_s29 + $0xa8] sm:$0xff] }
 0xd00   :  { %v2072_v36 = vmul.f32 %v2067_v34, %v5846_v48 }
 0xd01   :  { %2566 = vmatpush.msrb.mxu2 %v4582_v35 }
 0xd02   :  { %v6112_v14 = vsub.f32 %v2050_v51, %v2072_v36 }
 0xd04   :  { %v2082_v32 = vmul.f32 %v6112_v14, %v6112_v14 }
 0xd06   :  { %v2095_v50 = vsel %vm1609_vm6, %v2082_v32, 0.0 }
 0xd07   :  { %2096 = vadd.xlane.f32.xlu2 %v2095_v50  ;;  %v4572_v50 = vld [vmem:[%s7070_s7 + $0xa0] sm:$0xff] }
 0xd08   :  { %2524 = vmatpush.msra.mxu1 %v4572_v50 }
 0xd59   :  { %v2085_v61 = vpop.xlane.xlu1 %2084 }
 0xd5a   :  { %v2098_v42 = vmul.f32 %v2085_v61, %v5846_v48 }
 0xd5c   :  { %v2103_v63 = vadd.f32 1e-05, %v2098_v42 }
 0xd5e   :  { %4929 = vrsqrt.f32 %v2103_v63  ;;  %vm2114_vm11 = vweird.f32 %v2103_v63 }
 0xd61   :  { %v2088_v31 = vpop.xlane.xlu2 %2087 }
 0xd62   :  { %v2099_v0 = vmul.f32 %v2088_v31, %v5846_v48 }
 0xd64   :  { %v4930_v46 = vpop.eup %4929  ;;  %v2104_v60 = vadd.f32 1e-05, %v2099_v0 }
 0xd65   :  { %v2109_v7 = vmul.f32 %v4930_v46, %v2103_v63  ;;  %vm2115_vm9 = vweird.f32 %v4930_v46 }
 0xd66   :  { %4931 = vrsqrt.f32 %v2104_v60  ;;  %vm2116_vm12 = vmor %vm2114_vm11, %vm2115_vm9  ;;  %vm2124_vm14 = vweird.f32 %v2104_v60 }
 0xd67   :  { %v2110_v3 = vmul.f32 %v4930_v46, %v2109_v7 }
 0xd69   :  { %v2111_v4 = vmul.f32 0.5, %v2110_v3  ;;  %v2091_v5 = vpop.xlane.xlu0 %2090 }
 0xd6a   :  { %v2100_v8 = vmul.f32 %v2091_v5, %v5846_v48 }
 0xd6b   :  { %v2112_v45 = vsub.f32 1.5, %v2111_v4 }
 0xd6c   :  { %v4932_v11 = vpop.eup %4931  ;;  %v2105_v17 = vadd.f32 1e-05, %v2100_v8 }
 0xd6d   :  { %v2113_v10 = vmul.f32 %v4930_v46, %v2112_v45  ;;  %v2119_v20 = vmul.f32 %v4932_v11, %v2104_v60  ;;  %vm2125_vm13 = vweird.f32 %v4932_v11 }
 0xd6e   :  { %4933 = vrsqrt.f32 %v2105_v17  ;;  %vm2126_vm15 = vmor %vm2124_vm14, %vm2125_vm13  ;;  %vm2134_vm7 = vweird.f32 %v2105_v17 }
 0xd6f   :  { %v2117_v56 = vsel %vm2116_vm12, %v4930_v46, %v2113_v10  ;;  %v2120_v23 = vmul.f32 %v4932_v11, %v2119_v20 }
 0xd70   :  { %v2158_v33 = vmul.f32 %v2117_v56, %v6088_v44 }
 0xd71   :  { %v2121_v28 = vmul.f32 0.5, %v2120_v23  ;;  %v2094_v51 = vpop.xlane.xlu1 %2093 }
 0xd72   :  { %v2166_v24 = vmul.f32 %v6159_v19, %v2158_v33  ;;  %v2101_v9 = vmul.f32 %v2094_v51, %v5846_v48  ;;  %v4797_v51 = vld [vmem:[%s7032_s10 + $0x4] ss:$0 sm:$0xff] }
 0xd73   :  { %v2122_v62 = vsub.f32 1.5, %v2121_v28 }
 0xd74   :  { %v6169_v2 = vadd.f32 %v6164_v22, %v2166_v24  ;;  %v4934_v29 = vpop.eup %4933  ;;  %v2106_v18 = vadd.f32 1e-05, %v2101_v9 }
 0xd75   :  { %v2123_v27 = vmul.f32 %v4932_v11, %v2122_v62  ;;  %v2129_v37 = vmul.f32 %v4934_v29, %v2105_v17  ;;  %vm2135_vm0 = vweird.f32 %v4934_v29 }
 0xd76   :  { %4530 = vmatmul.msk.f32.vlgmr.msrb.gmra.mxu0 %vm158_vm1, %v6169_v2  ;;  %4540 = vmatmul.msk.f32.vlgmr.msrb.gmra.mxu1 %vm158_vm1, %v6169_v2  ;;  %4935 = vrsqrt.f32 %v2106_v18  ;;  %vm2136_vm8 = vmor %vm2134_vm7, %vm2135_vm0  ;;  %vm2144_vm11 = vweird.f32 %v2106_v18 }
 0xd77   :  { %4550 = vmatmul.msk.f32.vlgmr.msra.gmra.mxu2 %vm158_vm1, %v6169_v2  ;;  %v2127_v44 = vsel %vm2126_vm15, %v4932_v11, %v2123_v27  ;;  %v2130_v6 = vmul.f32 %v4934_v29, %v2129_v37 }
 0xd78   :  { %v2159_v30 = vmul.f32 %v2127_v44, %v6094_v55 }
 0xd79   :  { %v2131_v21 = vmul.f32 0.5, %v2130_v6 }
 0xd7a   :  { %v2167_v55 = vmul.f32 %v6159_v19, %v2159_v30  ;;  %v2097_v26 = vpop.xlane.xlu2 %2096 }
 0xd7b   :  { %v2132_v34 = vsub.f32 1.5, %v2131_v21  ;;  %v2102_v36 = vmul.f32 %v2097_v26, %v5846_v48  ;;  %v4594_v26 = vld [vmem:[%s7073_s29 + $0xb0] sm:$0xff] }
 0xd7c   :  { %v6200_v32 = vadd.f32 %v6164_v22, %v2167_v55  ;;  %v4936_v54 = vpop.eup %4935  ;;  %v4595_v55 = vld [vmem:[%s7073_s29 + $0xb8] sm:$0xff] }
 0xd7d   :  { %v2133_v39 = vmul.f32 %v4934_v29, %v2132_v34  ;;  %v2107_v15 = vadd.f32 1e-05, %v2102_v36  ;;  %v2139_v38 = vmul.f32 %v4936_v54, %v2106_v18  ;;  %vm2145_vm9 = vweird.f32 %v4936_v54  ;;  %v4592_v34 = vld [vmem:[%s7073_s29 + $0xa0] sm:$0xff] }
 0xd7e   :  { %4531 = vmatmul.msk.f32.gmra.mxu0 %vm158_vm1, %v6200_v32  ;;  %4541 = vmatmul.msk.f32.gmra.mxu1 %vm158_vm1, %v6200_v32  ;;  %vm2146_vm12 = vmor %vm2144_vm11, %vm2145_vm9 }
 0xd7f   :  { %v2137_v57 = vsel %vm2136_vm8, %v4934_v29, %v2133_v39  ;;  %4937 = vrsqrt.f32 %v2107_v15  ;;  %4551 = vmatmul.msk.f32.gmra.mxu2 %vm158_vm1, %v6200_v32  ;;  %v2140_v58 = vmul.f32 %v4936_v54, %v2139_v38  ;;  %vm2154_vm14 = vweird.f32 %v2107_v15 }
 0xd80   :  { %v2160_v49 = vmul.f32 %v2137_v57, %v6100_v12  ;;  %v4799_v57 = vld [vmem:[%s7074_s30 + $0x5] ss:$0 sm:$0xff] }
 0xd81   :  { %v2141_v40 = vmul.f32 0.5, %v2140_v58 }
 0xd82   :  { %v2168_v47 = vmul.f32 %v6159_v19, %v2160_v49 }
 0xd83   :  { %v2142_v41 = vsub.f32 1.5, %v2141_v40 }
 0xd84   :  { %v6217_v59 = vadd.f32 %v6164_v22, %v2168_v47 }
 0xd85   :  { %v4938_v61 = vpop.eup %4937  ;;  %v2143_v42 = vmul.f32 %v4936_v54, %v2142_v41 }
 0xd86   :  { %v2149_v63 = vmul.f32 %v4938_v61, %v2107_v15  ;;  %4532 = vmatmul.msk.f32.gmra.mxu0 %vm158_vm1, %v6217_v59  ;;  %4542 = vmatmul.msk.f32.gmra.mxu1 %vm158_vm1, %v6217_v59  ;;  %vm2155_vm13 = vweird.f32 %v4938_v61 }
 0xd87   :  { %4552 = vmatmul.msk.f32.gmra.mxu2 %vm158_vm1, %v6217_v59  ;;  %v2147_v12 = vsel %vm2146_vm12, %v4936_v54, %v2143_v42  ;;  %vm2156_vm15 = vmor %vm2154_vm14, %vm2155_vm13 }
 0xd88   :  { %v2150_v31 = vmul.f32 %v4938_v61, %v2149_v63  ;;  %v2161_v0 = vmul.f32 %v2147_v12, %v6106_v43 }
 0xd8a   :  { %v2151_v46 = vmul.f32 0.5, %v2150_v31  ;;  %v2169_v7 = vmul.f32 %v6159_v19, %v2161_v0  ;;  %v6320_v0 = vld [vmem:[%s7076_s28] sm:$0xff] }
 0xd8c   :  { %v2152_v60 = vsub.f32 1.5, %v2151_v46  ;;  %v6228_v3 = vadd.f32 %v6164_v22, %v2169_v7 }
 0xd8e   :  { %v2153_v4 = vmul.f32 %v4938_v61, %v2152_v60  ;;  %4533 = vmatmul.msk.f32.gmra.mxu0 %vm158_vm1, %v6228_v3  ;;  %4543 = vmatmul.msk.f32.gmra.mxu1 %vm158_vm1, %v6228_v3 }
 0xd8f   :  { %4553 = vmatmul.msk.f32.gmra.mxu2 %vm158_vm1, %v6228_v3 }
 0xd90   :  { %v2157_v5 = vsel %vm2156_vm15, %v4938_v61, %v2153_v4 }
 0xd91   :  { %v2162_v43 = vmul.f32 %v2157_v5, %v6112_v14  ;;  %v6327_v5 = vld [vmem:[%s7076_s28 + $0x8] sm:$0xff] }
 0xd93   :  { %v2170_v45 = vmul.f32 %v6159_v19, %v2162_v43 }
 0xd95   :  { %v6239_v8 = vadd.f32 %v6164_v22, %v2170_v45  ;;  %v4796_v22 = vld [vmem:[%s7074_s30 + $0x4] ss:$0 sm:$0xff] }
 0xd97   :  { %4534 = vmatmul.msk.f32.gmra.mxu0 %vm158_vm1, %v6239_v8  ;;  %4544 = vmatmul.msk.f32.gmra.mxu1 %vm158_vm1, %v6239_v8 }
 0xd98   :  { %4554 = vmatmul.msk.f32.gmra.mxu2 %vm158_vm1, %v6239_v8 }
 0xd9f   :  { %4577 = vmatmul.msk.f32.vlgmr.msra.gmra.mxu1 %vm158_vm1, %v6169_v2 }
 0xda0   :  { %4587 = vmatmul.msk.f32.vlgmr.msrb.gmra.mxu2 %vm158_vm1, %v6169_v2 }
 0xda7   :  { %4578 = vmatmul.msk.f32.gmra.mxu1 %vm158_vm1, %v6200_v32 }
 0xda8   :  { %4588 = vmatmul.msk.f32.gmra.mxu2 %vm158_vm1, %v6200_v32 }
 0xdaf   :  { %4579 = vmatmul.msk.f32.gmra.mxu1 %vm158_vm1, %v6217_v59 }
 0xdb0   :  { %4589 = vmatmul.msk.f32.gmra.mxu2 %vm158_vm1, %v6217_v59 }
 0xdb7   :  { %4580 = vmatmul.msk.f32.gmra.mxu1 %vm158_vm1, %v6228_v3 }
 0xdb8   :  { %4590 = vmatmul.msk.f32.gmra.mxu2 %vm158_vm1, %v6228_v3 }
 0xdbf   :  { %4581 = vmatmul.msk.f32.gmra.mxu1 %vm158_vm1, %v6239_v8 }
 0xdc0   :  { %4591 = vmatmul.msk.f32.gmra.mxu2 %vm158_vm1, %v6239_v8 }
 0xdf3   :  { %v2263_v14 = vpop.f32.mrf.mxu1  ;;  %v2221_v29 = vpop.f32.mrf.mxu0 }
 0xdf4   :  { %v2264_v25 = vadd.f32 %v4796_v22, %v2263_v14  ;;  %v2222_v13 = vadd.f32 %v4795_v1, %v2221_v29 }
 0xdfa   :  { %v2305_v11 = vpop.f32.mrf.mxu2 }
 0xdfb   :  { %v2266_v10 = vpop.f32.mrf.mxu1  ;;  %v2306_v16 = vadd.f32 %v4797_v51, %v2305_v11  ;;  %v2224_v21 = vpop.f32.mrf.mxu0 }
 0xdfc   :  { %v2267_v44 = vadd.f32 %v4796_v22, %v2266_v10  ;;  %v2225_v36 = vadd.f32 %v4795_v1, %v2224_v21  ;;  %v6334_v10 = vld [vmem:[%s7076_s28 + $0x10] sm:$0xff] }
 0xe02   :  { %v2308_v17 = vpop.f32.mrf.mxu2 }
 0xe03   :  { %v2269_v19 = vpop.f32.mrf.mxu1  ;;  %v2309_v6 = vadd.f32 %v4797_v51, %v2308_v17  ;;  %v2227_v50 = vpop.f32.mrf.mxu0 }
 0xe04   :  { %v2270_v27 = vadd.f32 %v4796_v22, %v2269_v19  ;;  %v2228_v39 = vadd.f32 %v4795_v1, %v2227_v50 }
 0xe0a   :  { %v2311_v20 = vpop.f32.mrf.mxu2 }
 0xe0b   :  { %v2272_v56 = vpop.f32.mrf.mxu1  ;;  %v2312_v18 = vadd.f32 %v4797_v51, %v2311_v20  ;;  %v2230_v15 = vpop.f32.mrf.mxu0 }
 0xe0c   :  { %v2273_v28 = vadd.f32 %v4796_v22, %v2272_v56  ;;  %v2231_v38 = vadd.f32 %v4795_v1, %v2230_v15 }
 0xe12   :  { %v2314_v33 = vpop.f32.mrf.mxu2 }
 0xe13   :  { %v2315_v37 = vadd.f32 %v4797_v51, %v2314_v33 }
 0xe14   :  { %v2275_v23 = vpop.f32.mrf.mxu1  ;;  %v2233_v47 = vpop.f32.mrf.mxu0 }
 0xe15   :  { %v2276_v24 = vadd.f32 %v4796_v22, %v2275_v23  ;;  %v2234_v40 = vadd.f32 %v4795_v1, %v2233_v47  ;;  %v6341_v22 = vld [vmem:[%s7076_s28 + $0x18] sm:$0xff] }
 0xe17   :  { %4555 = vmatpush.xpose.msk.msra.mxu3 %vm286_vm2, %v2276_v24 }
 0xe1b   :  { %v2317_v62 = vpop.f32.mrf.mxu2  ;;  %4556 = vmatpush.xpose.msk.msra.mxu3 %vm286_vm2, %v2273_v28 }
 0xe1c   :  { %v2318_v9 = vadd.f32 %v4797_v51, %v2317_v62  ;;  %v6348_v51 = vld [vmem:[%s7076_s28 + $0x20] sm:$0x3] }
 0xe1e   :  { %4565 = vmatpush.msk.msra.mxu0 %vm431_vm3, %v2318_v9 }
 0xe1f   :  { %4557 = vmatpush.xpose.msk.msra.mxu3 %vm286_vm2, %v2270_v27 }
 0xe20   :  { %2477 = vmatpush.msra.mxu0 %v2315_v37 }
 0xe22   :  { %2478 = vmatpush.msra.mxu0 %v2312_v18 }
 0xe23   :  { %v2568_v30 = vpop.f32.mrf.mxu2  ;;  %4558 = vmatpush.xpose.msk.msra.mxu3 %vm286_vm2, %v2267_v44  ;;  %v4800_v44 = vld [vmem:[%s7032_s10 + $0x5] ss:$0 sm:$0xff] }
 0xe24   :  { %2479 = vmatpush.msra.mxu0 %v2309_v6  ;;  %v2569_v63 = vadd.f32 %v4799_v57, %v2568_v30 }
 0xe26   :  { %2480 = vmatpush.msra.mxu0 %v2306_v16 }
 0xe27   :  { %4559 = vmatpush.xpose.msk.msra.mxu3 %vm286_vm2, %v2264_v25 }
 0xe2a   :  { %4560 = vmatmul.msk.f32.vlgmr.msra.gmra.mxu3 %vm286_vm2, %v2222_v13 }
 0xe2b   :  { %v2571_v52 = vpop.f32.mrf.mxu2  ;;  %2605 = vmatpush.msrb.mxu3 %v4595_v55 }
 0xe2c   :  { %v2572_v42 = vadd.f32 %v4799_v57, %v2571_v52 }
 0xe2d   :  { %2606 = vmatpush.msrb.mxu3 %v4594_v26 }
 0xe2f   :  { %2607 = vmatpush.msrb.mxu3 %v4593_v53 }
 0xe31   :  { %2608 = vmatpush.msrb.mxu3 %v4592_v34 }
 0xe32   :  { %4561 = vmatmul.msk.f32.gmra.mxu3 %vm286_vm2, %v2225_v36 }
 0xe33   :  { %v2574_v54 = vpop.f32.mrf.mxu2 }
 0xe34   :  { %v2575_v61 = vadd.f32 %v4799_v57, %v2574_v54 }
 0xe3a   :  { %4562 = vmatmul.msk.f32.gmra.mxu3 %vm286_vm2, %v2228_v39 }
 0xe3b   :  { %v2577_v35 = vpop.f32.mrf.mxu2 }
 0xe3c   :  { %v2578_v41 = vadd.f32 %v4799_v57, %v2577_v35 }
 0xe42   :  { %4563 = vmatmul.msk.f32.gmra.mxu3 %vm286_vm2, %v2231_v38 }
 0xe43   :  { %v2580_v49 = vpop.f32.mrf.mxu2 }
 0xe44   :  { %v2581_v58 = vadd.f32 %v4799_v57, %v2580_v49 }
 0xe46   :  { %4602 = vmatpush.xpose.msk.msrb.mxu0 %vm286_vm2, %v2581_v58 }
 0xe4a   :  { %4603 = vmatpush.xpose.msk.msrb.mxu0 %vm286_vm2, %v2578_v41  ;;  %4564 = vmatmul.msk.f32.gmra.mxu3 %vm286_vm2, %v2234_v40 }
 0xe4e   :  { %4604 = vmatpush.xpose.msk.msrb.mxu0 %vm286_vm2, %v2575_v61 }
 0xe52   :  { %4605 = vmatpush.xpose.msk.msrb.mxu0 %vm286_vm2, %v2572_v42  ;;  %4597 = vmatmul.msk.f32.vlgmr.msrb.gmra.mxu3 %vm158_vm1, %v6169_v2 }
 0xe56   :  { %4606 = vmatpush.xpose.msk.msrb.mxu0 %vm286_vm2, %v2569_v63 }
 0xe5a   :  { %4598 = vmatmul.msk.f32.gmra.mxu3 %vm158_vm1, %v6200_v32 }
 0xe62   :  { %4599 = vmatmul.msk.f32.gmra.mxu3 %vm158_vm1, %v6217_v59 }
 0xe6a   :  { %4600 = vmatmul.msk.f32.gmra.mxu3 %vm158_vm1, %v6228_v3 }
 0xe72   :  { %4601 = vmatmul.msk.f32.gmra.mxu3 %vm158_vm1, %v6239_v8 }
 0xead   :  { %v2367_v12 = vpop.f32.mrf.mxu3 }
 0xeae   :  { %v2382_v31 = vmul.f32 0.35355338, %v2367_v12 }
 0xeb0   :  { %v2387_v46 = vadd.f32 %v6320_v0, %v2382_v31 }
 0xeb2   :  { %v2392_v7 = vsel %vm359_vm4, %v2387_v46, -inf }
 0xeb3   :  { %2393 = vmax.xlane.f32.xlu0 %v2392_v7 }
 0xeb5   :  { %v2370_v60 = vpop.f32.mrf.mxu3 }
 0xeb6   :  { %v2383_v4 = vmul.f32 0.35355338, %v2370_v60 }
 0xeb8   :  { %v2388_v43 = vadd.f32 %v6327_v5, %v2383_v4 }
 0xeba   :  { %v2395_v45 = vsel %vm359_vm4, %v2388_v43, -inf }
 0xebb   :  { %2396 = vmax.xlane.f32.xlu1 %v2395_v45 }
 0xebd   :  { %v2373_v14 = vpop.f32.mrf.mxu3 }
 0xebe   :  { %v2384_v11 = vmul.f32 0.35355338, %v2373_v14 }
 0xec0   :  { %v2389_v17 = vadd.f32 %v6334_v10, %v2384_v11 }
 0xec2   :  { %v2398_v19 = vsel %vm359_vm4, %v2389_v17, -inf }
 0xec3   :  { %2399 = vmax.xlane.f32.xlu2 %v2398_v19 }
 0xec5   :  { %v2376_v20 = vpop.f32.mrf.mxu3 }
 0xec6   :  { %v2385_v56 = vmul.f32 0.35355338, %v2376_v20 }
 0xec8   :  { %v2390_v33 = vadd.f32 %v6341_v22, %v2385_v56 }
 0xeca   :  { %v2401_v23 = vsel %vm359_vm4, %v2390_v33, -inf }
 0xecb   :  { %2402 = vmax.xlane.f32.xlu0 %v2401_v23 }
 0xecd   :  { %v2379_v24 = vpop.f32.mrf.mxu3 }
 0xece   :  { %v2386_v28 = vmul.f32 0.35355338, %v2379_v24  ;;  %v2526_v24 = vpop.f32.mrf.mxu1 }
 0xed0   :  { %v2391_v62 = vadd.f32 %v6348_v51, %v2386_v28 }
 0xed2   :  { %v2404_v9 = vsel %vm372_vm5, %v2391_v62, -inf }
 0xed3   :  { %2405 = vmax.xlane.f32.xlu1 %v2404_v9  ;;  %v4798_v9 = vld [vmem:[%s7075_s8 + $0x5] ss:$0 sm:$0xff] }
 0xed5   :  { %v2610_v29 = vpop.f32.mrf.mxu3 }
 0xed6   :  { %v2611_v21 = vadd.f32 %v4800_v44, %v2610_v29  ;;  %v2529_v29 = vpop.f32.mrf.mxu1 }
 0xedd   :  { %v2613_v27 = vpop.f32.mrf.mxu3 }
 0xede   :  { %v2614_v25 = vadd.f32 %v4800_v44, %v2613_v27  ;;  %v2527_v27 = vadd.f32 %v4798_v9, %v2526_v24 }
 0xee5   :  { %v2616_v37 = vpop.f32.mrf.mxu3 }
 0xee6   :  { %v2617_v16 = vadd.f32 %v4800_v44, %v2616_v37  ;;  %v4632_v37 = vld [vmem:[%s7070_s7 + $0xd8] sm:$0xff] }
 0xeed   :  { %v2619_v18 = vpop.f32.mrf.mxu3 }
 0xeee   :  { %v2620_v1 = vadd.f32 %v4800_v44, %v2619_v18  ;;  %v4631_v18 = vld [vmem:[%s7070_s7 + $0xd0] sm:$0xff] }
 0xef5   :  { %v2622_v6 = vpop.f32.mrf.mxu3 }
 0xef6   :  { %v2623_v30 = vadd.f32 %v4800_v44, %v2622_v6  ;;  %v4630_v44 = vld [vmem:[%s7070_s7 + $0xc8] sm:$0xff]  ;;  %v4629_v6 = vld [vmem:[%s7070_s7 + $0xc0] sm:$0xff] }
 0xef8   :  { %4612 = vmatpush.msk.msrb.mxu1 %vm431_vm3, %v2623_v30  ;;  %v2530_v30 = vadd.f32 %v4798_v9, %v2529_v29 }
 0xefa   :  { %2782 = vmatpush.msrb.mxu1 %v2620_v1  ;;  %v2532_v1 = vpop.f32.mrf.mxu1 }
 0xefc   :  { %2783 = vmatpush.msrb.mxu1 %v2617_v16  ;;  %v2533_v16 = vadd.f32 %v4798_v9, %v2532_v1 }
 0xefe   :  { %2784 = vmatpush.msrb.mxu1 %v2614_v25 }
 0xf00   :  { %2785 = vmatpush.msrb.mxu1 %v2611_v21 }
 0xf02   :  { %v2535_v25 = vpop.f32.mrf.mxu1 }
 0xf03   :  { %v2536_v21 = vadd.f32 %v4798_v9, %v2535_v25 }
 0xf26   :  { %v2394_v13 = vpop.xlane.xlu0 %2393 }
 0xf27   :  { %v2407_v55 = vsub.f32 %v2387_v46, %v2394_v13  ;;  %v2538_v13 = vpop.f32.mrf.mxu1 }
 0xf29   :  { %v2412_v26 = vmul.f32 1.442695, %v2407_v55  ;;  %v2539_v55 = vadd.f32 %v4798_v9, %v2538_v13 }
 0xf2b   :  { %4939 = vpow2.f32 %v2412_v26  ;;  %v4571_v26 = vld [vmem:[%s7033_s11 + $0x20] sm:$0xff] }
 0xf2c   :  { %2881 = vmatpush.msra.mxu3 %v4571_v26 }
 0xf2e   :  { %v2397_v52 = vpop.xlane.xlu1 %2396 }
 0xf2f   :  { %v2408_v53 = vsub.f32 %v2388_v43, %v2397_v52 }
 0xf31   :  { %v4940_v34 = vpop.eup %4939  ;;  %v2414_v36 = vmul.f32 1.442695, %v2408_v53 }
 0xf32   :  { %v2422_v50 = vsel %vm359_vm4, %v4940_v34, 0.0 }
 0xf33   :  { %4941 = vpow2.f32 %v2414_v36  ;;  %2423 = vadd.xlane.f32.xlu2 %v2422_v50 }
 0xf36   :  { %v2400_v54 = vpop.xlane.xlu2 %2399 }
 0xf37   :  { %v2409_v39 = vsub.f32 %v2389_v17, %v2400_v54 }
 0xf39   :  { %v4942_v15 = vpop.eup %4941  ;;  %v2416_v35 = vmul.f32 1.442695, %v2409_v39 }
 0xf3a   :  { %v2425_v38 = vsel %vm359_vm4, %v4942_v15, 0.0 }
 0xf3b   :  { %4943 = vpow2.f32 %v2416_v35  ;;  %2426 = vadd.xlane.f32.xlu0 %v2425_v38 }
 0xf3e   :  { %v2403_v57 = vpop.xlane.xlu0 %2402 }
 0xf3f   :  { %v2410_v49 = vsub.f32 %v2390_v33, %v2403_v57 }
 0xf41   :  { %v4944_v58 = vpop.eup %4943  ;;  %v2418_v47 = vmul.f32 1.442695, %v2410_v49 }
 0xf42   :  { %v2428_v40 = vsel %vm359_vm4, %v4944_v58, 0.0 }
 0xf43   :  { %4945 = vpow2.f32 %v2418_v47  ;;  %2429 = vadd.xlane.f32.xlu1 %v2428_v40 }
 0xf46   :  { %v2406_v41 = vpop.xlane.xlu1 %2405 }
 0xf47   :  { %v2411_v61 = vsub.f32 %v2391_v62, %v2406_v41 }
 0xf49   :  { %v4946_v42 = vpop.eup %4945  ;;  %v2420_v63 = vmul.f32 1.442695, %v2411_v61 }
 0xf4a   :  { %v2431_v12 = vsel %vm359_vm4, %v4946_v42, 0.0 }
 0xf4b   :  { %4947 = vpow2.f32 %v2420_v63  ;;  %2432 = vadd.xlane.f32.xlu2 %v2431_v12 }
 0xf51   :  { %v4948_v31 = vpop.eup %4947 }
 0xf52   :  { %v2434_v46 = vsel %vm372_vm5, %v4948_v31, 0.0 }
 0xf53   :  { %2435 = vadd.xlane.f32.xlu0 %v2434_v46 }
 0xfa6   :  { %v2424_v7 = vpop.xlane.xlu2 %2423 }
 0xfa7   :  { %4949 = vrcp.f32 %v2424_v7 }
 0xfad   :  { %v4950_v60 = vpop.eup %4949 }
 0xfae   :  { %v2442_v4 = vmul.f32 %v4950_v60, %v4940_v34  ;;  %v2427_v43 = vpop.xlane.xlu0 %2426 }
 0xfaf   :  { %4951 = vrcp.f32 %v2427_v43 }
 0xfb0   :  { %4566 = vmatmul.msk.f32.vlgmr.msra.gmra.mxu0 %vm359_vm4, %v2442_v4 }
 0xfb1   :  { %2920 = vmatpush.msra.mxu0 %v4632_v37 }
 0xfb3   :  { %2921 = vmatpush.msra.mxu0 %v4631_v18 }
 0xfb5   :  { %v4952_v45 = vpop.eup %4951  ;;  %2922 = vmatpush.msra.mxu0 %v4630_v44 }
 0xfb6   :  { %v2430_v14 = vpop.xlane.xlu1 %2429  ;;  %v2443_v11 = vmul.f32 %v4952_v45, %v4942_v15 }
 0xfb7   :  { %4953 = vrcp.f32 %v2430_v14  ;;  %2923 = vmatpush.msra.mxu0 %v4629_v6 }
 0xfb8   :  { %4567 = vmatmul.msk.f32.gmra.mxu0 %vm359_vm4, %v2443_v11 }
 0xfbd   :  { %v4954_v17 = vpop.eup %4953 }
 0xfbe   :  { %v2433_v19 = vpop.xlane.xlu2 %2432  ;;  %v2444_v20 = vmul.f32 %v4954_v17, %v4944_v58 }
 0xfbf   :  { %4955 = vrcp.f32 %v2433_v19 }
 0xfc0   :  { %4568 = vmatmul.msk.f32.gmra.mxu0 %vm359_vm4, %v2444_v20 }
 0xfc5   :  { %v4956_v56 = vpop.eup %4955 }
 0xfc6   :  { %v2436_v33 = vpop.xlane.xlu0 %2435  ;;  %v2445_v23 = vmul.f32 %v4956_v56, %v4946_v42 }
 0xfc7   :  { %4957 = vrcp.f32 %v2436_v33 }
 0xfc8   :  { %4569 = vmatmul.msk.f32.gmra.mxu0 %vm359_vm4, %v2445_v23 }
 0xfcd   :  { %v4958_v28 = vpop.eup %4957 }
 0xfce   :  { %v2446_v62 = vmul.f32 %v4958_v28, %v4948_v31 }
 0xfd0   :  { %4570 = vmatmul.msk.f32.gmra.mxu0 %vm359_vm4, %v2446_v62 }
 0xfd8   :  { %4607 = vmatmul.msk.f32.vlgmr.msrb.gmra.mxu0 %vm286_vm2, %v2527_v27 }
 0xfe0   :  { %4608 = vmatmul.msk.f32.gmra.mxu0 %vm286_vm2, %v2530_v30 }
 0xfe8   :  { %4609 = vmatmul.msk.f32.gmra.mxu0 %vm286_vm2, %v2533_v16 }
 0xff0   :  { %4610 = vmatmul.msk.f32.gmra.mxu0 %vm286_vm2, %v2536_v21 }
 0xff8   :  { %4611 = vmatmul.msk.f32.gmra.mxu0 %vm286_vm2, %v2539_v55  ;;  %v4642_v55 = vld [vmem:[%s7071_s1 + $0xd8] sm:$0xff] }
 0xff9   :  { %2962 = vmatpush.msra.mxu1 %v4642_v55 }
0x1000   :  { %4634 = vmatmul.msk.f32.vlgmr.msra.gmra.mxu0 %vm158_vm1, %v6169_v2 }
0x1008   :  { %4635 = vmatmul.msk.f32.gmra.mxu0 %vm158_vm1, %v6200_v32 }
0x1010   :  { %4636 = vmatmul.msk.f32.gmra.mxu0 %vm158_vm1, %v6217_v59 }
0x1018   :  { %4637 = vmatmul.msk.f32.gmra.mxu0 %vm158_vm1, %v6228_v3 }
0x1020   :  { %4638 = vmatmul.msk.f32.gmra.mxu0 %vm158_vm1, %v6239_v8 }
0x102d   :  { %v2482_v52 = vpop.f32.mrf.mxu0 }
0x102e   :  { %4624 = vmatmul.msk.f32.vlgmr.msra.gmra.mxu3 %vm286_vm2, %v2482_v52 }
0x1035   :  { %v2485_v53 = vpop.f32.mrf.mxu0 }
0x1036   :  { %4625 = vmatmul.msk.f32.gmra.mxu3 %vm286_vm2, %v2485_v53 }
0x103d   :  { %v2488_v34 = vpop.f32.mrf.mxu0 }
0x103e   :  { %4626 = vmatmul.msk.f32.gmra.mxu3 %vm286_vm2, %v2488_v34  ;;  %v4641_v34 = vld [vmem:[%s7071_s1 + $0xd0] sm:$0xff] }
0x103f   :  { %2963 = vmatpush.msra.mxu1 %v4641_v34 }
0x1045   :  { %v2491_v36 = vpop.f32.mrf.mxu0 }
0x1046   :  { %4627 = vmatmul.msk.f32.gmra.mxu3 %vm286_vm2, %v2491_v36  ;;  %v4640_v36 = vld [vmem:[%s7071_s1 + $0xc8] sm:$0xff] }
0x1047   :  { %2964 = vmatpush.msra.mxu1 %v4640_v36 }
0x104d   :  { %v2494_v50 = vpop.f32.mrf.mxu0 }
0x104e   :  { %4628 = vmatmul.msk.f32.gmra.mxu3 %vm286_vm2, %v2494_v50  ;;  %v4639_v50 = vld [vmem:[%s7071_s1 + $0xc0] sm:$0xff] }
0x104f   :  { %2965 = vmatpush.msra.mxu1 %v4639_v50 }
0x1055   :  { %v2672_v54 = vpop.f32.mrf.mxu0 }
0x1056   :  { %v2687_v39 = vmul.f32 0.35355338, %v2672_v54 }
0x1058   :  { %v2692_v15 = vadd.f32 %v6320_v0, %v2687_v39 }
0x105a   :  { %v2697_v35 = vsel %vm359_vm4, %v2692_v15, -inf }
0x105b   :  { %2698 = vmax.xlane.f32.xlu1 %v2697_v35 }
0x105d   :  { %v2675_v38 = vpop.f32.mrf.mxu0 }
0x105e   :  { %v2688_v57 = vmul.f32 0.35355338, %v2675_v38 }
0x1060   :  { %v2693_v49 = vadd.f32 %v6327_v5, %v2688_v57 }
0x1062   :  { %v2700_v58 = vsel %vm359_vm4, %v2693_v49, -inf }
0x1063   :  { %2701 = vmax.xlane.f32.xlu2 %v2700_v58 }
0x1065   :  { %v2678_v47 = vpop.f32.mrf.mxu0 }
0x1066   :  { %v2689_v40 = vmul.f32 0.35355338, %v2678_v47 }
0x1068   :  { %v2694_v41 = vadd.f32 %v6334_v10, %v2689_v40 }
0x106a   :  { %v2703_v61 = vsel %vm359_vm4, %v2694_v41, -inf }
0x106b   :  { %2704 = vmax.xlane.f32.xlu0 %v2703_v61  ;;  %v4618_v61 = vld [vmem:[%s7033_s11 + $0x28] sm:$0xff] }
0x106c   :  { %2834 = vmatpush.msra.mxu2 %v4618_v61 }
0x106d   :  { %v2681_v42 = vpop.f32.mrf.mxu0 }
0x106e   :  { %v2690_v63 = vmul.f32 0.35355338, %v2681_v42 }
0x1070   :  { %v2695_v12 = vadd.f32 %v6341_v22, %v2690_v63  ;;  %v4652_v63 = vld [vmem:[%s7073_s29 + $0xd8] sm:$0xff] }
0x1071   :  { %3004 = vmatpush.msrb.mxu2 %v4652_v63  ;;  %v4803_v63 = vld [vmem:[%s7032_s10 + $0x6] ss:$0 sm:$0xff] }
0x1072   :  { %v2706_v31 = vsel %vm359_vm4, %v2695_v12, -inf }
0x1073   :  { %2707 = vmax.xlane.f32.xlu1 %v2706_v31  ;;  %v4650_v31 = vld [vmem:[%s7073_s29 + $0xc8] sm:$0xff] }
0x1075   :  { %v2684_v46 = vpop.f32.mrf.mxu0 }
0x1076   :  { %v2691_v7 = vmul.f32 0.35355338, %v2684_v46 }
0x1078   :  { %v2696_v60 = vadd.f32 %v6348_v51, %v2691_v7  ;;  %v4649_v7 = vld [vmem:[%s7073_s29 + $0xc0] sm:$0xff] }
0x107a   :  { %v2709_v4 = vsel %vm372_vm5, %v2696_v60, -inf }
0x107b   :  { %2710 = vmax.xlane.f32.xlu2 %v2709_v4 }
0x10b1   :  { %v6525_v36 = vpop.f32.mrf.mxu3 }
0x10ce   :  { %v2699_v43 = vpop.xlane.xlu1 %2698 }
0x10cf   :  { %v2712_v45 = vsub.f32 %v2692_v15, %v2699_v43 }
0x10d1   :  { %v2717_v14 = vmul.f32 1.442695, %v2712_v45 }
0x10d3   :  { %4959 = vpow2.f32 %v2717_v14  ;;  %v4684_v14 = vld [vmem:[%s7070_s7 + $0xf8] sm:$0xff] }
0x10d6   :  { %v2702_v11 = vpop.xlane.xlu2 %2701 }
0x10d7   :  { %v2713_v17 = vsub.f32 %v2693_v49, %v2702_v11  ;;  %v4683_v11 = vld [vmem:[%s7070_s7 + $0xf0] sm:$0xff] }
0x10d9   :  { %v4960_v19 = vpop.eup %4959  ;;  %v2719_v20 = vmul.f32 1.442695, %v2713_v17  ;;  %v4682_v17 = vld [vmem:[%s7070_s7 + $0xe8] sm:$0xff] }
0x10da   :  { %v2727_v56 = vsel %vm359_vm4, %v4960_v19, 0.0 }
0x10db   :  { %4961 = vpow2.f32 %v2719_v20  ;;  %2728 = vadd.xlane.f32.xlu0 %v2727_v56 }
0x10de   :  { %v2705_v33 = vpop.xlane.xlu0 %2704 }
0x10df   :  { %v2714_v23 = vsub.f32 %v2694_v41, %v2705_v33 }
0x10e1   :  { %v4962_v24 = vpop.eup %4961  ;;  %v2721_v28 = vmul.f32 1.442695, %v2714_v23  ;;  %v4802_v23 = vld [vmem:[%s7074_s30 + $0x6] ss:$0 sm:$0xff] }
0x10e2   :  { %v2730_v62 = vsel %vm359_vm4, %v4962_v24, 0.0 }
0x10e3   :  { %4963 = vpow2.f32 %v2721_v28  ;;  %2731 = vadd.xlane.f32.xlu1 %v2730_v62 }
0x10e6   :  { %v2708_v9 = vpop.xlane.xlu1 %2707 }
0x10e7   :  { %v2715_v29 = vsub.f32 %v2695_v12, %v2708_v9  ;;  %v4651_v12 = vld [vmem:[%s7073_s29 + $0xd0] sm:$0xff]  ;;  %v2925_v9 = vpop.f32.mrf.mxu0 }
0x10e8   :  { %3005 = vmatpush.msrb.mxu2 %v4651_v12 }
0x10e9   :  { %v4964_v27 = vpop.eup %4963  ;;  %v2723_v37 = vmul.f32 1.442695, %v2715_v29 }
0x10ea   :  { %v2733_v18 = vsel %vm359_vm4, %v4964_v27, 0.0  ;;  %3006 = vmatpush.msrb.mxu2 %v4650_v31 }
0x10eb   :  { %4965 = vpow2.f32 %v2723_v37  ;;  %2734 = vadd.xlane.f32.xlu2 %v2733_v18  ;;  %v4801_v37 = vld [vmem:[%s7075_s8 + $0x6] ss:$0 sm:$0xff] }
0x10ec   :  { %3007 = vmatpush.msrb.mxu2 %v4649_v7 }
0x10ee   :  { %v2711_v44 = vpop.xlane.xlu2 %2710 }
0x10ef   :  { %v2716_v6 = vsub.f32 %v2696_v60, %v2711_v44  ;;  %v2928_v44 = vpop.f32.mrf.mxu0 }
0x10f1   :  { %v4966_v30 = vpop.eup %4965  ;;  %v2725_v1 = vmul.f32 1.442695, %v2716_v6  ;;  %v2926_v6 = vadd.f32 %v4801_v37, %v2925_v9 }
0x10f2   :  { %v2736_v16 = vsel %vm359_vm4, %v4966_v30, 0.0 }
0x10f3   :  { %4967 = vpow2.f32 %v2725_v1  ;;  %2737 = vadd.xlane.f32.xlu0 %v2736_v16  ;;  %v4693_v1 = vld [vmem:[%s7071_s1 + $0xf0] sm:$0xff]  ;;  %v4692_v16 = vld [vmem:[%s7071_s1 + $0xe8] sm:$0xff] }
0x10f9   :  { %v4968_v25 = vpop.eup %4967 }
0x10fa   :  { %v2739_v21 = vsel %vm372_vm5, %v4968_v25, 0.0 }
0x10fb   :  { %2740 = vadd.xlane.f32.xlu1 %v2739_v21  ;;  %v2931_v21 = vpop.f32.mrf.mxu0 }
0x10fc   :  { %v2932_v55 = vadd.f32 %v4801_v37, %v2931_v21 }
0x114e   :  { %v2729_v13 = vpop.xlane.xlu0 %2728 }
0x114f   :  { %4969 = vrcp.f32 %v2729_v13  ;;  %v4691_v13 = vld [vmem:[%s7071_s1 + $0xe0] sm:$0xff] }
0x1155   :  { %v4970_v26 = vpop.eup %4969 }
0x1156   :  { %v2747_v52 = vmul.f32 %v4970_v26, %v4960_v19  ;;  %v2732_v53 = vpop.xlane.xlu1 %2731  ;;  %v4681_v19 = vld [vmem:[%s7070_s7 + $0xe0] sm:$0xff]  ;;  %v2934_v26 = vpop.f32.mrf.mxu0 }
0x1157   :  { %4971 = vrcp.f32 %v2732_v53 }
0x1158   :  { %4613 = vmatmul.msk.f32.vlgmr.msrb.gmra.mxu1 %vm359_vm4, %v2747_v52  ;;  %v2935_v52 = vadd.f32 %v4801_v37, %v2934_v26 }
0x115d   :  { %v4972_v54 = vpop.eup %4971 }
0x115e   :  { %v2735_v39 = vpop.xlane.xlu2 %2734  ;;  %v2748_v15 = vmul.f32 %v4972_v54, %v4962_v24  ;;  %v2937_v53 = vpop.f32.mrf.mxu0 }
0x115f   :  { %4973 = vrcp.f32 %v2735_v39  ;;  %v2938_v34 = vadd.f32 %v4801_v37, %v2937_v53  ;;  %v6530_v54 = vpop.f32.mrf.mxu3 }
0x1160   :  { %4614 = vmatmul.msk.f32.gmra.mxu1 %vm359_vm4, %v2748_v15 }
0x1165   :  { %v4974_v35 = vpop.eup %4973 }
0x1166   :  { %v2738_v38 = vpop.xlane.xlu0 %2737  ;;  %v2749_v57 = vmul.f32 %v4974_v35, %v4964_v27 }
0x1167   :  { %4975 = vrcp.f32 %v2738_v38  ;;  %v6538_v15 = vpop.f32.mrf.mxu3 }
0x1168   :  { %4615 = vmatmul.msk.f32.gmra.mxu1 %vm359_vm4, %v2749_v57 }
0x116d   :  { %v4976_v49 = vpop.eup %4975 }
0x116e   :  { %v2741_v58 = vpop.xlane.xlu1 %2740  ;;  %v2750_v47 = vmul.f32 %v4976_v49, %v4966_v30  ;;  %v4694_v30 = vld [vmem:[%s7071_s1 + $0xf8] sm:$0xff] }
0x116f   :  { %4977 = vrcp.f32 %v2741_v58  ;;  %v6544_v38 = vpop.f32.mrf.mxu3 }
0x1170   :  { %4616 = vmatmul.msk.f32.gmra.mxu1 %vm359_vm4, %v2750_v47 }
0x1175   :  { %v4978_v40 = vpop.eup %4977 }
0x1176   :  { %v2751_v41 = vmul.f32 %v4978_v40, %v4968_v25  ;;  %v2929_v25 = vadd.f32 %v4801_v37, %v2928_v44 }
0x1177   :  { %v2895_v49 = vpop.f32.mrf.mxu3 }
0x1178   :  { %4617 = vmatmul.msk.f32.gmra.mxu1 %vm359_vm4, %v2751_v41 }
0x1180   :  { %4644 = vmatmul.msk.f32.vlgmr.msra.gmra.mxu1 %vm158_vm1, %v6169_v2 }
0x1188   :  { %4645 = vmatmul.msk.f32.gmra.mxu1 %vm158_vm1, %v6200_v32 }
0x1190   :  { %4646 = vmatmul.msk.f32.gmra.mxu1 %vm158_vm1, %v6217_v59 }
0x1198   :  { %4647 = vmatmul.msk.f32.gmra.mxu1 %vm158_vm1, %v6228_v3 }
0x11a0   :  { %4648 = vmatmul.msk.f32.gmra.mxu1 %vm158_vm1, %v6239_v8 }
0x11d5   :  { %v2787_v42 = vpop.f32.mrf.mxu1 }
0x11d6   :  { %4619 = vmatmul.msk.f32.vlgmr.msra.gmra.mxu2 %vm286_vm2, %v2787_v42 }
0x11d7   :  { %3277 = vmatpush.msra.mxu2 %v4684_v14 }
0x11d9   :  { %3278 = vmatpush.msra.mxu2 %v4683_v11 }
0x11db   :  { %3279 = vmatpush.msra.mxu2 %v4682_v17 }
0x11dd   :  { %v2790_v46 = vpop.f32.mrf.mxu1  ;;  %3280 = vmatpush.msra.mxu2 %v4681_v19 }
0x11de   :  { %4620 = vmatmul.msk.f32.gmra.mxu2 %vm286_vm2, %v2790_v46 }
0x11e5   :  { %v2793_v60 = vpop.f32.mrf.mxu1 }
0x11e6   :  { %4621 = vmatmul.msk.f32.gmra.mxu2 %vm286_vm2, %v2793_v60 }
0x11ed   :  { %v2796_v4 = vpop.f32.mrf.mxu1 }
0x11ee   :  { %4622 = vmatmul.msk.f32.gmra.mxu2 %vm286_vm2, %v2796_v4 }
0x11f5   :  { %v2799_v43 = vpop.f32.mrf.mxu1 }
0x11f6   :  { %4623 = vmatmul.msk.f32.gmra.mxu2 %vm286_vm2, %v2799_v43 }
0x11fd   :  { %v2967_v45 = vpop.f32.mrf.mxu1 }
0x11fe   :  { %4654 = vmatmul.msk.f32.vlgmr.msrb.gmra.mxu2 %vm158_vm1, %v6169_v2  ;;  %v2968_v18 = vadd.f32 %v4802_v23, %v2967_v45 }
0x1205   :  { %v2970_v20 = vpop.f32.mrf.mxu1 }
0x1206   :  { %4655 = vmatmul.msk.f32.gmra.mxu2 %vm158_vm1, %v6200_v32  ;;  %v2971_v27 = vadd.f32 %v4802_v23, %v2970_v20 }
0x120d   :  { %v2973_v56 = vpop.f32.mrf.mxu1 }
0x120e   :  { %4656 = vmatmul.msk.f32.gmra.mxu2 %vm158_vm1, %v6217_v59  ;;  %v2974_v29 = vadd.f32 %v4802_v23, %v2973_v56 }
0x1215   :  { %v2976_v33 = vpop.f32.mrf.mxu1 }
0x1216   :  { %4657 = vmatmul.msk.f32.gmra.mxu2 %vm158_vm1, %v6228_v3  ;;  %v2977_v62 = vadd.f32 %v4802_v23, %v2976_v33 }
0x121d   :  { %v2979_v24 = vpop.f32.mrf.mxu1 }
0x121e   :  { %v2980_v28 = vadd.f32 %v4802_v23, %v2979_v24  ;;  %4658 = vmatmul.msk.f32.gmra.mxu2 %vm158_vm1, %v6239_v8 }
0x1220   :  { %4659 = vmatpush.xpose.msk.msrb.mxu3 %vm286_vm2, %v2980_v28 }
0x1224   :  { %4660 = vmatpush.xpose.msk.msrb.mxu3 %vm286_vm2, %v2977_v62 }
0x1226   :  { %4686 = vmatmul.msk.f32.vlgmr.msra.gmra.mxu2 %vm158_vm1, %v6169_v2 }
0x1228   :  { %4661 = vmatpush.xpose.msk.msrb.mxu3 %vm286_vm2, %v2974_v29 }
0x122c   :  { %4662 = vmatpush.xpose.msk.msrb.mxu3 %vm286_vm2, %v2971_v27 }
0x122e   :  { %4687 = vmatmul.msk.f32.gmra.mxu2 %vm158_vm1, %v6200_v32 }
0x1230   :  { %4663 = vmatpush.xpose.msk.msrb.mxu3 %vm286_vm2, %v2968_v18 }
0x1233   :  { %4664 = vmatmul.msk.f32.vlgmr.msrb.gmra.mxu3 %vm286_vm2, %v2926_v6 }
0x1234   :  { %3319 = vmatpush.msra.mxu3 %v4694_v30 }
0x1236   :  { %4688 = vmatmul.msk.f32.gmra.mxu2 %vm158_vm1, %v6217_v59  ;;  %3320 = vmatpush.msra.mxu3 %v4693_v1 }
0x1238   :  { %3321 = vmatpush.msra.mxu3 %v4692_v16 }
0x123a   :  { %3322 = vmatpush.msra.mxu3 %v4691_v13 }
0x123b   :  { %4665 = vmatmul.msk.f32.gmra.mxu3 %vm286_vm2, %v2929_v25 }
0x123e   :  { %4689 = vmatmul.msk.f32.gmra.mxu2 %vm158_vm1, %v6228_v3 }
0x1243   :  { %4666 = vmatmul.msk.f32.gmra.mxu3 %vm286_vm2, %v2932_v55 }
0x1246   :  { %4690 = vmatmul.msk.f32.gmra.mxu2 %vm158_vm1, %v6239_v8 }
0x124b   :  { %4667 = vmatmul.msk.f32.gmra.mxu3 %vm286_vm2, %v2935_v52 }
0x1253   :  { %4668 = vmatmul.msk.f32.gmra.mxu3 %vm286_vm2, %v2938_v34 }
0x1259   :  { %v6528_v50 = vpop.f32.mrf.mxu2 }
0x125b   :  { %4696 = vmatmul.msk.f32.vlgmr.msra.gmra.mxu3 %vm158_vm1, %v6169_v2 }
0x1261   :  { %v6534_v39 = vpop.f32.mrf.mxu2 }
0x1263   :  { %4697 = vmatmul.msk.f32.gmra.mxu3 %vm158_vm1, %v6200_v32 }
0x1269   :  { %v6540_v35 = vpop.f32.mrf.mxu2 }
0x126b   :  { %4698 = vmatmul.msk.f32.gmra.mxu3 %vm158_vm1, %v6217_v59 }
0x1271   :  { %v6546_v57 = vpop.f32.mrf.mxu2 }
0x1273   :  { %4699 = vmatmul.msk.f32.gmra.mxu3 %vm158_vm1, %v6228_v3 }
0x1279   :  { %v2848_v58 = vpop.f32.mrf.mxu2 }
0x127a   :  { %v6550_v47 = vadd.f32 %v2895_v49, %v2848_v58 }
0x127b   :  { %4700 = vmatmul.msk.f32.gmra.mxu3 %vm158_vm1, %v6239_v8 }
0x1281   :  { %v3009_v40 = vpop.f32.mrf.mxu2 }
0x1282   :  { %v3010_v4 = vadd.f32 %v4803_v63, %v3009_v40 }
0x1289   :  { %v3012_v41 = vpop.f32.mrf.mxu2 }
0x128a   :  { %v3013_v60 = vadd.f32 %v4803_v63, %v3012_v41 }
0x1291   :  { %v3015_v61 = vpop.f32.mrf.mxu2 }
0x1292   :  { %v3016_v7 = vadd.f32 %v4803_v63, %v3015_v61 }
0x1299   :  { %v3018_v42 = vpop.f32.mrf.mxu2 }
0x129a   :  { %v3019_v46 = vadd.f32 %v4803_v63, %v3018_v42 }
0x12a1   :  { %v3021_v12 = vpop.f32.mrf.mxu2 }
0x12a2   :  { %v3022_v31 = vadd.f32 %v4803_v63, %v3021_v12 }
0x12a4   :  { %4669 = vmatpush.msk.msrb.mxu0 %vm431_vm3, %v3022_v31 }
0x12a6   :  { %3181 = vmatpush.msrb.mxu0 %v3019_v46 }
0x12a8   :  { %3182 = vmatpush.msrb.mxu0 %v3016_v7 }
0x12aa   :  { %3183 = vmatpush.msrb.mxu0 %v3013_v60 }
0x12ac   :  { %3184 = vmatpush.msrb.mxu0 %v3010_v4 }
0x12b6   :  { %v3071_v43 = vpop.f32.mrf.mxu3 }
0x12b7   :  { %v3086_v45 = vmul.f32 0.35355338, %v3071_v43 }
0x12b9   :  { %v3091_v14 = vadd.f32 %v6320_v0, %v3086_v45 }
0x12bb   :  { %v3096_v11 = vsel %vm359_vm4, %v3091_v14, -inf }
0x12bc   :  { %3097 = vmax.xlane.f32.xlu2 %v3096_v11 }
0x12be   :  { %v3074_v17 = vpop.f32.mrf.mxu3 }
0x12bf   :  { %v3087_v19 = vmul.f32 0.35355338, %v3074_v17 }
0x12c1   :  { %v3092_v20 = vadd.f32 %v6327_v5, %v3087_v19 }
0x12c3   :  { %v3099_v56 = vsel %vm359_vm4, %v3092_v20, -inf }
0x12c4   :  { %3100 = vmax.xlane.f32.xlu0 %v3099_v56 }
0x12c6   :  { %v3077_v33 = vpop.f32.mrf.mxu3 }
0x12c7   :  { %v3088_v23 = vmul.f32 0.35355338, %v3077_v33 }
0x12c9   :  { %v3093_v24 = vadd.f32 %v6334_v10, %v3088_v23  ;;  %v4675_v10 = vld [vmem:[%s7033_s11 + $0x30] sm:$0xff] }
0x12ca   :  { %3233 = vmatpush.msrb.mxu1 %v4675_v10 }
0x12cb   :  { %v3102_v28 = vsel %vm359_vm4, %v3093_v24, -inf }
0x12cc   :  { %3103 = vmax.xlane.f32.xlu1 %v3102_v28 }
0x12ce   :  { %v3080_v62 = vpop.f32.mrf.mxu3 }
0x12cf   :  { %v3089_v9 = vmul.f32 0.35355338, %v3080_v62  ;;  %v4704_v62 = vld [vmem:[%s7073_s29 + $0xf8] sm:$0xff] }
0x12d0   :  { %3361 = vmatpush.msra.mxu0 %v4704_v62 }
0x12d1   :  { %v3094_v0 = vadd.f32 %v6341_v22, %v3089_v9  ;;  %v4805_v22 = vld [vmem:[%s7074_s30 + $0x7] ss:$0 sm:$0xff]  ;;  %v4703_v9 = vld [vmem:[%s7073_s29 + $0xf0] sm:$0xff] }
0x12d2   :  { %3362 = vmatpush.msra.mxu0 %v4703_v9 }
0x12d3   :  { %v3105_v29 = vsel %vm359_vm4, %v3094_v0, -inf }
0x12d4   :  { %3106 = vmax.xlane.f32.xlu2 %v3105_v29  ;;  %v4701_v29 = vld [vmem:[%s7073_s29 + $0xe0] sm:$0xff] }
0x12d6   :  { %v3083_v27 = vpop.f32.mrf.mxu3 }
0x12d7   :  { %v3090_v37 = vmul.f32 0.35355338, %v3083_v27 }
0x12d9   :  { %v3095_v5 = vadd.f32 %v6348_v51, %v3090_v37 }
0x12db   :  { %v3108_v18 = vsel %vm372_vm5, %v3095_v5, -inf }
0x12dc   :  { %3109 = vmax.xlane.f32.xlu0 %v3108_v18 }
0x12de   :  { %v3324_v44 = vpop.f32.mrf.mxu3 }
0x12df   :  { %v3325_v55 = vadd.f32 %v4805_v22, %v3324_v44 }
0x12e6   :  { %v3327_v6 = vpop.f32.mrf.mxu3 }
0x12e7   :  { %v3328_v13 = vadd.f32 %v4805_v22, %v3327_v6 }
0x12ee   :  { %v3330_v30 = vpop.f32.mrf.mxu3 }
0x12ef   :  { %v3331_v21 = vadd.f32 %v4805_v22, %v3330_v30 }
0x12f6   :  { %v3333_v1 = vpop.f32.mrf.mxu3 }
0x12f7   :  { %v3334_v51 = vadd.f32 %v4805_v22, %v3333_v1 }
0x12fe   :  { %v3336_v16 = vpop.f32.mrf.mxu3 }
0x12ff   :  { %v3337_v25 = vadd.f32 %v4805_v22, %v3336_v16 }
0x1301   :  { %4711 = vmatpush.xpose.msk.msra.mxu1 %vm286_vm2, %v3337_v25 }
0x1305   :  { %4712 = vmatpush.xpose.msk.msra.mxu1 %vm286_vm2, %v3334_v51 }
0x1309   :  { %4713 = vmatpush.xpose.msk.msra.mxu1 %vm286_vm2, %v3331_v21 }
0x130d   :  { %4714 = vmatpush.xpose.msk.msra.mxu1 %vm286_vm2, %v3328_v13 }
0x1311   :  { %4715 = vmatpush.xpose.msk.msra.mxu1 %vm286_vm2, %v3325_v55  ;;  %v3282_v55 = vpop.f32.mrf.mxu2 }
0x132f   :  { %v3098_v26 = vpop.xlane.xlu2 %3097 }
0x1330   :  { %v3111_v52 = vsub.f32 %v3091_v14, %v3098_v26 }
0x1332   :  { %v3116_v53 = vmul.f32 1.442695, %v3111_v52  ;;  %v4804_v52 = vld [vmem:[%s7075_s8 + $0x7] ss:$0 sm:$0xff]  ;;  %s4307_s8 = sshll.u32 %s5103_s4, 4  ;;  %s4308_s8 = int_to_ptr.vmem [resolvable:$true] %s4307_s8 }
0x1334   :  { %4979 = vpow2.f32 %v3116_v53  ;;  %v3285_v53 = vpop.f32.mrf.mxu2 }
0x1337   :  { %v3101_v34 = vpop.xlane.xlu0 %3100 }
0x1338   :  { %v3112_v49 = vsub.f32 %v3092_v20, %v3101_v34  ;;  %v3283_v34 = vadd.f32 %v4804_v52, %v3282_v55 }
0x133a   :  { %v4980_v58 = vpop.eup %4979  ;;  %v3118_v40 = vmul.f32 1.442695, %v3112_v49 }
0x133b   :  { %v3126_v41 = vsel %vm359_vm4, %v4980_v58, 0.0 }
0x133c   :  { %4981 = vpow2.f32 %v3118_v40  ;;  %3127 = vadd.xlane.f32.xlu1 %v3126_v41  ;;  %v3288_v40 = vpop.f32.mrf.mxu2 }
0x133f   :  { %v3104_v61 = vpop.xlane.xlu1 %3103 }
0x1340   :  { %v3113_v42 = vsub.f32 %v3093_v24, %v3104_v61  ;;  %v3289_v61 = vadd.f32 %v4804_v52, %v3288_v40 }
0x1342   :  { %v4982_v63 = vpop.eup %4981  ;;  %v3120_v12 = vmul.f32 1.442695, %v3113_v42 }
0x1343   :  { %v3129_v31 = vsel %vm359_vm4, %v4982_v63, 0.0 }
0x1344   :  { %4983 = vpow2.f32 %v3120_v12  ;;  %3130 = vadd.xlane.f32.xlu2 %v3129_v31 }
0x1347   :  { %v3107_v46 = vpop.xlane.xlu2 %3106 }
0x1348   :  { %v3114_v7 = vsub.f32 %v3094_v0, %v3107_v46  ;;  %v4702_v0 = vld [vmem:[%s7073_s29 + $0xe8] sm:$0xff] }
0x1349   :  { %3363 = vmatpush.msra.mxu0 %v4702_v0  ;;  %v2893_v0 = vadd.f32 %v6544_v38, %v6546_v57  ;;  %v5072_v38 = vld [vmem:[%s7076_s28 + $0x8] sm:$0xff] }
0x134a   :  { %v4984_v60 = vpop.eup %4983  ;;  %v3122_v4 = vmul.f32 1.442695, %v3114_v7 }
0x134b   :  { %v3132_v43 = vsel %vm359_vm4, %v4984_v60, 0.0  ;;  %3364 = vmatpush.msra.mxu0 %v4701_v29 }
0x134c   :  { %4985 = vpow2.f32 %v3122_v4  ;;  %3133 = vadd.xlane.f32.xlu0 %v3132_v43 }
0x134f   :  { %v3110_v45 = vpop.xlane.xlu0 %3109 }
0x1350   :  { %v3115_v14 = vsub.f32 %v3095_v5, %v3110_v45 }
0x1352   :  { %v4986_v11 = vpop.eup %4985  ;;  %v3124_v17 = vmul.f32 1.442695, %v3115_v14 }
0x1353   :  { %v3135_v19 = vsel %vm359_vm4, %v4986_v11, 0.0 }
0x1354   :  { %4987 = vpow2.f32 %v3124_v17  ;;  %3136 = vadd.xlane.f32.xlu1 %v3135_v19  ;;  %v2884_v19 = vadd.f32 %v6525_v36, %v6528_v50 }
0x135a   :  { %v4988_v20 = vpop.eup %4987 }
0x135b   :  { %v3138_v56 = vsel %vm372_vm5, %v4988_v20, 0.0 }
0x135c   :  { %3139 = vadd.xlane.f32.xlu2 %v3138_v56 }
0x13af   :  { %v3128_v33 = vpop.xlane.xlu1 %3127 }
0x13b0   :  { %4989 = vrcp.f32 %v3128_v33  ;;  %v2887_v33 = vadd.f32 %v6530_v54, %v6534_v39 }
0x13b6   :  { %v4990_v23 = vpop.eup %4989 }
0x13b7   :  { %v3146_v24 = vmul.f32 %v4990_v23, %v4980_v58  ;;  %v3131_v28 = vpop.xlane.xlu2 %3130  ;;  %v3286_v58 = vadd.f32 %v4804_v52, %v3285_v53 }
0x13b8   :  { %4991 = vrcp.f32 %v3131_v28  ;;  %v2890_v28 = vadd.f32 %v6538_v15, %v6540_v35 }
0x13b9   :  { %4670 = vmatmul.msk.f32.vlgmr.msrb.gmra.mxu0 %vm359_vm4, %v3146_v24 }
0x13be   :  { %v4992_v27 = vpop.eup %4991 }
0x13bf   :  { %v3134_v37 = vpop.xlane.xlu0 %3133  ;;  %v3147_v5 = vmul.f32 %v4992_v27, %v4982_v63  ;;  %v3291_v63 = vpop.f32.mrf.mxu2 }
0x13c0   :  { %4993 = vrcp.f32 %v3134_v37  ;;  %v3292_v12 = vadd.f32 %v4804_v52, %v3291_v63  ;;  %v5071_v37 = vld [vmem:[%s7076_s28] sm:$0xff] }
0x13c1   :  { %4671 = vmatmul.msk.f32.gmra.mxu0 %vm359_vm4, %v3147_v5 }
0x13c6   :  { %v4994_v18 = vpop.eup %4993 }
0x13c7   :  { %v3137_v44 = vpop.xlane.xlu1 %3136  ;;  %v3148_v10 = vmul.f32 %v4994_v18, %v4984_v60  ;;  %v3294_v46 = vpop.f32.mrf.mxu2  ;;  %v4806_v60 = vld [vmem:[%s7032_s10 + $0x7] ss:$0 sm:$0xff] }
0x13c8   :  { %4995 = vrcp.f32 %v3137_v44  ;;  %v3295_v7 = vadd.f32 %v4804_v52, %v3294_v46 }
0x13c9   :  { %4672 = vmatmul.msk.f32.gmra.mxu0 %vm359_vm4, %v3148_v10 }
0x13ce   :  { %v4996_v6 = vpop.eup %4995 }
0x13cf   :  { %v3140_v30 = vpop.xlane.xlu2 %3139  ;;  %v3149_v1 = vmul.f32 %v4996_v6, %v4986_v11  ;;  %v5073_v6 = vld [vmem:[%s7076_s28 + $0x10] sm:$0xff] }
0x13d0   :  { %4997 = vrcp.f32 %v3140_v30 }
0x13d1   :  { %4673 = vmatmul.msk.f32.gmra.mxu0 %vm359_vm4, %v3149_v1 }
0x13d6   :  { %v4998_v22 = vpop.eup %4997 }
0x13d7   :  { %v3150_v16 = vmul.f32 %v4998_v22, %v4988_v20 }
0x13d9   :  { %4674 = vmatmul.msk.f32.gmra.mxu0 %vm359_vm4, %v3150_v16 }
0x13e1   :  { %4706 = vmatmul.msk.f32.vlgmr.msra.gmra.mxu0 %vm158_vm1, %v6169_v2 }
0x13e9   :  { %4707 = vmatmul.msk.f32.gmra.mxu0 %vm158_vm1, %v6200_v32 }
0x13f1   :  { %4708 = vmatmul.msk.f32.gmra.mxu0 %vm158_vm1, %v6217_v59 }
0x13f9   :  { %4709 = vmatmul.msk.f32.gmra.mxu0 %vm158_vm1, %v6228_v3 }
0x1401   :  { %4710 = vmatmul.msk.f32.gmra.mxu0 %vm158_vm1, %v6239_v8 }
0x1436   :  { %v3186_v25 = vpop.f32.mrf.mxu0 }
0x1437   :  { %4676 = vmatmul.msk.f32.vlgmr.msrb.gmra.mxu1 %vm286_vm2, %v3186_v25  ;;  %v5074_v25 = vld [vmem:[%s7076_s28 + $0x18] sm:$0xff] }
0x143e   :  { %v3189_v51 = vpop.f32.mrf.mxu0 }
0x143f   :  { %4677 = vmatmul.msk.f32.gmra.mxu1 %vm286_vm2, %v3189_v51 }
0x1446   :  { %v3192_v21 = vpop.f32.mrf.mxu0 }
0x1447   :  { %4678 = vmatmul.msk.f32.gmra.mxu1 %vm286_vm2, %v3192_v21 }
0x144e   :  { %v3195_v13 = vpop.f32.mrf.mxu0 }
0x144f   :  { %4679 = vmatmul.msk.f32.gmra.mxu1 %vm286_vm2, %v3195_v13 }
0x1456   :  { %v3198_v26 = vpop.f32.mrf.mxu0 }
0x1457   :  { %4680 = vmatmul.msk.f32.gmra.mxu1 %vm286_vm2, %v3198_v26  ;;  %v5075_v26 = vld [vmem:[%s7076_s28 + $0x20] sm:$0x3] }
0x145e   :  { %v3366_v49 = vpop.f32.mrf.mxu0 }
0x145f   :  { %4716 = vmatmul.msk.f32.vlgmr.msra.gmra.mxu1 %vm286_vm2, %v3283_v34  ;;  %v3367_v17 = vadd.f32 %v4806_v60, %v3366_v49 }
0x1466   :  { %v3369_v41 = vpop.f32.mrf.mxu0 }
0x1467   :  { %4717 = vmatmul.msk.f32.gmra.mxu1 %vm286_vm2, %v3286_v58  ;;  %v3370_v11 = vadd.f32 %v4806_v60, %v3369_v41 }
0x146e   :  { %v3372_v42 = vpop.f32.mrf.mxu0 }
0x146f   :  { %4718 = vmatmul.msk.f32.gmra.mxu1 %vm286_vm2, %v3289_v61  ;;  %v3373_v14 = vadd.f32 %v4806_v60, %v3372_v42 }
0x1476   :  { %v3375_v31 = vpop.f32.mrf.mxu0 }
0x1477   :  { %4719 = vmatmul.msk.f32.gmra.mxu1 %vm286_vm2, %v3292_v12  ;;  %v3376_v45 = vadd.f32 %v4806_v60, %v3375_v31 }
0x147e   :  { %v3378_v4 = vpop.f32.mrf.mxu0 }
0x147f   :  { %v3379_v43 = vadd.f32 %v4806_v60, %v3378_v4  ;;  %4720 = vmatmul.msk.f32.gmra.mxu1 %vm286_vm2, %v3295_v7 }
0x1481   :  { %4721 = vmatpush.msk.msrb.mxu2 %vm431_vm3, %v3379_v43 }
0x1483   :  { %3538 = vmatpush.msrb.mxu2 %v3376_v45 }
0x1485   :  { %3539 = vmatpush.msrb.mxu2 %v3373_v14 }
0x1487   :  { %3540 = vmatpush.msrb.mxu2 %v3370_v11 }
0x1489   :  { %3541 = vmatpush.msrb.mxu2 %v3367_v17 }
0x14b4   :  { %v3235_v20 = vpop.f32.mrf.mxu1 }
0x14b5   :  { %v6630_v56 = vadd.f32 %v3235_v20, %v2884_v19 }
0x14bc   :  { %v3238_v23 = vpop.f32.mrf.mxu1 }
0x14bd   :  { %v6634_v24 = vadd.f32 %v3238_v23, %v2887_v33 }
0x14c4   :  { %v3241_v62 = vpop.f32.mrf.mxu1 }
0x14c5   :  { %v6638_v9 = vadd.f32 %v3241_v62, %v2890_v28 }
0x14cc   :  { %v3244_v29 = vpop.f32.mrf.mxu1 }
0x14cd   :  { %v6642_v36 = vadd.f32 %v3244_v29, %v2893_v0 }
0x14d4   :  { %v3247_v50 = vpop.f32.mrf.mxu1 }
0x14d5   :  { %v6645_v27 = vadd.f32 %v3247_v50, %v6550_v47 }
0x14dc   :  { %v3428_v54 = vpop.f32.mrf.mxu1 }
0x14dd   :  { %v3443_v39 = vmul.f32 0.35355338, %v3428_v54 }
0x14df   :  { %v3448_v15 = vadd.f32 %v5071_v37, %v3443_v39  ;;  %v4727_v39 = vld [vmem:[%s7033_s11 + $0x38] sm:$0xff] }
0x14e0   :  { %3590 = vmatpush.msrb.mxu3 %v4727_v39 }
0x14e1   :  { %v3453_v35 = vsel %vm359_vm4, %v3448_v15, -inf }
0x14e2   :  { %3454 = vmax.xlane.f32.xlu0 %v3453_v35 }
0x14e4   :  { %v3431_v5 = vpop.f32.mrf.mxu1 }
0x14e5   :  { %v3444_v18 = vmul.f32 0.35355338, %v3431_v5 }
0x14e7   :  { %v3449_v57 = vadd.f32 %v5072_v38, %v3444_v18 }
0x14e9   :  { %v3456_v47 = vsel %vm359_vm4, %v3449_v57, -inf }
0x14ea   :  { %3457 = vmax.xlane.f32.xlu1 %v3456_v47 }
0x14ec   :  { %v3434_v44 = vpop.f32.mrf.mxu1 }
0x14ed   :  { %v3445_v10 = vmul.f32 0.35355338, %v3434_v44 }
0x14ef   :  { %v3450_v30 = vadd.f32 %v5073_v6, %v3445_v10 }
0x14f1   :  { %v3459_v1 = vsel %vm359_vm4, %v3450_v30, -inf }
0x14f2   :  { %3460 = vmax.xlane.f32.xlu2 %v3459_v1 }
0x14f4   :  { %v3437_v22 = vpop.f32.mrf.mxu1 }
0x14f5   :  { %v3446_v16 = vmul.f32 0.35355338, %v3437_v22 }
0x14f7   :  { %v3451_v51 = vadd.f32 %v5074_v25, %v3446_v16 }
0x14f9   :  { %v3462_v21 = vsel %vm359_vm4, %v3451_v51, -inf }
0x14fa   :  { %3463 = vmax.xlane.f32.xlu0 %v3462_v21 }
0x14fc   :  { %v3440_v13 = vpop.f32.mrf.mxu1 }
0x14fd   :  { %v3447_v55 = vmul.f32 0.35355338, %v3440_v13 }
0x14ff   :  { %v3452_v52 = vadd.f32 %v5075_v26, %v3447_v55 }
0x1501   :  { %v3465_v53 = vsel %vm372_vm5, %v3452_v52, -inf }
0x1502   :  { %3466 = vmax.xlane.f32.xlu1 %v3465_v53 }
0x1555   :  { %v3455_v34 = vpop.xlane.xlu0 %3454 }
0x1556   :  { %v3468_v49 = vsub.f32 %v3448_v15, %v3455_v34 }
0x1558   :  { %v3473_v58 = vmul.f32 1.442695, %v3468_v49 }
0x155a   :  { %4999 = vpow2.f32 %v3473_v58 }
0x155d   :  { %v3458_v40 = vpop.xlane.xlu1 %3457 }
0x155e   :  { %v3469_v41 = vsub.f32 %v3449_v57, %v3458_v40 }
0x1560   :  { %v5000_v61 = vpop.eup %4999  ;;  %v3475_v42 = vmul.f32 1.442695, %v3469_v41 }
0x1561   :  { %v3483_v63 = vsel %vm359_vm4, %v5000_v61, 0.0 }
0x1562   :  { %5001 = vpow2.f32 %v3475_v42  ;;  %3484 = vadd.xlane.f32.xlu2 %v3483_v63 }
0x1565   :  { %v3461_v12 = vpop.xlane.xlu2 %3460 }
0x1566   :  { %v3470_v31 = vsub.f32 %v3450_v30, %v3461_v12 }
0x1568   :  { %v5002_v46 = vpop.eup %5001  ;;  %v3477_v7 = vmul.f32 1.442695, %v3470_v31 }
0x1569   :  { %v3486_v60 = vsel %vm359_vm4, %v5002_v46, 0.0 }
0x156a   :  { %5003 = vpow2.f32 %v3477_v7  ;;  %3487 = vadd.xlane.f32.xlu0 %v3486_v60 }
0x156d   :  { %v3464_v4 = vpop.xlane.xlu0 %3463 }
0x156e   :  { %v3471_v43 = vsub.f32 %v3451_v51, %v3464_v4  ;;  %v4807_v51 = vld [vmem:[%s7034_s12 + $0x1] ss:$0 sm:$0xff] }
0x1570   :  { %v5004_v45 = vpop.eup %5003  ;;  %v3479_v14 = vmul.f32 1.442695, %v3471_v43 }
0x1571   :  { %v3489_v11 = vsel %vm359_vm4, %v5004_v45, 0.0 }
0x1572   :  { %5005 = vpow2.f32 %v3479_v14  ;;  %3490 = vadd.xlane.f32.xlu1 %v3489_v11 }
0x1575   :  { %v3467_v17 = vpop.xlane.xlu1 %3466 }
0x1576   :  { %v3472_v19 = vsub.f32 %v3452_v52, %v3467_v17 }
0x1578   :  { %v5006_v20 = vpop.eup %5005  ;;  %v3481_v33 = vmul.f32 1.442695, %v3472_v19 }
0x1579   :  { %v3492_v23 = vsel %vm359_vm4, %v5006_v20, 0.0 }
0x157a   :  { %5007 = vpow2.f32 %v3481_v33  ;;  %3493 = vadd.xlane.f32.xlu2 %v3492_v23 }
0x1580   :  { %v5008_v28 = vpop.eup %5007 }
0x1581   :  { %v3495_v62 = vsel %vm372_vm5, %v5008_v28, 0.0 }
0x1582   :  { %3496 = vadd.xlane.f32.xlu0 %v3495_v62 }
0x15d5   :  { %v3485_v0 = vpop.xlane.xlu2 %3484 }
0x15d6   :  { %5009 = vrcp.f32 %v3485_v0 }
0x15dc   :  { %v5010_v29 = vpop.eup %5009 }
0x15dd   :  { %v3503_v50 = vmul.f32 %v5010_v29, %v5000_v61  ;;  %v3488_v54 = vpop.xlane.xlu0 %3487 }
0x15de   :  { %5011 = vrcp.f32 %v3488_v54 }
0x15df   :  { %4722 = vmatmul.msk.f32.vlgmr.msrb.gmra.mxu2 %vm359_vm4, %v3503_v50 }
0x15e4   :  { %v5012_v37 = vpop.eup %5011 }
0x15e5   :  { %v3491_v15 = vpop.xlane.xlu1 %3490  ;;  %v3504_v35 = vmul.f32 %v5012_v37, %v5002_v46 }
0x15e6   :  { %5013 = vrcp.f32 %v3491_v15 }
0x15e7   :  { %4723 = vmatmul.msk.f32.gmra.mxu2 %vm359_vm4, %v3504_v35 }
0x15ec   :  { %v5014_v5 = vpop.eup %5013 }
0x15ed   :  { %v3494_v18 = vpop.xlane.xlu2 %3493  ;;  %v3505_v38 = vmul.f32 %v5014_v5, %v5004_v45 }
0x15ee   :  { %5015 = vrcp.f32 %v3494_v18  ;;  %v4739_v18 = vld [vmem:[%s7037_s15 + $0x38] sm:$0xff] }
0x15ef   :  { %4724 = vmatmul.msk.f32.gmra.mxu2 %vm359_vm4, %v3505_v38  ;;  %3794 = vmatpush.msrb.mxu0 %v4739_v18  ;;  %v4738_v38 = vld [vmem:[%s7037_s15 + $0x30] sm:$0xff] }
0x15f1   :  { %3795 = vmatpush.msrb.mxu0 %v4738_v38 }
0x15f4   :  { %v5016_v57 = vpop.eup %5015 }
0x15f5   :  { %v3497_v47 = vpop.xlane.xlu0 %3496  ;;  %v3506_v44 = vmul.f32 %v5016_v57, %v5006_v20  ;;  %v4737_v57 = vld [vmem:[%s7037_s15 + $0x28] sm:$0xff] }
0x15f6   :  { %5017 = vrcp.f32 %v3497_v47  ;;  %3796 = vmatpush.msrb.mxu0 %v4737_v57  ;;  %v4736_v47 = vld [vmem:[%s7037_s15 + $0x20] sm:$0xff] }
0x15f7   :  { %4725 = vmatmul.msk.f32.gmra.mxu2 %vm359_vm4, %v3506_v44 }
0x15f8   :  { %3797 = vmatpush.msrb.mxu0 %v4736_v47 }
0x15fc   :  { %v5018_v10 = vpop.eup %5017 }
0x15fd   :  { %v3507_v6 = vmul.f32 %v5018_v10, %v5008_v28 }
0x15ff   :  { %4726 = vmatmul.msk.f32.gmra.mxu2 %vm359_vm4, %v3507_v6 }
0x1662   :  { %v3543_v30 = vpop.f32.mrf.mxu2 }
0x1663   :  { %4728 = vmatmul.msk.f32.vlgmr.msrb.gmra.mxu3 %vm286_vm2, %v3543_v30 }
0x166a   :  { %v3546_v1 = vpop.f32.mrf.mxu2 }
0x166b   :  { %4729 = vmatmul.msk.f32.gmra.mxu3 %vm286_vm2, %v3546_v1 }
0x1672   :  { %v3549_v22 = vpop.f32.mrf.mxu2 }
0x1673   :  { %4730 = vmatmul.msk.f32.gmra.mxu3 %vm286_vm2, %v3549_v22 }
0x167a   :  { %v3552_v16 = vpop.f32.mrf.mxu2 }
0x167b   :  { %4731 = vmatmul.msk.f32.gmra.mxu3 %vm286_vm2, %v3552_v16 }
0x1682   :  { %v3555_v25 = vpop.f32.mrf.mxu2 }
0x1683   :  { %4732 = vmatmul.msk.f32.gmra.mxu3 %vm286_vm2, %v3555_v25 }
0x16e6   :  { %v3592_v21 = vpop.f32.mrf.mxu3 }
0x16e7   :  { %v3607_v13 = vadd.f32 %v3592_v21, %v6630_v56 }
0x16e9   :  { %v3617_v55 = vadd.f32 %v4807_v51, %v3607_v13 }
0x16eb   :  { %v3622_v26 = vadd.f32 %v3617_v55, %v6169_v2 }
0x16ed   :  { %v3631_v52 = vsel %vm158_vm1, %v3622_v26, 0.0 }
0x16ee   :  { %v3595_v53 = vpop.f32.mrf.mxu3  ;;  %3632 = vadd.xlane.f32.xlu1 %v3631_v52 }
0x16ef   :  { %v3608_v34 = vadd.f32 %v3595_v53, %v6634_v24 }
0x16f1   :  { %v3618_v49 = vadd.f32 %v4807_v51, %v3608_v34 }
0x16f3   :  { %v3623_v58 = vadd.f32 %v3618_v49, %v6200_v32 }
0x16f5   :  { %v3634_v40 = vsel %vm158_vm1, %v3623_v58, 0.0 }
0x16f6   :  { %3635 = vadd.xlane.f32.xlu2 %v3634_v40  ;;  %v3598_v41 = vpop.f32.mrf.mxu3 }
0x16f7   :  { %v3609_v61 = vadd.f32 %v3598_v41, %v6638_v9 }
0x16f9   :  { %v3619_v42 = vadd.f32 %v4807_v51, %v3609_v61  ;;  %v6756_v61 = vld [vmem:[%s7036_s14 + $0x1] ss:$0 sm:$0xff] }
0x16fb   :  { %v3624_v56 = vadd.f32 %v3619_v42, %v6217_v59 }
0x16fd   :  { %v3637_v2 = vsel %vm158_vm1, %v3624_v56, 0.0 }
0x16fe   :  { %3638 = vadd.xlane.f32.xlu0 %v3637_v2  ;;  %v3601_v63 = vpop.f32.mrf.mxu3 }
0x16ff   :  { %v3610_v12 = vadd.f32 %v3601_v63, %v6642_v36 }
0x1701   :  { %v3620_v31 = vadd.f32 %v4807_v51, %v3610_v12 }
0x1703   :  { %v3625_v24 = vadd.f32 %v3620_v31, %v6228_v3 }
0x1705   :  { %v3640_v32 = vsel %vm158_vm1, %v3625_v24, 0.0 }
0x1706   :  { %3641 = vadd.xlane.f32.xlu1 %v3640_v32  ;;  %v3604_v46 = vpop.f32.mrf.mxu3 }
0x1707   :  { %v3611_v7 = vadd.f32 %v3604_v46, %v6645_v27 }
0x1709   :  { %v3621_v60 = vadd.f32 %v4807_v51, %v3611_v7 }
0x170b   :  { %v3626_v9 = vadd.f32 %v3621_v60, %v6239_v8 }
0x170d   :  { %v3643_v59 = vsel %vm1609_vm6, %v3626_v9, 0.0 }
0x170e   :  { %3644 = vadd.xlane.f32.xlu2 %v3643_v59 }
0x1761   :  { %v3633_v4 = vpop.xlane.xlu1 %3632 }
0x1762   :  { %v3646_v43 = vmul.f32 %v3633_v4, %v5846_v48 }
0x1764   :  { %v6704_v45 = vsub.f32 %v3622_v26, %v3646_v43 }
0x1766   :  { %v3656_v3 = vmul.f32 %v6704_v45, %v6704_v45 }
0x1768   :  { %v3661_v36 = vsel %vm158_vm1, %v3656_v3, 0.0 }
0x1769   :  { %v3636_v14 = vpop.xlane.xlu2 %3635  ;;  %3662 = vadd.xlane.f32.xlu0 %v3661_v36 }
0x176a   :  { %v3647_v27 = vmul.f32 %v3636_v14, %v5846_v48 }
0x176c   :  { %v6710_v11 = vsub.f32 %v3623_v58, %v3647_v27  ;;  %v6751_v58 = vld [vmem:[%s7035_s13 + $0x1] ss:$0 sm:$0xff] }
0x176e   :  { %v3657_v8 = vmul.f32 %v6710_v11, %v6710_v11 }
0x1770   :  { %v3664_v17 = vsel %vm158_vm1, %v3657_v8, 0.0 }
0x1771   :  { %v3639_v19 = vpop.xlane.xlu0 %3638  ;;  %3665 = vadd.xlane.f32.xlu1 %v3664_v17 }
0x1772   :  { %v3648_v20 = vmul.f32 %v3639_v19, %v5846_v48 }
0x1774   :  { %v6716_v33 = vsub.f32 %v3624_v56, %v3648_v20 }
0x1776   :  { %v3658_v23 = vmul.f32 %v6716_v33, %v6716_v33 }
0x1778   :  { %v3667_v28 = vsel %vm158_vm1, %v3658_v23, 0.0 }
0x1779   :  { %v3642_v62 = vpop.xlane.xlu1 %3641  ;;  %3668 = vadd.xlane.f32.xlu2 %v3667_v28 }
0x177a   :  { %v3649_v0 = vmul.f32 %v3642_v62, %v5846_v48 }
0x177c   :  { %v6722_v29 = vsub.f32 %v3625_v24, %v3649_v0 }
0x177e   :  { %v3659_v50 = vmul.f32 %v6722_v29, %v6722_v29 }
0x1780   :  { %v3670_v54 = vsel %vm158_vm1, %v3659_v50, 0.0 }
0x1781   :  { %3671 = vadd.xlane.f32.xlu0 %v3670_v54  ;;  %v3645_v39 = vpop.xlane.xlu2 %3644 }
0x1782   :  { %v3650_v37 = vmul.f32 %v3645_v39, %v5846_v48 }
0x1784   :  { %v6728_v15 = vsub.f32 %v3626_v9, %v3650_v37 }
0x1786   :  { %v3660_v35 = vmul.f32 %v6728_v15, %v6728_v15 }
0x1788   :  { %v3673_v5 = vsel %vm1609_vm6, %v3660_v35, 0.0 }
0x1789   :  { %3674 = vadd.xlane.f32.xlu1 %v3673_v5 }
0x17dc   :  { %v3663_v44 = vpop.xlane.xlu0 %3662 }
0x17dd   :  { %v3676_v10 = vmul.f32 %v3663_v44, %v5846_v48 }
0x17df   :  { %v3681_v6 = vadd.f32 1e-05, %v3676_v10 }
0x17e1   :  { %5019 = vrsqrt.f32 %v3681_v6  ;;  %vm3692_vm5 = vweird.f32 %v3681_v6 }
0x17e4   :  { %v3666_v30 = vpop.xlane.xlu1 %3665 }
0x17e5   :  { %v3677_v1 = vmul.f32 %v3666_v30, %v5846_v48 }
0x17e7   :  { %v5020_v22 = vpop.eup %5019  ;;  %v3682_v16 = vadd.f32 1e-05, %v3677_v1 }
0x17e8   :  { %v3687_v25 = vmul.f32 %v5020_v22, %v3681_v6  ;;  %vm3693_vm2 = vweird.f32 %v5020_v22 }
0x17e9   :  { %5021 = vrsqrt.f32 %v3682_v16  ;;  %vm3694_vm0 = vmor %vm3692_vm5, %vm3693_vm2  ;;  %vm3702_vm8 = vweird.f32 %v3682_v16 }
0x17ea   :  { %v3688_v51 = vmul.f32 %v5020_v22, %v3687_v25 }
0x17ec   :  { %v3689_v21 = vmul.f32 0.5, %v3688_v51  ;;  %v3669_v13 = vpop.xlane.xlu2 %3668 }
0x17ed   :  { %v3678_v55 = vmul.f32 %v3669_v13, %v5846_v48 }
0x17ee   :  { %v3690_v26 = vsub.f32 1.5, %v3689_v21 }
0x17ef   :  { %v5022_v52 = vpop.eup %5021  ;;  %v3683_v53 = vadd.f32 1e-05, %v3678_v55 }
0x17f0   :  { %v3691_v34 = vmul.f32 %v5020_v22, %v3690_v26  ;;  %v3697_v49 = vmul.f32 %v5022_v52, %v3682_v16  ;;  %vm3703_vm7 = vweird.f32 %v5022_v52 }
0x17f1   :  { %5023 = vrsqrt.f32 %v3683_v53  ;;  %vm3704_vm9 = vmor %vm3702_vm8, %vm3703_vm7  ;;  %vm3712_vm12 = vweird.f32 %v3683_v53 }
0x17f2   :  { %v3695_v40 = vsel %vm3694_vm0, %v5020_v22, %v3691_v34  ;;  %v3698_v41 = vmul.f32 %v5022_v52, %v3697_v49  ;;  %v6798_v22 = vld [vmem:[%s7038_s16 + $0x1] ss:$0 sm:$0xff]  ;;  %v4752_v49 = vld [vmem:[%s7039_s17 + $0x70] sm:$0xff] }
0x17f3   :  { %v3736_v42 = vmul.f32 %v3695_v40, %v6704_v45 }
0x17f4   :  { %v3699_v56 = vmul.f32 0.5, %v3698_v41  ;;  %v3672_v2 = vpop.xlane.xlu0 %3671 }
0x17f5   :  { %v3744_v63 = vmul.f32 %v6751_v58, %v3736_v42  ;;  %v3679_v12 = vmul.f32 %v3672_v2, %v5846_v48  ;;  %v4751_v42 = vld [vmem:[%s7039_s17 + $0x68] sm:$0xff] }
0x17f6   :  { %v3700_v31 = vsub.f32 1.5, %v3699_v56 }
0x17f7   :  { %v5024_v24 = vpop.eup %5023  ;;  %v6762_v32 = vadd.f32 %v6756_v61, %v3744_v63  ;;  %v3684_v46 = vadd.f32 1e-05, %v3679_v12  ;;  %v4750_v12 = vld [vmem:[%s7039_s17 + $0x60] sm:$0xff] }
0x17f8   :  { %v3701_v7 = vmul.f32 %v5022_v52, %v3700_v31  ;;  %v3707_v60 = vmul.f32 %v5024_v24, %v3683_v53  ;;  %vm3713_vm11 = vweird.f32 %v5024_v24  ;;  %v4753_v53 = vld [vmem:[%s7039_s17 + $0x78] sm:$0xff] }
0x17f9   :  { %5025 = vrsqrt.f32 %v3684_v46  ;;  %4741 = vmatmul.msk.f32.vlgmr.msrb.gmra.mxu0 %vm158_vm1, %v6762_v32  ;;  %vm3714_vm13 = vmor %vm3712_vm12, %vm3713_vm11  ;;  %vm3722_vm15 = vweird.f32 %v3684_v46  ;;  %4051 = vmatpush.msrb.mxu1 %v4753_v53 }
0x17fa   :  { %v3705_v9 = vsel %vm3704_vm9, %v5022_v52, %v3701_v7  ;;  %v3708_v59 = vmul.f32 %v5024_v24, %v3707_v60 }
0x17fb   :  { %v3737_v4 = vmul.f32 %v3705_v9, %v6710_v11  ;;  %4052 = vmatpush.msrb.mxu1 %v4752_v49  ;;  %v4749_v9 = vld [vmem:[%s7039_s17 + $0x58] sm:$0xff] }
0x17fc   :  { %v3709_v43 = vmul.f32 0.5, %v3708_v59  ;;  %v3675_v45 = vpop.xlane.xlu1 %3674 }
0x17fd   :  { %v3680_v3 = vmul.f32 %v3675_v45, %v5846_v48  ;;  %v3745_v36 = vmul.f32 %v6751_v58, %v3737_v4  ;;  %4053 = vmatpush.msrb.mxu1 %v4751_v42  ;;  %v4748_v4 = vld [vmem:[%s7039_s17 + $0x50] sm:$0xff] }
0x17fe   :  { %v3710_v14 = vsub.f32 1.5, %v3709_v43 }
0x17ff   :  { %v5026_v27 = vpop.eup %5025  ;;  %v3685_v8 = vadd.f32 1e-05, %v3680_v3  ;;  %v6770_v17 = vadd.f32 %v6756_v61, %v3745_v36  ;;  %4054 = vmatpush.msrb.mxu1 %v4750_v12 }
0x1800   :  { %v3711_v19 = vmul.f32 %v5024_v24, %v3710_v14  ;;  %v3717_v20 = vmul.f32 %v5026_v27, %v3684_v46  ;;  %vm3723_vm14 = vweird.f32 %v5026_v27 }
0x1801   :  { %5027 = vrsqrt.f32 %v3685_v8  ;;  %4742 = vmatmul.msk.f32.gmra.mxu0 %vm158_vm1, %v6770_v17  ;;  %vm3724_vm2 = vmor %vm3722_vm15, %vm3723_vm14  ;;  %vm3732_vm0 = vweird.f32 %v3685_v8  ;;  %4055 = vmatpush.msrb.mxu1 %v4749_v9 }
0x1802   :  { %v3715_v11 = vsel %vm3714_vm13, %v5024_v24, %v3711_v19  ;;  %v3718_v23 = vmul.f32 %v5026_v27, %v3717_v20 }
0x1803   :  { %v3738_v28 = vmul.f32 %v3715_v11, %v6716_v33  ;;  %4056 = vmatpush.msrb.mxu1 %v4748_v4 }
0x1804   :  { %v3719_v62 = vmul.f32 0.5, %v3718_v23 }
0x1805   :  { %v3746_v0 = vmul.f32 %v6751_v58, %v3738_v28  ;;  %v4746_v28 = vld [vmem:[%s7039_s17 + $0x40] sm:$0xff] }
0x1806   :  { %v3720_v50 = vsub.f32 1.5, %v3719_v62 }
0x1807   :  { %v5028_v54 = vpop.eup %5027  ;;  %v6777_v39 = vadd.f32 %v6756_v61, %v3746_v0 }
0x1808   :  { %v3721_v37 = vmul.f32 %v5026_v27, %v3720_v50  ;;  %v3727_v35 = vmul.f32 %v5028_v54, %v3685_v8  ;;  %vm3733_vm5 = vweird.f32 %v5028_v54 }
0x1809   :  { %4743 = vmatmul.msk.f32.gmra.mxu0 %vm158_vm1, %v6777_v39  ;;  %vm3734_vm7 = vmor %vm3732_vm0, %vm3733_vm5 }
0x180a   :  { %v3725_v5 = vsel %vm3724_vm2, %v5026_v27, %v3721_v37  ;;  %v3728_v18 = vmul.f32 %v5028_v54, %v3727_v35  ;;  %v4747_v27 = vld [vmem:[%s7039_s17 + $0x48] sm:$0xff] }
0x180b   :  { %v3739_v33 = vmul.f32 %v3725_v5, %v6722_v29  ;;  %4057 = vmatpush.msrb.mxu1 %v4747_v27 }
0x180c   :  { %v3729_v38 = vmul.f32 0.5, %v3728_v18 }
0x180d   :  { %v3747_v57 = vmul.f32 %v6751_v58, %v3739_v33  ;;  %4058 = vmatpush.msrb.mxu1 %v4746_v28 }
0x180e   :  { %v3730_v47 = vsub.f32 1.5, %v3729_v38 }
0x180f   :  { %v6784_v44 = vadd.f32 %v6756_v61, %v3747_v57 }
0x1810   :  { %v3731_v10 = vmul.f32 %v5028_v54, %v3730_v47 }
0x1811   :  { %4744 = vmatmul.msk.f32.gmra.mxu0 %vm158_vm1, %v6784_v44 }
0x1812   :  { %v3735_v6 = vsel %vm3734_vm7, %v5028_v54, %v3731_v10 }
0x1813   :  { %v3740_v30 = vmul.f32 %v3735_v6, %v6728_v15 }
0x1815   :  { %v3748_v1 = vmul.f32 %v6751_v58, %v3740_v30 }
0x1817   :  { %v6791_v29 = vadd.f32 %v6756_v61, %v3748_v1 }
0x1819   :  { %4745 = vmatmul.msk.f32.gmra.mxu0 %vm158_vm1, %v6791_v29 }
0x1876   :  { %v3799_v16 = vpop.f32.mrf.mxu0 }
0x1877   :  { %v6801_v25 = vadd.f32 %v6798_v22, %v3799_v16 }
0x1879   :  { %v6804_v51 = vmul.f32 0.70710677, %v6801_v25 }
0x187b   :  { %v3824_v15 = vand.u32 2147483647, %v6804_v51 }
0x187d   :  { %v3829_v21 = vmul.f32 0.3275911, %v3824_v15  ;;  %v3959_v20 = vsub.f32 0.0, %v3824_v15 }
0x187e   :  { %v3802_v13 = vpop.f32.mrf.mxu0 }
0x187f   :  { %v3834_v55 = vadd.f32 1.0, %v3829_v21  ;;  %v6808_v26 = vadd.f32 %v6798_v22, %v3802_v13  ;;  %v3964_v37 = vmul.f32 %v3959_v20, %v3824_v15 }
0x1881   :  { %5029 = vrcp.f32 %v3834_v55  ;;  %v6811_v52 = vmul.f32 0.70710677, %v6808_v26  ;;  %v3850_v24 = vand.u32 2147483648, %v3834_v55  ;;  %v3848_v60 = vand.u32 2147483647, %v3834_v55 }
0x1882   :  { %vm3844_vm9 = vweird.f32 %v3834_v55  ;;  %v3969_v16 = vmul.f32 1.442695, %v3964_v37 }
0x1883   :  { %v6817_v34 = vand.u32 2147483647, %v6811_v52  ;;  %v3851_v3 = vor.u32 1.1754944e-38, %v3850_v24  ;;  %vm3849_vm12 = vcmp.eq.f32.partialorder %v3848_v60, 8.507059e+37 }
0x1885   :  { %v3830_v58 = vmul.f32 0.3275911, %v6817_v34 }
0x1886   :  { %v3805_v40 = vpop.f32.mrf.mxu0 }
0x1887   :  { %v5030_v41 = vpop.eup %5029  ;;  %v6824_v61 = vadd.f32 %v6798_v22, %v3805_v40  ;;  %v3835_v2 = vadd.f32 1.0, %v3830_v58 }
0x1888   :  { %v3840_v56 = vmul.f32 %v5030_v41, %v3834_v55  ;;  %vm3845_vm8 = vweird.f32 %v5030_v41  ;;  %v3960_v55 = vsub.f32 0.0, %v6817_v34 }
0x1889   :  { %v6830_v63 = vmul.f32 0.70710677, %v6824_v61  ;;  %5031 = vrcp.f32 %v3835_v2  ;;  %vm3846_vm11 = vmor %vm3844_vm9, %vm3845_vm8  ;;  %v3865_v35 = vand.u32 2147483648, %v3835_v2  ;;  %v3863_v18 = vand.u32 2147483647, %v3835_v2 }
0x188a   :  { %v3841_v31 = vsub.f32 1.0, %v3840_v56  ;;  %vm3859_vm14 = vweird.f32 %v3835_v2  ;;  %v3965_v24 = vmul.f32 %v3960_v55, %v6817_v34 }
0x188b   :  { %v6836_v46 = vand.u32 2147483647, %v6830_v63  ;;  %v3866_v15 = vor.u32 1.1754944e-38, %v3865_v35  ;;  %vm3864_vm2 = vcmp.eq.f32.partialorder %v3863_v18, 8.507059e+37 }
0x188c   :  { %v3842_v7 = vmul.f32 %v5030_v41, %v3841_v31 }
0x188d   :  { %v3831_v59 = vmul.f32 0.3275911, %v6836_v46 }
0x188e   :  { %v3843_v43 = vadd.f32 %v5030_v41, %v3842_v7  ;;  %v3808_v45 = vpop.f32.mrf.mxu0 }
0x188f   :  { %v6845_v36 = vadd.f32 1.0, %v3831_v59  ;;  %v6848_v14 = vadd.f32 %v6798_v22, %v3808_v45  ;;  %v5032_v8 = vpop.eup %5031 }
0x1890   :  { %v3847_v19 = vsel %vm3846_vm11, %v5030_v41, %v3843_v43  ;;  %v3855_v23 = vmul.f32 %v5032_v8, %v3835_v2  ;;  %vm3860_vm13 = vweird.f32 %v5032_v8  ;;  %v3961_v43 = vsub.f32 0.0, %v6836_v46 }
0x1891   :  { %v6853_v11 = vsel %vm3849_vm12, %v3851_v3, %v3847_v19  ;;  %5033 = vrcp.f32 %v6845_v36  ;;  %v6861_v50 = vmul.f32 0.70710677, %v6848_v14  ;;  %vm3861_vm15 = vmor %vm3859_vm14, %vm3860_vm13  ;;  %v3880_v42 = vand.u32 2147483648, %v6845_v36 }
0x1892   :  { %v3914_v62 = vmul.f32 1.0614054, %v6853_v11  ;;  %v3856_v0 = vsub.f32 1.0, %v3855_v23  ;;  %v3878_v12 = vand.u32 2147483647, %v6845_v36  ;;  %vm3874_vm0 = vweird.f32 %v6845_v36 }
0x1893   :  { %v6864_v33 = vand.u32 2147483647, %v6861_v50  ;;  %v3881_v4 = vor.u32 1.1754944e-38, %v3880_v42  ;;  %v3971_v19 = vmul.f32 1.442695, %v3965_v24  ;;  %v3966_v37 = vmul.f32 %v3961_v43, %v6836_v46 }
0x1894   :  { %v3919_v54 = vadd.f32 -1.4531521, %v3914_v62  ;;  %v3857_v5 = vmul.f32 %v5032_v8, %v3856_v0  ;;  %vm3879_vm8 = vcmp.eq.f32.partialorder %v3878_v12, 8.507059e+37  ;;  %vm3989_vm12 = vcmp.ge.f32.partialorder %v6804_v51, 0.0 }
0x1895   :  { %v3832_v6 = vmul.f32 0.3275911, %v6864_v33 }
0x1896   :  { %v3924_v38 = vmul.f32 %v3919_v54, %v6853_v11  ;;  %v3811_v57 = vpop.f32.mrf.mxu0  ;;  %v3858_v10 = vadd.f32 %v5032_v8, %v3857_v5 }
0x1897   :  { %v5034_v47 = vpop.eup %5033  ;;  %v6869_v30 = vadd.f32 %v6798_v22, %v3811_v57  ;;  %v3837_v53 = vadd.f32 1.0, %v3832_v6 }
0x1898   :  { %v3929_v1 = vadd.f32 1.4214138, %v3924_v38  ;;  %v3870_v21 = vmul.f32 %v5034_v47, %v6845_v36  ;;  %v3862_v13 = vsel %vm3861_vm15, %v5032_v8, %v3858_v10  ;;  %vm3875_vm5 = vweird.f32 %v5034_v47 }
0x1899   :  { %v6874_v58 = vsel %vm3864_vm2, %v3866_v15, %v3862_v13  ;;  %v6877_v41 = vmul.f32 0.70710677, %v6869_v30  ;;  %5035 = vrcp.f32 %v3837_v53  ;;  %vm3876_vm7 = vmor %vm3874_vm0, %vm3875_vm5  ;;  %v3893_v57 = vand.u32 2147483647, %v3837_v53 }
0x189a   :  { %v3934_v49 = vmul.f32 %v3929_v1, %v6853_v11  ;;  %v3871_v40 = vsub.f32 1.0, %v3870_v21  ;;  %v3915_v22 = vmul.f32 1.0614054, %v6874_v58  ;;  %5037 = vpow2.f32 %v3969_v16 }
0x189b   :  { %v6884_v7 = vand.u32 2147483647, %v6877_v41  ;;  %v3814_v1 = vmul.f32 0.5, %v6801_v25  ;;  %v3973_v15 = vmul.f32 1.442695, %v3966_v37  ;;  %vm3889_vm11 = vweird.f32 %v3837_v53 }
0x189c   :  { %v3939_v56 = vadd.f32 -0.28449672, %v3934_v49  ;;  %v3872_v2 = vmul.f32 %v5034_v47, %v3871_v40  ;;  %v3920_v31 = vadd.f32 -1.4531521, %v3915_v22  ;;  %vm3894_vm14 = vcmp.eq.f32.partialorder %v3893_v57, 8.507059e+37 }
0x189d   :  { %v3833_v45 = vmul.f32 0.3275911, %v6884_v7  ;;  %vm3990_vm5 = vcmp.ge.f32.partialorder %v6811_v52, 0.0 }
0x189e   :  { %v3944_v60 = vmul.f32 %v3939_v56, %v6853_v11  ;;  %v3873_v9 = vadd.f32 %v5034_v47, %v3872_v2  ;;  %v3925_v59 = vmul.f32 %v3920_v31, %v6874_v58 }
0x189f   :  { %v5036_v34 = vpop.eup %5035  ;;  %v6893_v23 = vadd.f32 1.0, %v3833_v45 }
0x18a0   :  { %v3949_v3 = vadd.f32 0.2548296, %v3944_v60  ;;  %v3877_v27 = vsel %vm3876_vm7, %v5034_v47, %v3873_v9  ;;  %v3930_v8 = vadd.f32 1.4214138, %v3925_v59  ;;  %v3885_v62 = vmul.f32 %v5036_v34, %v3837_v53  ;;  %v5038_v0 = vpop.eup %5037 }
0x18a1   :  { %v6891_v20 = vsel %vm3879_vm8, %v3881_v4, %v3877_v27  ;;  %5039 = vrcp.f32 %v6893_v23  ;;  %v3895_v47 = vand.u32 2147483648, %v3837_v53  ;;  %vm3890_vm9 = vweird.f32 %v5036_v34 }
0x18a2   :  { %v3954_v36 = vmul.f32 %v3949_v3, %v6853_v11  ;;  %v3916_v28 = vmul.f32 1.0614054, %v6891_v20  ;;  %v3935_v54 = vmul.f32 %v3930_v8, %v6874_v58  ;;  %v3886_v18 = vsub.f32 1.0, %v3885_v62  ;;  %vm3891_vm13 = vmor %vm3889_vm11, %vm3890_vm9 }
0x18a3   :  { %5041 = vpow2.f32 %v3971_v19  ;;  %v3896_v40 = vor.u32 1.1754944e-38, %v3895_v47  ;;  %v3962_v53 = vsub.f32 0.0, %v6864_v33  ;;  %v3908_v43 = vand.u32 2147483647, %v6893_v23 }
0x18a4   :  { %v3979_v35 = vmul.f32 %v5038_v0, %v3954_v36  ;;  %v3921_v5 = vadd.f32 -1.4531521, %v3916_v28  ;;  %v3940_v38 = vadd.f32 -0.28449672, %v3935_v54  ;;  %v3887_v6 = vmul.f32 %v5036_v34, %v3886_v18 }
0x18a5   :  { %5043 = vpow2.f32 %v3973_v15  ;;  %v3910_v45 = vand.u32 2147483648, %v6893_v23  ;;  %vm3904_vm2 = vweird.f32 %v6893_v23  ;;  %v3815_v62 = vmul.f32 0.5, %v6808_v26 }
0x18a6   :  { %v3984_v10 = vsub.f32 1.0, %v3979_v35  ;;  %v3926_v11 = vmul.f32 %v3921_v5, %v6891_v20  ;;  %v3945_v16 = vmul.f32 %v3940_v38, %v6874_v58  ;;  %v3888_v13 = vadd.f32 %v5036_v34, %v3887_v6 }
0x18a7   :  { %v5040_v55 = vpop.eup %5039  ;;  %v3911_v54 = vor.u32 1.1754944e-38, %v3910_v45  ;;  %vm3909_vm7 = vcmp.eq.f32.partialorder %v3908_v43, 8.507059e+37  ;;  %v3963_v47 = vsub.f32 0.0, %v6884_v7  ;;  %vm3991_vm8 = vcmp.ge.f32.partialorder %v6830_v63, 0.0 }
0x18a8   :  { %v3994_v46 = vsub.f32 0.0, %v3984_v10  ;;  %v3931_v21 = vadd.f32 1.4214138, %v3926_v11  ;;  %v3950_v49 = vadd.f32 0.2548296, %v3945_v16  ;;  %v3892_v56 = vsel %vm3891_vm13, %v5036_v34, %v3888_v13 }
0x18a9   :  { %v3900_v25 = vmul.f32 %v5040_v55, %v6893_v23  ;;  %v5042_v2 = vpop.eup %5041  ;;  %v3897_v24 = vsel %vm3894_vm14, %v3896_v40, %v3892_v56  ;;  %vm3905_vm15 = vweird.f32 %v5040_v55  ;;  %v3968_v15 = vmul.f32 %v3963_v47, %v6884_v7 }
0x18aa   :  { %v3999_v22 = vsel %vm3989_vm12, %v3984_v10, %v3994_v46  ;;  %v3936_v42 = vmul.f32 %v3931_v21, %v6891_v20  ;;  %v3955_v31 = vmul.f32 %v3950_v49, %v6874_v58  ;;  %v3917_v51 = vmul.f32 1.0614054, %v3897_v24  ;;  %vm3906_vm0 = vmor %vm3904_vm2, %vm3905_vm15 }
0x18ab   :  { %v4004_v12 = vadd.f32 1.0, %v3999_v22  ;;  %v3901_v9 = vsub.f32 1.0, %v3900_v25  ;;  %v3967_v58 = vmul.f32 %v3962_v53, %v6864_v33  ;;  %v5044_v37 = vpop.eup %5043  ;;  %v3816_v40 = vmul.f32 0.5, %v6824_v61 }
0x18ac   :  { %v3941_v60 = vadd.f32 -0.28449672, %v3936_v42  ;;  %v3980_v4 = vmul.f32 %v5042_v2, %v3955_v31  ;;  %v3922_v27 = vadd.f32 -1.4531521, %v3917_v51  ;;  %v3977_v42 = vmul.f32 1.442695, %v3968_v15 }
0x18ad   :  { %v4009_v59 = vmul.f32 %v4004_v12, %v3814_v1  ;;  %v3902_v34 = vmul.f32 %v5040_v55, %v3901_v9  ;;  %v3975_v38 = vmul.f32 1.442695, %v3967_v58  ;;  %vm3992_vm9 = vcmp.ge.f32.partialorder %v6861_v50, 0.0 }
0x18ae   :  { %v3946_v3 = vmul.f32 %v3941_v60, %v6891_v20  ;;  %v3985_v8 = vsub.f32 1.0, %v3980_v4  ;;  %v3927_v36 = vmul.f32 %v3922_v27, %v3897_v24  ;;  %v3817_v4 = vmul.f32 0.5, %v6848_v14  ;;  %v4811_v14 = vld [vmem:[%s7040_s18 + $0x1] ss:$0 sm:$0xff] }
0x18af   :  { %4755 = vmatmul.msk.f32.vlgmr.msrb.gmra.mxu1 %vm1998_vm10, %v4009_v59  ;;  %v3903_v28 = vadd.f32 %v5040_v55, %v3902_v34  ;;  %5045 = vpow2.f32 %v3975_v38  ;;  %vm3993_vm11 = vcmp.ge.f32.partialorder %v6877_v41, 0.0 }
0x18b0   :  { %v3951_v19 = vadd.f32 0.2548296, %v3946_v3  ;;  %v3995_v0 = vsub.f32 0.0, %v3985_v8  ;;  %v3932_v5 = vadd.f32 1.4214138, %v3927_v36  ;;  %5047 = vpow2.f32 %v3977_v42 }
0x18b1   :  { %v3907_v18 = vsel %vm3906_vm0, %v5040_v55, %v3903_v28 }
0x18b2   :  { %v3956_v35 = vmul.f32 %v3951_v19, %v6891_v20  ;;  %v4000_v33 = vsel %vm3990_vm5, %v3985_v8, %v3995_v0  ;;  %v3912_v57 = vsel %vm3909_vm7, %v3911_v54, %v3907_v18  ;;  %v3937_v11 = vmul.f32 %v3932_v5, %v3897_v24 }
0x18b3   :  { %v4005_v10 = vadd.f32 1.0, %v4000_v33  ;;  %v3918_v26 = vmul.f32 1.0614054, %v3912_v57  ;;  %v3818_v8 = vmul.f32 0.5, %v6869_v30 }
0x18b4   :  { %v3981_v23 = vmul.f32 %v5044_v37, %v3956_v35  ;;  %v3942_v1 = vadd.f32 -0.28449672, %v3937_v11 }
0x18b5   :  { %v4010_v6 = vmul.f32 %v4005_v10, %v3815_v62  ;;  %v3923_v16 = vadd.f32 -1.4531521, %v3918_v26  ;;  %v5046_v2 = vpop.eup %5045 }
0x18b6   :  { %v3986_v52 = vsub.f32 1.0, %v3981_v23  ;;  %v3947_v46 = vmul.f32 %v3942_v1, %v3897_v24  ;;  %v5048_v61 = vpop.eup %5047 }
0x18b7   :  { %v3928_v21 = vmul.f32 %v3923_v16, %v3912_v57  ;;  %4756 = vmatmul.msk.f32.gmra.mxu1 %vm1998_vm10, %v4010_v6 }
0x18b8   :  { %v3996_v20 = vsub.f32 0.0, %v3986_v52  ;;  %v3952_v55 = vadd.f32 0.2548296, %v3947_v46 }
0x18b9   :  { %v3933_v49 = vadd.f32 1.4214138, %v3928_v21 }
0x18ba   :  { %v4001_v13 = vsel %vm3991_vm8, %v3986_v52, %v3996_v20  ;;  %v3957_v56 = vmul.f32 %v3952_v55, %v3897_v24 }
0x18bb   :  { %v4006_v22 = vadd.f32 1.0, %v4001_v13  ;;  %v3938_v25 = vmul.f32 %v3933_v49, %v3912_v57 }
0x18bc   :  { %v3982_v31 = vmul.f32 %v5046_v2, %v3957_v56 }
0x18bd   :  { %v4011_v12 = vmul.f32 %v4006_v22, %v3816_v40  ;;  %v3943_v7 = vadd.f32 -0.28449672, %v3938_v25 }
0x18be   :  { %v3987_v53 = vsub.f32 1.0, %v3982_v31 }
0x18bf   :  { %v3948_v60 = vmul.f32 %v3943_v7, %v3912_v57  ;;  %4757 = vmatmul.msk.f32.gmra.mxu1 %vm1998_vm10, %v4011_v12 }
0x18c0   :  { %v3997_v51 = vsub.f32 0.0, %v3987_v53 }
0x18c1   :  { %v3953_v63 = vadd.f32 0.2548296, %v3948_v60 }
0x18c2   :  { %v4002_v9 = vsel %vm3992_vm9, %v3987_v53, %v3997_v51 }
0x18c3   :  { %v3958_v59 = vmul.f32 %v3953_v63, %v3912_v57  ;;  %v4007_v24 = vadd.f32 1.0, %v4002_v9 }
0x18c5   :  { %v3983_v43 = vmul.f32 %v5048_v61, %v3958_v59  ;;  %v4012_v45 = vmul.f32 %v4007_v24, %v3817_v4 }
0x18c7   :  { %v3988_v3 = vsub.f32 1.0, %v3983_v43  ;;  %4758 = vmatmul.msk.f32.gmra.mxu1 %vm1998_vm10, %v4012_v45 }
0x18c9   :  { %v3998_v27 = vsub.f32 0.0, %v3988_v3 }
0x18cb   :  { %v4003_v34 = vsel %vm3993_vm11, %v3988_v3, %v3998_v27 }
0x18cc   :  { %v4008_v58 = vadd.f32 1.0, %v4003_v34 }
0x18ce   :  { %v4013_v19 = vmul.f32 %v4008_v58, %v3818_v8 }
0x18d0   :  { %4759 = vmatmul.msk.f32.gmra.mxu1 %vm1998_vm10, %v4013_v19 }
0x192c   :  { %v4060_v50 = vpop.f32.mrf.mxu1 }
0x192d   :  { %v4061_v35 = vadd.f32 %v4811_v14, %v4060_v50 }
0x192f   :  { %v4075_v38 = vadd.f32 %v4061_v35, %v6762_v32 }
0x1931   :  { %v4084_v10 = vsel %vm158_vm1, %v4075_v38, 0.0 }
0x1934   :  { %v4063_v36 = vpop.f32.mrf.mxu1 }
0x1935   :  { %v4064_v47 = vadd.f32 %v4811_v14, %v4063_v36 }
0x1937   :  { %v4076_v23 = vadd.f32 %v4064_v47, %v6770_v17 }
0x193c   :  { %v4066_v28 = vpop.f32.mrf.mxu1 }
0x193d   :  { %v4067_v62 = vadd.f32 %v4811_v14, %v4066_v28 }
0x193f   :  { %v4077_v0 = vadd.f32 %v4067_v62, %v6777_v39 }
0x1941   :  { %v4090_v54 = vsel %vm158_vm1, %v4077_v0, 0.0 }
0x1942   :  { %4091 = vadd.xlane.f32.xlu1 %v4090_v54 }
0x1944   :  { %v4069_v41 = vpop.f32.mrf.mxu1 }
0x1945   :  { %v4070_v37 = vadd.f32 %v4811_v14, %v4069_v41 }
0x1947   :  { %v4078_v30 = vadd.f32 %v4070_v37, %v6784_v44  ;;  %v4087_v44 = vsel %vm158_vm1, %v4076_v23, 0.0 }
0x1949   :  { %v4093_v5 = vsel %vm158_vm1, %v4078_v30, 0.0 }
0x194a   :  { %4094 = vadd.xlane.f32.xlu0 %v4093_v5 }
0x194d   :  { %v4072_v18 = vpop.f32.mrf.mxu1 }
0x194e   :  { %v4073_v33 = vadd.f32 %v4811_v14, %v4072_v18 }
0x1950   :  { %v4079_v57 = vadd.f32 %v4073_v33, %v6791_v29 }
0x1952   :  { %v4096_v39 = vsel %vm1609_vm6, %v4079_v57, 0.0  ;;  %4085 = vadd.xlane.f32.xlu0 %v4084_v10 }
0x1953   :  { %4097 = vadd.xlane.f32.xlu2 %v4096_v39 }
0x195b   :  { %4088 = vadd.xlane.f32.xlu2 %v4087_v44 }
0x19b5   :  { %v4092_v11 = vpop.xlane.xlu1 %4091 }
0x19b6   :  { %v4101_v26 = vmul.f32 %v4092_v11, %v5846_v48 }
0x19b8   :  { %v6943_v6 = vsub.f32 %v4077_v0, %v4101_v26 }
0x19ba   :  { %v4111_v32 = vmul.f32 %v6943_v6, %v6943_v6 }
0x19bc   :  { %v4120_v29 = vsel %vm158_vm1, %v4111_v32, 0.0 }
0x19bd   :  { %4121 = vadd.xlane.f32.xlu0 %v4120_v29  ;;  %v4095_v52 = vpop.xlane.xlu0 %4094 }
0x19be   :  { %v4102_v1 = vmul.f32 %v4095_v52, %v5846_v48 }
0x19c0   :  { %v6949_v16 = vsub.f32 %v4078_v30, %v4102_v1 }
0x19c2   :  { %v4112_v17 = vmul.f32 %v6949_v16, %v6949_v16 }
0x19c4   :  { %v4123_v15 = vsel %vm158_vm1, %v4112_v17, 0.0 }
0x19c5   :  { %4124 = vadd.xlane.f32.xlu2 %v4123_v15  ;;  %v4086_v46 = vpop.xlane.xlu0 %4085  ;;  %v4812_v15 = vld [vmem:[%s7041_s19 + $0x1] ss:$0 sm:$0xff] }
0x19c6   :  { %v4098_v20 = vpop.xlane.xlu2 %4097  ;;  %v4099_v13 = vmul.f32 %v4086_v46, %v5846_v48 }
0x19c7   :  { %v4103_v21 = vmul.f32 %v4098_v20, %v5846_v48 }
0x19c8   :  { %v6958_v49 = vsub.f32 %v4075_v38, %v4099_v13 }
0x19c9   :  { %v6956_v55 = vsub.f32 %v4079_v57, %v4103_v21 }
0x19ca   :  { %v4109_v40 = vmul.f32 %v6958_v49, %v6958_v49 }
0x19cb   :  { %v4113_v22 = vmul.f32 %v6956_v55, %v6956_v55 }
0x19cc   :  { %v4114_v42 = vsel %vm158_vm1, %v4109_v40, 0.0 }
0x19cd   :  { %v4126_v56 = vsel %vm1609_vm6, %v4113_v22, 0.0  ;;  %4115 = vadd.xlane.f32.xlu2 %v4114_v42 }
0x19ce   :  { %v4089_v25 = vpop.xlane.xlu2 %4088  ;;  %4127 = vadd.xlane.f32.xlu1 %v4126_v56  ;;  %v4813_v56 = vld [vmem:[%s7042_s20 + $0x1] ss:$0 sm:$0xff] }
0x19cf   :  { %v4100_v2 = vmul.f32 %v4089_v25, %v5846_v48 }
0x19d1   :  { %v6967_v12 = vsub.f32 %v4076_v23, %v4100_v2 }
0x19d3   :  { %v4110_v31 = vmul.f32 %v6967_v12, %v6967_v12 }
0x19d5   :  { %v4117_v7 = vsel %vm158_vm1, %v4110_v31, 0.0 }
0x19d6   :  { %4118 = vadd.xlane.f32.xlu1 %v4117_v7 }
0x1a30   :  { %v4122_v53 = vpop.xlane.xlu0 %4121 }
0x1a31   :  { %v4131_v60 = vmul.f32 %v4122_v53, %v5846_v48 }
0x1a33   :  { %v4136_v51 = vadd.f32 1e-05, %v4131_v60 }
0x1a35   :  { %5049 = vrsqrt.f32 %v4136_v51  ;;  %vm4165_vm15 = vweird.f32 %v4136_v51 }
0x1a38   :  { %v4125_v63 = vpop.xlane.xlu2 %4124 }
0x1a39   :  { %v4132_v9 = vmul.f32 %v4125_v63, %v5846_v48 }
0x1a3b   :  { %v4137_v59 = vadd.f32 1e-05, %v4132_v9  ;;  %v5050_v61 = vpop.eup %5049 }
0x1a3c   :  { %v4160_v43 = vmul.f32 %v5050_v61, %v4136_v51  ;;  %vm4166_vm13 = vweird.f32 %v5050_v61 }
0x1a3d   :  { %5051 = vrsqrt.f32 %v4137_v59  ;;  %vm4175_vm12 = vweird.f32 %v4137_v59  ;;  %vm4167_vm5 = vmor %vm4165_vm15, %vm4166_vm13 }
0x1a3e   :  { %v4161_v19 = vmul.f32 %v5050_v61, %v4160_v43 }
0x1a40   :  { %v4116_v4 = vpop.xlane.xlu2 %4115  ;;  %v4162_v28 = vmul.f32 0.5, %v4161_v19 }
0x1a41   :  { %v4128_v24 = vpop.xlane.xlu1 %4127  ;;  %v4129_v45 = vmul.f32 %v4116_v4, %v5846_v48 }
0x1a42   :  { %v4133_v3 = vmul.f32 %v4128_v24, %v5846_v48  ;;  %v4163_v35 = vsub.f32 1.5, %v4162_v28 }
0x1a43   :  { %v5052_v27 = vpop.eup %5051  ;;  %v4134_v34 = vadd.f32 1e-05, %v4129_v45 }
0x1a44   :  { %v4138_v8 = vadd.f32 1e-05, %v4133_v3  ;;  %v4170_v58 = vmul.f32 %v5052_v27, %v4137_v59  ;;  %vm4176_vm10 = vweird.f32 %v5052_v27  ;;  %v4164_v47 = vmul.f32 %v5050_v61, %v4163_v35 }
0x1a45   :  { %5053 = vrsqrt.f32 %v4134_v34  ;;  %vm4177_vm14 = vmor %vm4175_vm12, %vm4176_vm10  ;;  %vm4145_vm9 = vweird.f32 %v4134_v34 }
0x1a46   :  { %v4171_v50 = vmul.f32 %v5052_v27, %v4170_v58  ;;  %5055 = vrsqrt.f32 %v4138_v8  ;;  %v4168_v32 = vsel %vm4167_vm5, %v5050_v61, %v4164_v47  ;;  %vm4185_vm0 = vweird.f32 %v4138_v8  ;;  %v4210_v61 = vld [vmem:[%s7077_s3] sm:$0x3] }
0x1a47   :  { %v4191_v13 = vmul.f32 %v4168_v32, %v6943_v6  ;;  %v4269_v58 = vld [vmem:[%s7045_s23] sm:$0xff] }
0x1a48   :  { %v4172_v36 = vmul.f32 0.5, %v4171_v50 }
0x1a49   :  { %v4119_v14 = vpop.xlane.xlu1 %4118  ;;  %v4199_v31 = vmul.f32 %v4812_v15, %v4191_v13 }
0x1a4a   :  { %v4130_v62 = vmul.f32 %v4119_v14, %v5846_v48  ;;  %v4173_v0 = vsub.f32 1.5, %v4172_v36 }
0x1a4b   :  { %v5054_v54 = vpop.eup %5053  ;;  %v4207_v60 = vadd.f32 %v4813_v56, %v4199_v31 }
0x1a4c   :  { %v4135_v41 = vadd.f32 1e-05, %v4130_v62  ;;  %v5056_v37 = vpop.eup %5055  ;;  %v4140_v30 = vmul.f32 %v5054_v54, %v4134_v34  ;;  %v4174_v18 = vmul.f32 %v5052_v27, %v4173_v0  ;;  %vm4146_vm7 = vweird.f32 %v5054_v54  ;;  %v4271_v34 = vld [vmem:[%s7045_s23 + $0x10] sm:$0xff] }
0x1a4d   :  { %v4180_v5 = vmul.f32 %v5056_v37, %v4138_v8  ;;  %vm4186_vm2 = vweird.f32 %v5056_v37  ;;  %vm4147_vm11 = vmor %vm4145_vm9, %vm4146_vm7  ;;  %v4270_v8 = vld [vmem:[%s7045_s23 + $0x8] sm:$0xff] }
0x1a4e   :  { %5057 = vrsqrt.f32 %v4135_v41  ;;  %v4141_v33 = vmul.f32 %v5054_v54, %v4140_v30  ;;  %v4178_v10 = vsel %vm4177_vm14, %v5052_v27, %v4174_v18  ;;  %vm4187_vm8 = vmor %vm4185_vm0, %vm4186_vm2  ;;  %vm4155_vm12 = vweird.f32 %v4135_v41  ;;  %v4272_v27 = vld [vmem:[%s7045_s23 + $0x18] sm:$0xff] }
0x1a4f   :  { %v4181_v38 = vmul.f32 %v5056_v37, %v4180_v5  ;;  %v4192_v52 = vmul.f32 %v4178_v10, %v6949_v16  ;;  %4292 = vmatpush.msra.mxu3 %v4272_v27  ;;  %vm4300_vm14 = vcmask 74752  }
0x1a50   :  { %v4142_v57 = vmul.f32 0.5, %v4141_v33  ;;  %v4816_v33 = vld [vmem:[%s7046_s24] ss:$0 sm:$0xff] }
0x1a51   :  { %v4182_v39 = vmul.f32 0.5, %v4181_v38  ;;  %v4200_v40 = vmul.f32 %v4812_v15, %v4192_v52  ;;  %4293 = vmatpush.msra.mxu3 %v4271_v34 }
0x1a52   :  { %v4143_v23 = vsub.f32 1.5, %v4142_v57 }
0x1a53   :  { %v4183_v11 = vsub.f32 1.5, %v4182_v39  ;;  %v4208_v6 = vadd.f32 %v4813_v56, %v4200_v40  ;;  %4294 = vmatpush.msra.mxu3 %v4270_v8 }
0x1a54   :  { %v5058_v44 = vpop.eup %5057  ;;  %v4144_v1 = vmul.f32 %v5054_v54, %v4143_v23 }
0x1a55   :  { %v4150_v26 = vmul.f32 %v5058_v44, %v4135_v41  ;;  %v4184_v29 = vmul.f32 %v5056_v37, %v4183_v11  ;;  %vm4156_vm10 = vweird.f32 %v5058_v44  ;;  %4295 = vmatpush.msra.mxu3 %v4269_v58 }
0x1a56   :  { %v4148_v22 = vsel %vm4147_vm11, %v5054_v54, %v4144_v1  ;;  %vm4157_vm13 = vmor %vm4155_vm12, %vm4156_vm10 }
0x1a57   :  { %v4151_v17 = vmul.f32 %v5058_v44, %v4150_v26  ;;  %v4188_v20 = vsel %vm4187_vm8, %v5056_v37, %v4184_v29  ;;  %v4814_v37 = vld [vmem:[%s7043_s21] ss:$0 sm:$0xff]  ;;  %s7078_s21 = sld [smem:[#allocation15_spill]] }
0x1a58   :  { %v4193_v46 = vmul.f32 %v4188_v20, %v6956_v55  ;;  %v4189_v55 = vmul.f32 %v4148_v22, %v6958_v49 }
0x1a59   :  { %v4152_v21 = vmul.f32 0.5, %v4151_v17 }
0x1a5a   :  { %v4201_v42 = vmul.f32 %v4812_v15, %v4193_v46  ;;  %v4197_v63 = vmul.f32 %v4812_v15, %v4189_v55 }
0x1a5b   :  { %v4153_v16 = vsub.f32 1.5, %v4152_v21 }
0x1a5c   :  { %v4209_v2 = vadd.f32 %v4813_v56, %v4201_v42  ;;  %v4205_v59 = vadd.f32 %v4813_v56, %v4197_v63 }
0x1a5d   :  { %v4154_v25 = vmul.f32 %v5058_v44, %v4153_v16  ;;  %s4309_s5 = sshll.u32 %s7078_s21, 4  ;;  %s4310_s5 = int_to_ptr.hbm [resolvable:$true] %s4309_s5 }
0x1a5e   :  { %4762 = vmatpush.msk.msra.mxu2 %vm431_vm3, %v4209_v2 }
0x1a5f   :  { %v4158_v7 = vsel %vm4157_vm13, %v5058_v44, %v4154_v25 }
0x1a60   :  { %v4190_v53 = vmul.f32 %v4158_v7, %v6967_v12  ;;  %4229 = vmatpush.msra.mxu2 %v4208_v6 }
0x1a62   :  { %v4198_v51 = vmul.f32 %v4812_v15, %v4190_v53  ;;  %4230 = vmatpush.msra.mxu2 %v4207_v60 }
0x1a64   :  { %v4206_v9 = vadd.f32 %v4813_v56, %v4198_v51 }
0x1a66   :  { %4231 = vmatpush.msra.mxu2 %v4206_v9 }
0x1a68   :  { %4232 = vmatpush.msra.mxu2 %v4205_v59 }
0x1a69   :  { %4763 = vmatmul.msk.f32.vlgmr.msra.gmra.mxu2 %vm359_vm4, %v4210_v61 }
0x1aec   :  { %v4234_v49 = vpop.f32.mrf.mxu2 }
0x1aed   :  { %v4239_v4 = vsel %vm1609_vm6, %v4234_v49, 0.0 }
0x1aee   :  { %4240 = vadd.xlane.f32.xlu0 %v4239_v4 }
0x1b61   :  { %v4241_v12 = vpop.xlane.xlu0 %4240 }
0x1b62   :  { %v4242_v24 = vmul.f32 %v4241_v12, %v5846_v48 }
0x1b64   :  { %v4243_v43 = vsub.f32 %v4234_v49, %v4242_v24 }
0x1b66   :  { %v4244_v45 = vmul.f32 %v4243_v43, %v4243_v43 }
0x1b68   :  { %v4245_v3 = vsel %vm1609_vm6, %v4244_v45, 0.0 }
0x1b69   :  { %4246 = vadd.xlane.f32.xlu1 %v4245_v3 }
0x1bdc   :  { %v4247_v19 = vpop.xlane.xlu1 %4246 }
0x1bdd   :  { %v4248_v50 = vmul.f32 %v4247_v19, %v5846_v48  ;;  %v4815_v48 = vld [vmem:[%s7044_s22] ss:$0 sm:$0xff] }
0x1bdf   :  { %v4249_v36 = vadd.f32 1e-05, %v4248_v50 }
0x1be1   :  { %5059 = vrsqrt.f32 %v4249_v36  ;;  %vm4256_vm4 = vweird.f32 %v4249_v36 }
0x1be7   :  { %v5060_v14 = vpop.eup %5059 }
0x1be8   :  { %v4251_v28 = vmul.f32 %v5060_v14, %v4249_v36  ;;  %vm4257_vm3 = vweird.f32 %v5060_v14 }
0x1be9   :  { %vm4258_vm6 = vmor %vm4256_vm4, %vm4257_vm3 }
0x1bea   :  { %v4252_v62 = vmul.f32 %v5060_v14, %v4251_v28 }
0x1bec   :  { %v4253_v0 = vmul.f32 0.5, %v4252_v62 }
0x1bee   :  { %v4254_v54 = vsub.f32 1.5, %v4253_v0 }
0x1bf0   :  { %v4255_v41 = vmul.f32 %v5060_v14, %v4254_v54 }
0x1bf2   :  { %v4259_v30 = vsel %vm4258_vm6, %v5060_v14, %v4255_v41 }
0x1bf3   :  { %v4260_v35 = vmul.f32 %v4259_v30, %v4243_v43 }
0x1bf5   :  { %v4264_v5 = vmul.f32 %v4814_v37, %v4260_v35 }
0x1bf7   :  { %v4268_v18 = vadd.f32 %v4815_v48, %v4264_v5 }
0x1bf9   :  { %4764 = vmatmul.msk.f32.vlgmr.msra.gmra.mxu3 %vm158_vm1, %v4268_v18 }
0x1c7c   :  { %v4297_v38 = vpop.f32.mrf.mxu3 }
0x1c7d   :  { %v4298_v57 = vadd.f32 %v4816_v33, %v4297_v38 }
0x1c7f   :  { %4301 = vst.msk [vmem:[#allocation2] sm:$0x3] %vm4300_vm14, %v4298_v57 }
0x1c80   :  { %4312 = dma.vmem_to_hbm [thread:$0]  %s4308_s8, 32, %s4310_s5, [#allocation3]  }
0x1c81   :  { %5100 = dma.done.wait [#allocation3], 32  }
0x1c82   :  { %5101 = vsyncadd [#allocation3], 4294967264 }
0x1c83   :  { %4317 = vsyncpa [#allocation3], 1 }

</bundles_post_ra>
